<compile_context>
chip_gen: v7x
topology: tpu7x:2x2x1
jax: 0.10.0
libtpu: 0.0.40
codegen_flags: <defaults>
</compile_context>

<pallas_src>
import math

import jax
import jax.numpy as jnp
from jax import lax
from jax.experimental import pallas as pl
from jax.experimental.pallas import tpu as pltpu


# ---------------------------------------------------------------------------
# Fused encoder kernel (one batch element per grid step)
# ---------------------------------------------------------------------------
def _encoder_kernel(x_ref, w1_ref, b1_ref, w2_ref, b2_ref, o_ref,
                    xp1_ref, y1_ref, xp2_ref, y2_ref):
    # x_ref : (1, H, W, Cin)       f32   input tile (NHWC)
    # w1_ref: (k*k, Cin, C1)       bf16  conv1 taps
    # b1_ref: (1, C1)              f32
    # w2_ref: (k*k, C1, C2)        bf16  conv2 taps
    # b2_ref: (1, C2)              f32
    # o_ref : (1, H//4, W//4, C2)  f32   output tile (NHWC)
    # scratch: xp1 (H+4, W+4, Cin), y1 (H, W, C1),
    #          xp2 (H/2+4, W/2+4, C1), y2 (H/2, W/2, C2)  -- all f32 VMEM
    _, H, W, Cin = x_ref.shape
    KK, _, C1 = w1_ref.shape
    C2 = w2_ref.shape[-1]
    k = math.isqrt(KK)
    p = k // 2
    Ho, Wo = H // 2, W // 2          # after pool 1
    Hq, Wq = Ho // 2, Wo // 2        # after pool 2

    # ---------------- conv1 (5x5, pad 2) + bias + ReLU ----------------
    xp1_ref[...] = jnp.zeros(xp1_ref.shape, xp1_ref.dtype)
    xp1_ref[p:p + H, p:p + W, :] = x_ref[0]

    acc = jnp.zeros((H * W, C1), jnp.float32)
    for t in range(KK):                                   # unrolled taps
        dy, dx = divmod(t, k)
        patch = xp1_ref[dy:dy + H, dx:dx + W, :].reshape(H * W, Cin)
        acc = acc + jnp.dot(patch.astype(jnp.bfloat16), w1_ref[t],
                            preferred_element_type=jnp.float32)
    y1_ref[...] = jnp.maximum(acc + b1_ref[...], 0.0).reshape(H, W, C1)

    # ---------------- maxpool 2x2/2  -> padded conv2 input -------------
    xp2_ref[...] = jnp.zeros(xp2_ref.shape, xp2_ref.dtype)
    wmax = jnp.maximum(y1_ref[:, pl.ds(0, Wo, 2), :],      # even W columns
                       y1_ref[:, pl.ds(1, Wo, 2), :])      # odd  W columns
    wmax = wmax.reshape(Ho, 2, Wo, C1)                     # leading-dim split
    xp2_ref[p:p + Ho, p:p + Wo, :] = jnp.maximum(wmax[:, 0], wmax[:, 1])

    # ---------------- conv2 (5x5, pad 2) + bias + ReLU ------------------
    acc2 = jnp.zeros((Ho * Wo, C2), jnp.float32)
    for t in range(KK):
        dy, dx = divmod(t, k)
        patch = xp2_ref[dy:dy + Ho, dx:dx + Wo, :].reshape(Ho * Wo, C1)
        acc2 = acc2 + jnp.dot(patch.astype(jnp.bfloat16), w2_ref[t],
                              preferred_element_type=jnp.float32)
    y2_ref[...] = jnp.maximum(acc2 + b2_ref[...], 0.0).reshape(Ho, Wo, C2)

    # ---------------- maxpool 2x2/2  -> output --------------------------
    wmax2 = jnp.maximum(y2_ref[:, pl.ds(0, Wq, 2), :],
                        y2_ref[:, pl.ds(1, Wq, 2), :])
    wmax2 = wmax2.reshape(Hq, 2, Wq, C2)
    o_ref[0] = jnp.maximum(wmax2[:, 0], wmax2[:, 1]).astype(o_ref.dtype)


# ---------------------------------------------------------------------------
# Wrapper
# ---------------------------------------------------------------------------
def encoder_forward(wrf_nchw, params):
    """wrf: (N, 29, H, W) f32 (NCHW, like PyTorch). Returns (N, 32, H/4, W/4)."""
    w1, b1, w2, b2 = params                  # w* are HWIO
    N, Cin, H, W = wrf_nchw.shape
    k = w1.shape[0]
    C1, C2 = w1.shape[-1], w2.shape[-1]
    # TODO(synk): odd H/W (PyTorch MaxPool2d floor mode) not supported here;
    #             requires H % 4 == 0 and W % 4 == 0.
    assert H % 4 == 0 and W % 4 == 0, (H, W)

    x = jnp.transpose(wrf_nchw, (0, 2, 3, 1))                    # NCHW -> NHWC
    w1r = w1.reshape(k * k, Cin, C1).astype(jnp.bfloat16)        # (tap, Cin, C1)
    w2r = w2.reshape(k * k, C1, C2).astype(jnp.bfloat16)
    b1r = b1.reshape(1, C1).astype(jnp.float32)
    b2r = b2.reshape(1, C2).astype(jnp.float32)

    out = pl.pallas_call(
        _encoder_kernel,
        out_shape=jax.ShapeDtypeStruct((N, H // 4, W // 4, C2), jnp.float32),
        grid_spec=pltpu.PrefetchScalarGridSpec(
            num_scalar_prefetch=0,
            grid=(N,),
            in_specs=[
                pl.BlockSpec((1, H, W, Cin), lambda n: (n, 0, 0, 0)),
                pl.BlockSpec((k * k, Cin, C1), lambda n: (0, 0, 0)),
                pl.BlockSpec((1, C1), lambda n: (0, 0)),
                pl.BlockSpec((k * k, C1, C2), lambda n: (0, 0, 0)),
                pl.BlockSpec((1, C2), lambda n: (0, 0)),
            ],
            out_specs=pl.BlockSpec((1, H // 4, W // 4, C2),
                                   lambda n: (n, 0, 0, 0)),
            scratch_shapes=[
                pltpu.VMEM((H + 4, W + 4, Cin), jnp.float32),        # padded in1
                pltpu.VMEM((H, W, C1), jnp.float32),                 # conv1 out
                pltpu.VMEM((H // 2 + 4, W // 2 + 4, C1), jnp.float32),  # padded in2
                pltpu.VMEM((H // 2, W // 2, C2), jnp.float32),       # conv2 out
            ],
        ),
        compiler_params=pltpu.CompilerParams(
            dimension_semantics=("parallel",),          # batch steps split over TCs
            vmem_limit_bytes=32 * 1024 * 1024,          # well under v7x 64 MiB
        ),
    )(x, w1r, b1r, w2r, b2r)
    return jnp.transpose(out, (0, 3, 1, 2))                      # NHWC -> NCHW


# ---------------------------------------------------------------------------
# Pure-JAX reference (silent correctness check)
# ---------------------------------------------------------------------------
def _ref_forward(wrf_nchw, params):
    w1, b1, w2, b2 = params
    x = jnp.transpose(wrf_nchw, (0, 2, 3, 1))

    def block(x, w, b):
        y = lax.conv_general_dilated(
            x, w, window_strides=(1, 1), padding=((2, 2), (2, 2)),
            dimension_numbers=("NHWC", "HWIO", "NHWC"),
            precision=lax.Precision.HIGHEST,
        ) + b
        y = jnp.maximum(y, 0.0)
        return lax.reduce_window(
            y, -jnp.inf, lax.max, (1, 2, 2, 1), (1, 2, 2, 1), "VALID"
        )

    x = block(x, w1, b1)
    x = block(x, w2, b2)
    return jnp.transpose(x, (0, 3, 1, 2))


# ---------------------------------------------------------------------------
# Parameter init (deterministic, PyTorch-default-style uniform bounds)
# ---------------------------------------------------------------------------
def init_params(key):
    k1, k2, k3, k4 = jax.random.split(key, 4)
    bound1 = 1.0 / math.sqrt(29 * 5 * 5)
    bound2 = 1.0 / math.sqrt(32 * 5 * 5)
    w1 = jax.random.uniform(k1, (5, 5, 29, 32), jnp.float32, -bound1, bound1)
    b1 = jax.random.uniform(k2, (32,), jnp.float32, -bound1, bound1)
    w2 = jax.random.uniform(k3, (5, 5, 32, 32), jnp.float32, -bound2, bound2)
    b2 = jax.random.uniform(k4, (32,), jnp.float32, -bound2, bound2)
    return (w1, b1, w2, b2)


if __name__ == "__main__":
    key = jax.random.PRNGKey(0)
    kx, kp = jax.random.split(key)
    params = init_params(kp)

    # Small input consistent with the module: N=2, C=29 (fixed by Conv2d), 16x16 spatial.
    wrf = jax.random.normal(kx, (2, 29, 16, 16), dtype=jnp.float32)

    out = jax.block_until_ready(encoder_forward(wrf, params))
    assert out.shape == (2, 32, 4, 4), out.shape

    ref = jax.block_until_ready(_ref_forward(wrf, params))
    err = float(jnp.max(jnp.abs(out - ref)))
    assert jnp.allclose(out, ref, atol=2e-2, rtol=2e-2), err

    print("KERNEL_OK")
</pallas_src>

<mosaic_0001>
module attributes {stable_mosaic.version = 11 : i64} {
  func.func @_encoder_kernel(%arg0: i32, %arg1: memref<1x16x16x29xf32, #tpu.memory_space<vmem>>, %arg2: memref<25x29x32xbf16, #tpu.memory_space<vmem>>, %arg3: memref<1x32xf32, #tpu.memory_space<vmem>>, %arg4: memref<25x32x32xbf16, #tpu.memory_space<vmem>>, %arg5: memref<1x32xf32, #tpu.memory_space<vmem>>, %arg6: memref<1x4x4x32xf32, #tpu.memory_space<vmem>>, %arg7: memref<20x20x29xf32, #tpu.memory_space<vmem>>, %arg8: memref<16x16x32xf32, #tpu.memory_space<vmem>>, %arg9: memref<12x12x32xf32, #tpu.memory_space<vmem>>, %arg10: memref<8x8x32xf32, #tpu.memory_space<vmem>>) attributes {dimension_semantics = [#tpu.dimension_semantics<parallel>], iteration_bounds = array<i64: 2>, scalar_prefetch = 0 : i64, scratch_operands = 4 : i64, tpu.core_type = #tpu.core_type<tc>, window_params = [{transform_indices = @transform_0, window_bounds = array<i64: 1, 16, 16, 29>}, {pipeline_mode = #tpu.pipeline_mode<synchronous>, transform_indices = @transform_1, window_bounds = array<i64: 25, 29, 32>}, {pipeline_mode = #tpu.pipeline_mode<synchronous>, transform_indices = @transform_2, window_bounds = array<i64: 1, 32>}, {pipeline_mode = #tpu.pipeline_mode<synchronous>, transform_indices = @transform_3, window_bounds = array<i64: 25, 32, 32>}, {pipeline_mode = #tpu.pipeline_mode<synchronous>, transform_indices = @transform_4, window_bounds = array<i64: 1, 32>}, {transform_indices = @transform_5, window_bounds = array<i64: 1, 4, 4, 32>}]} {
    %cst = arith.constant 0.000000e+00 : f32
    %0 = vector.broadcast %cst : f32 to vector<20x20x29xf32>
    %c0 = arith.constant 0 : index
    %c0_0 = arith.constant 0 : index
    %c0_1 = arith.constant 0 : index
    %1 = vector.load %arg7[%c0, %c0_0, %c0_1] : memref<20x20x29xf32, #tpu.memory_space<vmem>>, vector<20x20x29xf32>
    tpu.vector_store %arg7[%c0, %c0_0, %c0_1], %0 {strides = array<i32>} : memref<20x20x29xf32, #tpu.memory_space<vmem>>, vector<20x20x29xf32>,
    %c0_2 = arith.constant 0 : index
    %c0_3 = arith.constant 0 : index
    %c0_4 = arith.constant 0 : index
    %c0_5 = arith.constant 0 : index
    %2 = vector.load %arg1[%c0_2, %c0_3, %c0_4, %c0_5] : memref<1x16x16x29xf32, #tpu.memory_space<vmem>>, vector<1x16x16x29xf32>
    %3 = vector.shape_cast %2 : vector<1x16x16x29xf32> to vector<16x16x29xf32>
    %c2 = arith.constant 2 : index
    %c2_6 = arith.constant 2 : index
    %c0_7 = arith.constant 0 : index
    %4 = vector.load %arg7[%c2, %c2_6, %c0_7] : memref<20x20x29xf32, #tpu.memory_space<vmem>>, vector<16x16x29xf32>
    tpu.vector_store %arg7[%c2, %c2_6, %c0_7], %3 {strides = array<i32>} : memref<20x20x29xf32, #tpu.memory_space<vmem>>, vector<16x16x29xf32>,
    %cst_8 = arith.constant 0.000000e+00 : f32
    %5 = vector.broadcast %cst_8 : f32 to vector<256x32xf32>
    %c0_9 = arith.constant 0 : index
    %c0_10 = arith.constant 0 : index
    %c0_11 = arith.constant 0 : index
    %6 = vector.load %arg7[%c0_9, %c0_10, %c0_11] : memref<20x20x29xf32, #tpu.memory_space<vmem>>, vector<16x16x29xf32>
    %7 = vector.shape_cast %6 : vector<16x16x29xf32> to vector<256x29xf32>
    %8 = arith.truncf %7 : vector<256x29xf32> to vector<256x29xbf16>
    %c0_12 = arith.constant 0 : index
    %c0_13 = arith.constant 0 : index
    %c0_14 = arith.constant 0 : index
    %9 = vector.load %arg2[%c0_12, %c0_13, %c0_14] : memref<25x29x32xbf16, #tpu.memory_space<vmem>>, vector<1x29x32xbf16>
    %10 = vector.shape_cast %9 : vector<1x29x32xbf16> to vector<29x32xbf16>
    %cst_15 = arith.constant dense<0.000000e+00> : vector<256x32xf32>
    %11 = tpu.matmul %8, %10, %cst_15 {dimension_numbers = #tpu.dot_dimension_numbers<[1], [0], [0], [1], [0, 0, 1, 1], [], []>} : vector<256x29xbf16>, vector<29x32xbf16>, vector<256x32xf32> -> vector<256x32xf32>
    %12 = arith.addf %5, %11 : vector<256x32xf32>
    %c0_16 = arith.constant 0 : index
    %c1 = arith.constant 1 : index
    %c0_17 = arith.constant 0 : index
    %13 = vector.load %arg7[%c0_16, %c1, %c0_17] : memref<20x20x29xf32, #tpu.memory_space<vmem>>, vector<16x16x29xf32>
    %14 = vector.shape_cast %13 : vector<16x16x29xf32> to vector<256x29xf32>
    %15 = arith.truncf %14 : vector<256x29xf32> to vector<256x29xbf16>
    %c1_18 = arith.constant 1 : index
    %c0_19 = arith.constant 0 : index
    %c0_20 = arith.constant 0 : index
    %16 = vector.load %arg2[%c1_18, %c0_19, %c0_20] : memref<25x29x32xbf16, #tpu.memory_space<vmem>>, vector<1x29x32xbf16>
    %17 = vector.shape_cast %16 : vector<1x29x32xbf16> to vector<29x32xbf16>
    %cst_21 = arith.constant dense<0.000000e+00> : vector<256x32xf32>
    %18 = tpu.matmul %15, %17, %cst_21 {dimension_numbers = #tpu.dot_dimension_numbers<[1], [0], [0], [1], [0, 0, 1, 1], [], []>} : vector<256x29xbf16>, vector<29x32xbf16>, vector<256x32xf32> -> vector<256x32xf32>
    %19 = arith.addf %12, %18 : vector<256x32xf32>
    %c0_22 = arith.constant 0 : index
    %c2_23 = arith.constant 2 : index
    %c0_24 = arith.constant 0 : index
    %20 = vector.load %arg7[%c0_22, %c2_23, %c0_24] : memref<20x20x29xf32, #tpu.memory_space<vmem>>, vector<16x16x29xf32>
    %21 = vector.shape_cast %20 : vector<16x16x29xf32> to vector<256x29xf32>
    %22 = arith.truncf %21 : vector<256x29xf32> to vector<256x29xbf16>
    %c2_25 = arith.constant 2 : index
    %c0_26 = arith.constant 0 : index
    %c0_27 = arith.constant 0 : index
    %23 = vector.load %arg2[%c2_25, %c0_26, %c0_27] : memref<25x29x32xbf16, #tpu.memory_space<vmem>>, vector<1x29x32xbf16>
    %24 = vector.shape_cast %23 : vector<1x29x32xbf16> to vector<29x32xbf16>
    %cst_28 = arith.constant dense<0.000000e+00> : vector<256x32xf32>
    %25 = tpu.matmul %22, %24, %cst_28 {dimension_numbers = #tpu.dot_dimension_numbers<[1], [0], [0], [1], [0, 0, 1, 1], [], []>} : vector<256x29xbf16>, vector<29x32xbf16>, vector<256x32xf32> -> vector<256x32xf32>
    %26 = arith.addf %19, %25 : vector<256x32xf32>
    %c0_29 = arith.constant 0 : index
    %c3 = arith.constant 3 : index
    %c0_30 = arith.constant 0 : index
    %27 = vector.load %arg7[%c0_29, %c3, %c0_30] : memref<20x20x29xf32, #tpu.memory_space<vmem>>, vector<16x16x29xf32>
    %28 = vector.shape_cast %27 : vector<16x16x29xf32> to vector<256x29xf32>
    %29 = arith.truncf %28 : vector<256x29xf32> to vector<256x29xbf16>
    %c3_31 = arith.constant 3 : index
    %c0_32 = arith.constant 0 : index
    %c0_33 = arith.constant 0 : index
    %30 = vector.load %arg2[%c3_31, %c0_32, %c0_33] : memref<25x29x32xbf16, #tpu.memory_space<vmem>>, vector<1x29x32xbf16>
    %31 = vector.shape_cast %30 : vector<1x29x32xbf16> to vector<29x32xbf16>
    %cst_34 = arith.constant dense<0.000000e+00> : vector<256x32xf32>
    %32 = tpu.matmul %29, %31, %cst_34 {dimension_numbers = #tpu.dot_dimension_numbers<[1], [0], [0], [1], [0, 0, 1, 1], [], []>} : vector<256x29xbf16>, vector<29x32xbf16>, vector<256x32xf32> -> vector<256x32xf32>
    %33 = arith.addf %26, %32 : vector<256x32xf32>
    %c0_35 = arith.constant 0 : index
    %c4 = arith.constant 4 : index
    %c0_36 = arith.constant 0 : index
    %34 = vector.load %arg7[%c0_35, %c4, %c0_36] : memref<20x20x29xf32, #tpu.memory_space<vmem>>, vector<16x16x29xf32>
    %35 = vector.shape_cast %34 : vector<16x16x29xf32> to vector<256x29xf32>
    %36 = arith.truncf %35 : vector<256x29xf32> to vector<256x29xbf16>
    %c4_37 = arith.constant 4 : index
    %c0_38 = arith.constant 0 : index
    %c0_39 = arith.constant 0 : index
    %37 = vector.load %arg2[%c4_37, %c0_38, %c0_39] : memref<25x29x32xbf16, #tpu.memory_space<vmem>>, vector<1x29x32xbf16>
    %38 = vector.shape_cast %37 : vector<1x29x32xbf16> to vector<29x32xbf16>
    %cst_40 = arith.constant dense<0.000000e+00> : vector<256x32xf32>
    %39 = tpu.matmul %36, %38, %cst_40 {dimension_numbers = #tpu.dot_dimension_numbers<[1], [0], [0], [1], [0, 0, 1, 1], [], []>} : vector<256x29xbf16>, vector<29x32xbf16>, vector<256x32xf32> -> vector<256x32xf32>
    %40 = arith.addf %33, %39 : vector<256x32xf32>
    %c1_41 = arith.constant 1 : index
    %c0_42 = arith.constant 0 : index
    %c0_43 = arith.constant 0 : index
    %41 = vector.load %arg7[%c1_41, %c0_42, %c0_43] : memref<20x20x29xf32, #tpu.memory_space<vmem>>, vector<16x16x29xf32>
    %42 = vector.shape_cast %41 : vector<16x16x29xf32> to vector<256x29xf32>
    %43 = arith.truncf %42 : vector<256x29xf32> to vector<256x29xbf16>
    %c5 = arith.constant 5 : index
    %c0_44 = arith.constant 0 : index
    %c0_45 = arith.constant 0 : index
    %44 = vector.load %arg2[%c5, %c0_44, %c0_45] : memref<25x29x32xbf16, #tpu.memory_space<vmem>>, vector<1x29x32xbf16>
    %45 = vector.shape_cast %44 : vector<1x29x32xbf16> to vector<29x32xbf16>
    %cst_46 = arith.constant dense<0.000000e+00> : vector<256x32xf32>
    %46 = tpu.matmul %43, %45, %cst_46 {dimension_numbers = #tpu.dot_dimension_numbers<[1], [0], [0], [1], [0, 0, 1, 1], [], []>} : vector<256x29xbf16>, vector<29x32xbf16>, vector<256x32xf32> -> vector<256x32xf32>
    %47 = arith.addf %40, %46 : vector<256x32xf32>
    %c1_47 = arith.constant 1 : index
    %c1_48 = arith.constant 1 : index
    %c0_49 = arith.constant 0 : index
    %48 = vector.load %arg7[%c1_47, %c1_48, %c0_49] : memref<20x20x29xf32, #tpu.memory_space<vmem>>, vector<16x16x29xf32>
    %49 = vector.shape_cast %48 : vector<16x16x29xf32> to vector<256x29xf32>
    %50 = arith.truncf %49 : vector<256x29xf32> to vector<256x29xbf16>
    %c6 = arith.constant 6 : index
    %c0_50 = arith.constant 0 : index
    %c0_51 = arith.constant 0 : index
    %51 = vector.load %arg2[%c6, %c0_50, %c0_51] : memref<25x29x32xbf16, #tpu.memory_space<vmem>>, vector<1x29x32xbf16>
    %52 = vector.shape_cast %51 : vector<1x29x32xbf16> to vector<29x32xbf16>
    %cst_52 = arith.constant dense<0.000000e+00> : vector<256x32xf32>
    %53 = tpu.matmul %50, %52, %cst_52 {dimension_numbers = #tpu.dot_dimension_numbers<[1], [0], [0], [1], [0, 0, 1, 1], [], []>} : vector<256x29xbf16>, vector<29x32xbf16>, vector<256x32xf32> -> vector<256x32xf32>
    %54 = arith.addf %47, %53 : vector<256x32xf32>
    %c1_53 = arith.constant 1 : index
    %c2_54 = arith.constant 2 : index
    %c0_55 = arith.constant 0 : index
    %55 = vector.load %arg7[%c1_53, %c2_54, %c0_55] : memref<20x20x29xf32, #tpu.memory_space<vmem>>, vector<16x16x29xf32>
    %56 = vector.shape_cast %55 : vector<16x16x29xf32> to vector<256x29xf32>
    %57 = arith.truncf %56 : vector<256x29xf32> to vector<256x29xbf16>
    %c7 = arith.constant 7 : index
    %c0_56 = arith.constant 0 : index
    %c0_57 = arith.constant 0 : index
    %58 = vector.load %arg2[%c7, %c0_56, %c0_57] : memref<25x29x32xbf16, #tpu.memory_space<vmem>>, vector<1x29x32xbf16>
    %59 = vector.shape_cast %58 : vector<1x29x32xbf16> to vector<29x32xbf16>
    %cst_58 = arith.constant dense<0.000000e+00> : vector<256x32xf32>
    %60 = tpu.matmul %57, %59, %cst_58 {dimension_numbers = #tpu.dot_dimension_numbers<[1], [0], [0], [1], [0, 0, 1, 1], [], []>} : vector<256x29xbf16>, vector<29x32xbf16>, vector<256x32xf32> -> vector<256x32xf32>
    %61 = arith.addf %54, %60 : vector<256x32xf32>
    %c1_59 = arith.constant 1 : index
    %c3_60 = arith.constant 3 : index
    %c0_61 = arith.constant 0 : index
    %62 = vector.load %arg7[%c1_59, %c3_60, %c0_61] : memref<20x20x29xf32, #tpu.memory_space<vmem>>, vector<16x16x29xf32>
    %63 = vector.shape_cast %62 : vector<16x16x29xf32> to vector<256x29xf32>
    %64 = arith.truncf %63 : vector<256x29xf32> to vector<256x29xbf16>
    %c8 = arith.constant 8 : index
    %c0_62 = arith.constant 0 : index
    %c0_63 = arith.constant 0 : index
    %65 = vector.load %arg2[%c8, %c0_62, %c0_63] : memref<25x29x32xbf16, #tpu.memory_space<vmem>>, vector<1x29x32xbf16>
    %66 = vector.shape_cast %65 : vector<1x29x32xbf16> to vector<29x32xbf16>
    %cst_64 = arith.constant dense<0.000000e+00> : vector<256x32xf32>
    %67 = tpu.matmul %64, %66, %cst_64 {dimension_numbers = #tpu.dot_dimension_numbers<[1], [0], [0], [1], [0, 0, 1, 1], [], []>} : vector<256x29xbf16>, vector<29x32xbf16>, vector<256x32xf32> -> vector<256x32xf32>
    %68 = arith.addf %61, %67 : vector<256x32xf32>
    %c1_65 = arith.constant 1 : index
    %c4_66 = arith.constant 4 : index
    %c0_67 = arith.constant 0 : index
    %69 = vector.load %arg7[%c1_65, %c4_66, %c0_67] : memref<20x20x29xf32, #tpu.memory_space<vmem>>, vector<16x16x29xf32>
    %70 = vector.shape_cast %69 : vector<16x16x29xf32> to vector<256x29xf32>
    %71 = arith.truncf %70 : vector<256x29xf32> to vector<256x29xbf16>
    %c9 = arith.constant 9 : index
    %c0_68 = arith.constant 0 : index
    %c0_69 = arith.constant 0 : index
    %72 = vector.load %arg2[%c9, %c0_68, %c0_69] : memref<25x29x32xbf16, #tpu.memory_space<vmem>>, vector<1x29x32xbf16>
    %73 = vector.shape_cast %72 : vector<1x29x32xbf16> to vector<29x32xbf16>
    %cst_70 = arith.constant dense<0.000000e+00> : vector<256x32xf32>
    %74 = tpu.matmul %71, %73, %cst_70 {dimension_numbers = #tpu.dot_dimension_numbers<[1], [0], [0], [1], [0, 0, 1, 1], [], []>} : vector<256x29xbf16>, vector<29x32xbf16>, vector<256x32xf32> -> vector<256x32xf32>
    %75 = arith.addf %68, %74 : vector<256x32xf32>
    %c2_71 = arith.constant 2 : index
    %c0_72 = arith.constant 0 : index
    %c0_73 = arith.constant 0 : index
    %76 = vector.load %arg7[%c2_71, %c0_72, %c0_73] : memref<20x20x29xf32, #tpu.memory_space<vmem>>, vector<16x16x29xf32>
    %77 = vector.shape_cast %76 : vector<16x16x29xf32> to vector<256x29xf32>
    %78 = arith.truncf %77 : vector<256x29xf32> to vector<256x29xbf16>
    %c10 = arith.constant 10 : index
    %c0_74 = arith.constant 0 : index
    %c0_75 = arith.constant 0 : index
    %79 = vector.load %arg2[%c10, %c0_74, %c0_75] : memref<25x29x32xbf16, #tpu.memory_space<vmem>>, vector<1x29x32xbf16>
    %80 = vector.shape_cast %79 : vector<1x29x32xbf16> to vector<29x32xbf16>
    %cst_76 = arith.constant dense<0.000000e+00> : vector<256x32xf32>
    %81 = tpu.matmul %78, %80, %cst_76 {dimension_numbers = #tpu.dot_dimension_numbers<[1], [0], [0], [1], [0, 0, 1, 1], [], []>} : vector<256x29xbf16>, vector<29x32xbf16>, vector<256x32xf32> -> vector<256x32xf32>
    %82 = arith.addf %75, %81 : vector<256x32xf32>
    %c2_77 = arith.constant 2 : index
    %c1_78 = arith.constant 1 : index
    %c0_79 = arith.constant 0 : index
    %83 = vector.load %arg7[%c2_77, %c1_78, %c0_79] : memref<20x20x29xf32, #tpu.memory_space<vmem>>, vector<16x16x29xf32>
    %84 = vector.shape_cast %83 : vector<16x16x29xf32> to vector<256x29xf32>
    %85 = arith.truncf %84 : vector<256x29xf32> to vector<256x29xbf16>
    %c11 = arith.constant 11 : index
    %c0_80 = arith.constant 0 : index
    %c0_81 = arith.constant 0 : index
    %86 = vector.load %arg2[%c11, %c0_80, %c0_81] : memref<25x29x32xbf16, #tpu.memory_space<vmem>>, vector<1x29x32xbf16>
    %87 = vector.shape_cast %86 : vector<1x29x32xbf16> to vector<29x32xbf16>
    %cst_82 = arith.constant dense<0.000000e+00> : vector<256x32xf32>
    %88 = tpu.matmul %85, %87, %cst_82 {dimension_numbers = #tpu.dot_dimension_numbers<[1], [0], [0], [1], [0, 0, 1, 1], [], []>} : vector<256x29xbf16>, vector<29x32xbf16>, vector<256x32xf32> -> vector<256x32xf32>
    %89 = arith.addf %82, %88 : vector<256x32xf32>
    %c2_83 = arith.constant 2 : index
    %c2_84 = arith.constant 2 : index
    %c0_85 = arith.constant 0 : index
    %90 = vector.load %arg7[%c2_83, %c2_84, %c0_85] : memref<20x20x29xf32, #tpu.memory_space<vmem>>, vector<16x16x29xf32>
    %91 = vector.shape_cast %90 : vector<16x16x29xf32> to vector<256x29xf32>
    %92 = arith.truncf %91 : vector<256x29xf32> to vector<256x29xbf16>
    %c12 = arith.constant 12 : index
    %c0_86 = arith.constant 0 : index
    %c0_87 = arith.constant 0 : index
    %93 = vector.load %arg2[%c12, %c0_86, %c0_87] : memref<25x29x32xbf16, #tpu.memory_space<vmem>>, vector<1x29x32xbf16>
    %94 = vector.shape_cast %93 : vector<1x29x32xbf16> to vector<29x32xbf16>
    %cst_88 = arith.constant dense<0.000000e+00> : vector<256x32xf32>
    %95 = tpu.matmul %92, %94, %cst_88 {dimension_numbers = #tpu.dot_dimension_numbers<[1], [0], [0], [1], [0, 0, 1, 1], [], []>} : vector<256x29xbf16>, vector<29x32xbf16>, vector<256x32xf32> -> vector<256x32xf32>
    %96 = arith.addf %89, %95 : vector<256x32xf32>
    %c2_89 = arith.constant 2 : index
    %c3_90 = arith.constant 3 : index
    %c0_91 = arith.constant 0 : index
    %97 = vector.load %arg7[%c2_89, %c3_90, %c0_91] : memref<20x20x29xf32, #tpu.memory_space<vmem>>, vector<16x16x29xf32>
    %98 = vector.shape_cast %97 : vector<16x16x29xf32> to vector<256x29xf32>
    %99 = arith.truncf %98 : vector<256x29xf32> to vector<256x29xbf16>
    %c13 = arith.constant 13 : index
    %c0_92 = arith.constant 0 : index
    %c0_93 = arith.constant 0 : index
    %100 = vector.load %arg2[%c13, %c0_92, %c0_93] : memref<25x29x32xbf16, #tpu.memory_space<vmem>>, vector<1x29x32xbf16>
    %101 = vector.shape_cast %100 : vector<1x29x32xbf16> to vector<29x32xbf16>
    %cst_94 = arith.constant dense<0.000000e+00> : vector<256x32xf32>
    %102 = tpu.matmul %99, %101, %cst_94 {dimension_numbers = #tpu.dot_dimension_numbers<[1], [0], [0], [1], [0, 0, 1, 1], [], []>} : vector<256x29xbf16>, vector<29x32xbf16>, vector<256x32xf32> -> vector<256x32xf32>
    %103 = arith.addf %96, %102 : vector<256x32xf32>
    %c2_95 = arith.constant 2 : index
    %c4_96 = arith.constant 4 : index
    %c0_97 = arith.constant 0 : index
    %104 = vector.load %arg7[%c2_95, %c4_96, %c0_97] : memref<20x20x29xf32, #tpu.memory_space<vmem>>, vector<16x16x29xf32>
    %105 = vector.shape_cast %104 : vector<16x16x29xf32> to vector<256x29xf32>
    %106 = arith.truncf %105 : vector<256x29xf32> to vector<256x29xbf16>
    %c14 = arith.constant 14 : index
    %c0_98 = arith.constant 0 : index
    %c0_99 = arith.constant 0 : index
    %107 = vector.load %arg2[%c14, %c0_98, %c0_99] : memref<25x29x32xbf16, #tpu.memory_space<vmem>>, vector<1x29x32xbf16>
    %108 = vector.shape_cast %107 : vector<1x29x32xbf16> to vector<29x32xbf16>
    %cst_100 = arith.constant dense<0.000000e+00> : vector<256x32xf32>
    %109 = tpu.matmul %106, %108, %cst_100 {dimension_numbers = #tpu.dot_dimension_numbers<[1], [0], [0], [1], [0, 0, 1, 1], [], []>} : vector<256x29xbf16>, vector<29x32xbf16>, vector<256x32xf32> -> vector<256x32xf32>
    %110 = arith.addf %103, %109 : vector<256x32xf32>
    %c3_101 = arith.constant 3 : index
    %c0_102 = arith.constant 0 : index
    %c0_103 = arith.constant 0 : index
    %111 = vector.load %arg7[%c3_101, %c0_102, %c0_103] : memref<20x20x29xf32, #tpu.memory_space<vmem>>, vector<16x16x29xf32>
    %112 = vector.shape_cast %111 : vector<16x16x29xf32> to vector<256x29xf32>
    %113 = arith.truncf %112 : vector<256x29xf32> to vector<256x29xbf16>
    %c15 = arith.constant 15 : index
    %c0_104 = arith.constant 0 : index
    %c0_105 = arith.constant 0 : index
    %114 = vector.load %arg2[%c15, %c0_104, %c0_105] : memref<25x29x32xbf16, #tpu.memory_space<vmem>>, vector<1x29x32xbf16>
    %115 = vector.shape_cast %114 : vector<1x29x32xbf16> to vector<29x32xbf16>
    %cst_106 = arith.constant dense<0.000000e+00> : vector<256x32xf32>
    %116 = tpu.matmul %113, %115, %cst_106 {dimension_numbers = #tpu.dot_dimension_numbers<[1], [0], [0], [1], [0, 0, 1, 1], [], []>} : vector<256x29xbf16>, vector<29x32xbf16>, vector<256x32xf32> -> vector<256x32xf32>
    %117 = arith.addf %110, %116 : vector<256x32xf32>
    %c3_107 = arith.constant 3 : index
    %c1_108 = arith.constant 1 : index
    %c0_109 = arith.constant 0 : index
    %118 = vector.load %arg7[%c3_107, %c1_108, %c0_109] : memref<20x20x29xf32, #tpu.memory_space<vmem>>, vector<16x16x29xf32>
    %119 = vector.shape_cast %118 : vector<16x16x29xf32> to vector<256x29xf32>
    %120 = arith.truncf %119 : vector<256x29xf32> to vector<256x29xbf16>
    %c16 = arith.constant 16 : index
    %c0_110 = arith.constant 0 : index
    %c0_111 = arith.constant 0 : index
    %121 = vector.load %arg2[%c16, %c0_110, %c0_111] : memref<25x29x32xbf16, #tpu.memory_space<vmem>>, vector<1x29x32xbf16>
    %122 = vector.shape_cast %121 : vector<1x29x32xbf16> to vector<29x32xbf16>
    %cst_112 = arith.constant dense<0.000000e+00> : vector<256x32xf32>
    %123 = tpu.matmul %120, %122, %cst_112 {dimension_numbers = #tpu.dot_dimension_numbers<[1], [0], [0], [1], [0, 0, 1, 1], [], []>} : vector<256x29xbf16>, vector<29x32xbf16>, vector<256x32xf32> -> vector<256x32xf32>
    %124 = arith.addf %117, %123 : vector<256x32xf32>
    %c3_113 = arith.constant 3 : index
    %c2_114 = arith.constant 2 : index
    %c0_115 = arith.constant 0 : index
    %125 = vector.load %arg7[%c3_113, %c2_114, %c0_115] : memref<20x20x29xf32, #tpu.memory_space<vmem>>, vector<16x16x29xf32>
    %126 = vector.shape_cast %125 : vector<16x16x29xf32> to vector<256x29xf32>
    %127 = arith.truncf %126 : vector<256x29xf32> to vector<256x29xbf16>
    %c17 = arith.constant 17 : index
    %c0_116 = arith.constant 0 : index
    %c0_117 = arith.constant 0 : index
    %128 = vector.load %arg2[%c17, %c0_116, %c0_117] : memref<25x29x32xbf16, #tpu.memory_space<vmem>>, vector<1x29x32xbf16>
    %129 = vector.shape_cast %128 : vector<1x29x32xbf16> to vector<29x32xbf16>
    %cst_118 = arith.constant dense<0.000000e+00> : vector<256x32xf32>
    %130 = tpu.matmul %127, %129, %cst_118 {dimension_numbers = #tpu.dot_dimension_numbers<[1], [0], [0], [1], [0, 0, 1, 1], [], []>} : vector<256x29xbf16>, vector<29x32xbf16>, vector<256x32xf32> -> vector<256x32xf32>
    %131 = arith.addf %124, %130 : vector<256x32xf32>
    %c3_119 = arith.constant 3 : index
    %c3_120 = arith.constant 3 : index
    %c0_121 = arith.constant 0 : index
    %132 = vector.load %arg7[%c3_119, %c3_120, %c0_121] : memref<20x20x29xf32, #tpu.memory_space<vmem>>, vector<16x16x29xf32>
    %133 = vector.shape_cast %132 : vector<16x16x29xf32> to vector<256x29xf32>
    %134 = arith.truncf %133 : vector<256x29xf32> to vector<256x29xbf16>
    %c18 = arith.constant 18 : index
    %c0_122 = arith.constant 0 : index
    %c0_123 = arith.constant 0 : index
    %135 = vector.load %arg2[%c18, %c0_122, %c0_123] : memref<25x29x32xbf16, #tpu.memory_space<vmem>>, vector<1x29x32xbf16>
    %136 = vector.shape_cast %135 : vector<1x29x32xbf16> to vector<29x32xbf16>
    %cst_124 = arith.constant dense<0.000000e+00> : vector<256x32xf32>
    %137 = tpu.matmul %134, %136, %cst_124 {dimension_numbers = #tpu.dot_dimension_numbers<[1], [0], [0], [1], [0, 0, 1, 1], [], []>} : vector<256x29xbf16>, vector<29x32xbf16>, vector<256x32xf32> -> vector<256x32xf32>
    %138 = arith.addf %131, %137 : vector<256x32xf32>
    %c3_125 = arith.constant 3 : index
    %c4_126 = arith.constant 4 : index
    %c0_127 = arith.constant 0 : index
    %139 = vector.load %arg7[%c3_125, %c4_126, %c0_127] : memref<20x20x29xf32, #tpu.memory_space<vmem>>, vector<16x16x29xf32>
    %140 = vector.shape_cast %139 : vector<16x16x29xf32> to vector<256x29xf32>
    %141 = arith.truncf %140 : vector<256x29xf32> to vector<256x29xbf16>
    %c19 = arith.constant 19 : index
    %c0_128 = arith.constant 0 : index
    %c0_129 = arith.constant 0 : index
    %142 = vector.load %arg2[%c19, %c0_128, %c0_129] : memref<25x29x32xbf16, #tpu.memory_space<vmem>>, vector<1x29x32xbf16>
    %143 = vector.shape_cast %142 : vector<1x29x32xbf16> to vector<29x32xbf16>
    %cst_130 = arith.constant dense<0.000000e+00> : vector<256x32xf32>
    %144 = tpu.matmul %141, %143, %cst_130 {dimension_numbers = #tpu.dot_dimension_numbers<[1], [0], [0], [1], [0, 0, 1, 1], [], []>} : vector<256x29xbf16>, vector<29x32xbf16>, vector<256x32xf32> -> vector<256x32xf32>
    %145 = arith.addf %138, %144 : vector<256x32xf32>
    %c4_131 = arith.constant 4 : index
    %c0_132 = arith.constant 0 : index
    %c0_133 = arith.constant 0 : index
    %146 = vector.load %arg7[%c4_131, %c0_132, %c0_133] : memref<20x20x29xf32, #tpu.memory_space<vmem>>, vector<16x16x29xf32>
    %147 = vector.shape_cast %146 : vector<16x16x29xf32> to vector<256x29xf32>
    %148 = arith.truncf %147 : vector<256x29xf32> to vector<256x29xbf16>
    %c20 = arith.constant 20 : index
    %c0_134 = arith.constant 0 : index
    %c0_135 = arith.constant 0 : index
    %149 = vector.load %arg2[%c20, %c0_134, %c0_135] : memref<25x29x32xbf16, #tpu.memory_space<vmem>>, vector<1x29x32xbf16>
    %150 = vector.shape_cast %149 : vector<1x29x32xbf16> to vector<29x32xbf16>
    %cst_136 = arith.constant dense<0.000000e+00> : vector<256x32xf32>
    %151 = tpu.matmul %148, %150, %cst_136 {dimension_numbers = #tpu.dot_dimension_numbers<[1], [0], [0], [1], [0, 0, 1, 1], [], []>} : vector<256x29xbf16>, vector<29x32xbf16>, vector<256x32xf32> -> vector<256x32xf32>
    %152 = arith.addf %145, %151 : vector<256x32xf32>
    %c4_137 = arith.constant 4 : index
    %c1_138 = arith.constant 1 : index
    %c0_139 = arith.constant 0 : index
    %153 = vector.load %arg7[%c4_137, %c1_138, %c0_139] : memref<20x20x29xf32, #tpu.memory_space<vmem>>, vector<16x16x29xf32>
    %154 = vector.shape_cast %153 : vector<16x16x29xf32> to vector<256x29xf32>
    %155 = arith.truncf %154 : vector<256x29xf32> to vector<256x29xbf16>
    %c21 = arith.constant 21 : index
    %c0_140 = arith.constant 0 : index
    %c0_141 = arith.constant 0 : index
    %156 = vector.load %arg2[%c21, %c0_140, %c0_141] : memref<25x29x32xbf16, #tpu.memory_space<vmem>>, vector<1x29x32xbf16>
    %157 = vector.shape_cast %156 : vector<1x29x32xbf16> to vector<29x32xbf16>
    %cst_142 = arith.constant dense<0.000000e+00> : vector<256x32xf32>
    %158 = tpu.matmul %155, %157, %cst_142 {dimension_numbers = #tpu.dot_dimension_numbers<[1], [0], [0], [1], [0, 0, 1, 1], [], []>} : vector<256x29xbf16>, vector<29x32xbf16>, vector<256x32xf32> -> vector<256x32xf32>
    %159 = arith.addf %152, %158 : vector<256x32xf32>
    %c4_143 = arith.constant 4 : index
    %c2_144 = arith.constant 2 : index
    %c0_145 = arith.constant 0 : index
    %160 = vector.load %arg7[%c4_143, %c2_144, %c0_145] : memref<20x20x29xf32, #tpu.memory_space<vmem>>, vector<16x16x29xf32>
    %161 = vector.shape_cast %160 : vector<16x16x29xf32> to vector<256x29xf32>
    %162 = arith.truncf %161 : vector<256x29xf32> to vector<256x29xbf16>
    %c22 = arith.constant 22 : index
    %c0_146 = arith.constant 0 : index
    %c0_147 = arith.constant 0 : index
    %163 = vector.load %arg2[%c22, %c0_146, %c0_147] : memref<25x29x32xbf16, #tpu.memory_space<vmem>>, vector<1x29x32xbf16>
    %164 = vector.shape_cast %163 : vector<1x29x32xbf16> to vector<29x32xbf16>
    %cst_148 = arith.constant dense<0.000000e+00> : vector<256x32xf32>
    %165 = tpu.matmul %162, %164, %cst_148 {dimension_numbers = #tpu.dot_dimension_numbers<[1], [0], [0], [1], [0, 0, 1, 1], [], []>} : vector<256x29xbf16>, vector<29x32xbf16>, vector<256x32xf32> -> vector<256x32xf32>
    %166 = arith.addf %159, %165 : vector<256x32xf32>
    %c4_149 = arith.constant 4 : index
    %c3_150 = arith.constant 3 : index
    %c0_151 = arith.constant 0 : index
    %167 = vector.load %arg7[%c4_149, %c3_150, %c0_151] : memref<20x20x29xf32, #tpu.memory_space<vmem>>, vector<16x16x29xf32>
    %168 = vector.shape_cast %167 : vector<16x16x29xf32> to vector<256x29xf32>
    %169 = arith.truncf %168 : vector<256x29xf32> to vector<256x29xbf16>
    %c23 = arith.constant 23 : index
    %c0_152 = arith.constant 0 : index
    %c0_153 = arith.constant 0 : index
    %170 = vector.load %arg2[%c23, %c0_152, %c0_153] : memref<25x29x32xbf16, #tpu.memory_space<vmem>>, vector<1x29x32xbf16>
    %171 = vector.shape_cast %170 : vector<1x29x32xbf16> to vector<29x32xbf16>
    %cst_154 = arith.constant dense<0.000000e+00> : vector<256x32xf32>
    %172 = tpu.matmul %169, %171, %cst_154 {dimension_numbers = #tpu.dot_dimension_numbers<[1], [0], [0], [1], [0, 0, 1, 1], [], []>} : vector<256x29xbf16>, vector<29x32xbf16>, vector<256x32xf32> -> vector<256x32xf32>
    %173 = arith.addf %166, %172 : vector<256x32xf32>
    %c4_155 = arith.constant 4 : index
    %c4_156 = arith.constant 4 : index
    %c0_157 = arith.constant 0 : index
    %174 = vector.load %arg7[%c4_155, %c4_156, %c0_157] : memref<20x20x29xf32, #tpu.memory_space<vmem>>, vector<16x16x29xf32>
    %175 = vector.shape_cast %174 : vector<16x16x29xf32> to vector<256x29xf32>
    %176 = arith.truncf %175 : vector<256x29xf32> to vector<256x29xbf16>
    %c24 = arith.constant 24 : index
    %c0_158 = arith.constant 0 : index
    %c0_159 = arith.constant 0 : index
    %177 = vector.load %arg2[%c24, %c0_158, %c0_159] : memref<25x29x32xbf16, #tpu.memory_space<vmem>>, vector<1x29x32xbf16>
    %178 = vector.shape_cast %177 : vector<1x29x32xbf16> to vector<29x32xbf16>
    %cst_160 = arith.constant dense<0.000000e+00> : vector<256x32xf32>
    %179 = tpu.matmul %176, %178, %cst_160 {dimension_numbers = #tpu.dot_dimension_numbers<[1], [0], [0], [1], [0, 0, 1, 1], [], []>} : vector<256x29xbf16>, vector<29x32xbf16>, vector<256x32xf32> -> vector<256x32xf32>
    %180 = arith.addf %173, %179 : vector<256x32xf32>
    %c0_161 = arith.constant 0 : index
    %c0_162 = arith.constant 0 : index
    %181 = vector.load %arg3[%c0_161, %c0_162] : memref<1x32xf32, #tpu.memory_space<vmem>>, vector<1x32xf32>
    %182 = vector.broadcast %181 : vector<1x32xf32> to vector<256x32xf32>
    %183 = arith.addf %180, %182 : vector<256x32xf32>
    %cst_163 = arith.constant 0.000000e+00 : f32
    %184 = vector.broadcast %cst_163 : f32 to vector<256x32xf32>
    %185 = arith.maximumf %183, %184 : vector<256x32xf32>
    %186 = vector.shape_cast %185 : vector<256x32xf32> to vector<16x16x32xf32>
    %c0_164 = arith.constant 0 : index
    %c0_165 = arith.constant 0 : index
    %c0_166 = arith.constant 0 : index
    %187 = vector.load %arg8[%c0_164, %c0_165, %c0_166] : memref<16x16x32xf32, #tpu.memory_space<vmem>>, vector<16x16x32xf32>
    tpu.vector_store %arg8[%c0_164, %c0_165, %c0_166], %186 {strides = array<i32>} : memref<16x16x32xf32, #tpu.memory_space<vmem>>, vector<16x16x32xf32>,
    %cst_167 = arith.constant 0.000000e+00 : f32
    %188 = vector.broadcast %cst_167 : f32 to vector<12x12x32xf32>
    %c0_168 = arith.constant 0 : index
    %c0_169 = arith.constant 0 : index
    %c0_170 = arith.constant 0 : index
    %189 = vector.load %arg9[%c0_168, %c0_169, %c0_170] : memref<12x12x32xf32, #tpu.memory_space<vmem>>, vector<12x12x32xf32>
    tpu.vector_store %arg9[%c0_168, %c0_169, %c0_170], %188 {strides = array<i32>} : memref<12x12x32xf32, #tpu.memory_space<vmem>>, vector<12x12x32xf32>,
    %c0_171 = arith.constant 0 : index
    %c0_172 = arith.constant 0 : index
    %c0_173 = arith.constant 0 : index
    %190 = tpu.strided_load %arg8[%c0_171, %c0_172, %c0_173] {strides = array<i32: 1, 2, 1>} : memref<16x16x32xf32, #tpu.memory_space<vmem>>, vector<16x8x32xf32>
    %c0_174 = arith.constant 0 : index
    %c1_175 = arith.constant 1 : index
    %c0_176 = arith.constant 0 : index
    %191 = tpu.strided_load %arg8[%c0_174, %c1_175, %c0_176] {strides = array<i32: 1, 2, 1>} : memref<16x16x32xf32, #tpu.memory_space<vmem>>, vector<16x8x32xf32>
    %192 = arith.maximumf %190, %191 : vector<16x8x32xf32>
    %193 = vector.shape_cast %192 : vector<16x8x32xf32> to vector<8x2x8x32xf32>
    %194 = vector.extract_strided_slice %193 {offsets = [0, 0, 0, 0], sizes = [8, 1, 8, 32], strides = [1, 1, 1, 1]} : vector<8x2x8x32xf32> to vector<8x1x8x32xf32>
    %195 = vector.shape_cast %194 : vector<8x1x8x32xf32> to vector<8x8x32xf32>
    %196 = vector.extract_strided_slice %193 {offsets = [0, 1, 0, 0], sizes = [8, 1, 8, 32], strides = [1, 1, 1, 1]} : vector<8x2x8x32xf32> to vector<8x1x8x32xf32>
    %197 = vector.shape_cast %196 : vector<8x1x8x32xf32> to vector<8x8x32xf32>
    %198 = arith.maximumf %195, %197 : vector<8x8x32xf32>
    %c2_177 = arith.constant 2 : index
    %c2_178 = arith.constant 2 : index
    %c0_179 = arith.constant 0 : index
    %199 = vector.load %arg9[%c2_177, %c2_178, %c0_179] : memref<12x12x32xf32, #tpu.memory_space<vmem>>, vector<8x8x32xf32>
    tpu.vector_store %arg9[%c2_177, %c2_178, %c0_179], %198 {strides = array<i32>} : memref<12x12x32xf32, #tpu.memory_space<vmem>>, vector<8x8x32xf32>,
    %cst_180 = arith.constant 0.000000e+00 : f32
    %200 = vector.broadcast %cst_180 : f32 to vector<64x32xf32>
    %c0_181 = arith.constant 0 : index
    %c0_182 = arith.constant 0 : index
    %c0_183 = arith.constant 0 : index
    %201 = vector.load %arg9[%c0_181, %c0_182, %c0_183] : memref<12x12x32xf32, #tpu.memory_space<vmem>>, vector<8x8x32xf32>
    %202 = vector.shape_cast %201 : vector<8x8x32xf32> to vector<64x32xf32>
    %203 = arith.truncf %202 : vector<64x32xf32> to vector<64x32xbf16>
    %c0_184 = arith.constant 0 : index
    %c0_185 = arith.constant 0 : index
    %c0_186 = arith.constant 0 : index
    %204 = vector.load %arg4[%c0_184, %c0_185, %c0_186] : memref<25x32x32xbf16, #tpu.memory_space<vmem>>, vector<1x32x32xbf16>
    %205 = vector.shape_cast %204 : vector<1x32x32xbf16> to vector<32x32xbf16>
    %cst_187 = arith.constant dense<0.000000e+00> : vector<64x32xf32>
    %206 = tpu.matmul %203, %205, %cst_187 {dimension_numbers = #tpu.dot_dimension_numbers<[1], [0], [0], [1], [0, 0, 1, 1], [], []>} : vector<64x32xbf16>, vector<32x32xbf16>, vector<64x32xf32> -> vector<64x32xf32>
    %207 = arith.addf %200, %206 : vector<64x32xf32>
    %c0_188 = arith.constant 0 : index
    %c1_189 = arith.constant 1 : index
    %c0_190 = arith.constant 0 : index
    %208 = vector.load %arg9[%c0_188, %c1_189, %c0_190] : memref<12x12x32xf32, #tpu.memory_space<vmem>>, vector<8x8x32xf32>
    %209 = vector.shape_cast %208 : vector<8x8x32xf32> to vector<64x32xf32>
    %210 = arith.truncf %209 : vector<64x32xf32> to vector<64x32xbf16>
    %c1_191 = arith.constant 1 : index
    %c0_192 = arith.constant 0 : index
    %c0_193 = arith.constant 0 : index
    %211 = vector.load %arg4[%c1_191, %c0_192, %c0_193] : memref<25x32x32xbf16, #tpu.memory_space<vmem>>, vector<1x32x32xbf16>
    %212 = vector.shape_cast %211 : vector<1x32x32xbf16> to vector<32x32xbf16>
    %cst_194 = arith.constant dense<0.000000e+00> : vector<64x32xf32>
    %213 = tpu.matmul %210, %212, %cst_194 {dimension_numbers = #tpu.dot_dimension_numbers<[1], [0], [0], [1], [0, 0, 1, 1], [], []>} : vector<64x32xbf16>, vector<32x32xbf16>, vector<64x32xf32> -> vector<64x32xf32>
    %214 = arith.addf %207, %213 : vector<64x32xf32>
    %c0_195 = arith.constant 0 : index
    %c2_196 = arith.constant 2 : index
    %c0_197 = arith.constant 0 : index
    %215 = vector.load %arg9[%c0_195, %c2_196, %c0_197] : memref<12x12x32xf32, #tpu.memory_space<vmem>>, vector<8x8x32xf32>
    %216 = vector.shape_cast %215 : vector<8x8x32xf32> to vector<64x32xf32>
    %217 = arith.truncf %216 : vector<64x32xf32> to vector<64x32xbf16>
    %c2_198 = arith.constant 2 : index
    %c0_199 = arith.constant 0 : index
    %c0_200 = arith.constant 0 : index
    %218 = vector.load %arg4[%c2_198, %c0_199, %c0_200] : memref<25x32x32xbf16, #tpu.memory_space<vmem>>, vector<1x32x32xbf16>
    %219 = vector.shape_cast %218 : vector<1x32x32xbf16> to vector<32x32xbf16>
    %cst_201 = arith.constant dense<0.000000e+00> : vector<64x32xf32>
    %220 = tpu.matmul %217, %219, %cst_201 {dimension_numbers = #tpu.dot_dimension_numbers<[1], [0], [0], [1], [0, 0, 1, 1], [], []>} : vector<64x32xbf16>, vector<32x32xbf16>, vector<64x32xf32> -> vector<64x32xf32>
    %221 = arith.addf %214, %220 : vector<64x32xf32>
    %c0_202 = arith.constant 0 : index
    %c3_203 = arith.constant 3 : index
    %c0_204 = arith.constant 0 : index
    %222 = vector.load %arg9[%c0_202, %c3_203, %c0_204] : memref<12x12x32xf32, #tpu.memory_space<vmem>>, vector<8x8x32xf32>
    %223 = vector.shape_cast %222 : vector<8x8x32xf32> to vector<64x32xf32>
    %224 = arith.truncf %223 : vector<64x32xf32> to vector<64x32xbf16>
    %c3_205 = arith.constant 3 : index
    %c0_206 = arith.constant 0 : index
    %c0_207 = arith.constant 0 : index
    %225 = vector.load %arg4[%c3_205, %c0_206, %c0_207] : memref<25x32x32xbf16, #tpu.memory_space<vmem>>, vector<1x32x32xbf16>
    %226 = vector.shape_cast %225 : vector<1x32x32xbf16> to vector<32x32xbf16>
    %cst_208 = arith.constant dense<0.000000e+00> : vector<64x32xf32>
    %227 = tpu.matmul %224, %226, %cst_208 {dimension_numbers = #tpu.dot_dimension_numbers<[1], [0], [0], [1], [0, 0, 1, 1], [], []>} : vector<64x32xbf16>, vector<32x32xbf16>, vector<64x32xf32> -> vector<64x32xf32>
    %228 = arith.addf %221, %227 : vector<64x32xf32>
    %c0_209 = arith.constant 0 : index
    %c4_210 = arith.constant 4 : index
    %c0_211 = arith.constant 0 : index
    %229 = vector.load %arg9[%c0_209, %c4_210, %c0_211] : memref<12x12x32xf32, #tpu.memory_space<vmem>>, vector<8x8x32xf32>
    %230 = vector.shape_cast %229 : vector<8x8x32xf32> to vector<64x32xf32>
    %231 = arith.truncf %230 : vector<64x32xf32> to vector<64x32xbf16>
    %c4_212 = arith.constant 4 : index
    %c0_213 = arith.constant 0 : index
    %c0_214 = arith.constant 0 : index
    %232 = vector.load %arg4[%c4_212, %c0_213, %c0_214] : memref<25x32x32xbf16, #tpu.memory_space<vmem>>, vector<1x32x32xbf16>
    %233 = vector.shape_cast %232 : vector<1x32x32xbf16> to vector<32x32xbf16>
    %cst_215 = arith.constant dense<0.000000e+00> : vector<64x32xf32>
    %234 = tpu.matmul %231, %233, %cst_215 {dimension_numbers = #tpu.dot_dimension_numbers<[1], [0], [0], [1], [0, 0, 1, 1], [], []>} : vector<64x32xbf16>, vector<32x32xbf16>, vector<64x32xf32> -> vector<64x32xf32>
    %235 = arith.addf %228, %234 : vector<64x32xf32>
    %c1_216 = arith.constant 1 : index
    %c0_217 = arith.constant 0 : index
    %c0_218 = arith.constant 0 : index
    %236 = vector.load %arg9[%c1_216, %c0_217, %c0_218] : memref<12x12x32xf32, #tpu.memory_space<vmem>>, vector<8x8x32xf32>
    %237 = vector.shape_cast %236 : vector<8x8x32xf32> to vector<64x32xf32>
    %238 = arith.truncf %237 : vector<64x32xf32> to vector<64x32xbf16>
    %c5_219 = arith.constant 5 : index
    %c0_220 = arith.constant 0 : index
    %c0_221 = arith.constant 0 : index
    %239 = vector.load %arg4[%c5_219, %c0_220, %c0_221] : memref<25x32x32xbf16, #tpu.memory_space<vmem>>, vector<1x32x32xbf16>
    %240 = vector.shape_cast %239 : vector<1x32x32xbf16> to vector<32x32xbf16>
    %cst_222 = arith.constant dense<0.000000e+00> : vector<64x32xf32>
    %241 = tpu.matmul %238, %240, %cst_222 {dimension_numbers = #tpu.dot_dimension_numbers<[1], [0], [0], [1], [0, 0, 1, 1], [], []>} : vector<64x32xbf16>, vector<32x32xbf16>, vector<64x32xf32> -> vector<64x32xf32>
    %242 = arith.addf %235, %241 : vector<64x32xf32>
    %c1_223 = arith.constant 1 : index
    %c1_224 = arith.constant 1 : index
    %c0_225 = arith.constant 0 : index
    %243 = vector.load %arg9[%c1_223, %c1_224, %c0_225] : memref<12x12x32xf32, #tpu.memory_space<vmem>>, vector<8x8x32xf32>
    %244 = vector.shape_cast %243 : vector<8x8x32xf32> to vector<64x32xf32>
    %245 = arith.truncf %244 : vector<64x32xf32> to vector<64x32xbf16>
    %c6_226 = arith.constant 6 : index
    %c0_227 = arith.constant 0 : index
    %c0_228 = arith.constant 0 : index
    %246 = vector.load %arg4[%c6_226, %c0_227, %c0_228] : memref<25x32x32xbf16, #tpu.memory_space<vmem>>, vector<1x32x32xbf16>
    %247 = vector.shape_cast %246 : vector<1x32x32xbf16> to vector<32x32xbf16>
    %cst_229 = arith.constant dense<0.000000e+00> : vector<64x32xf32>
    %248 = tpu.matmul %245, %247, %cst_229 {dimension_numbers = #tpu.dot_dimension_numbers<[1], [0], [0], [1], [0, 0, 1, 1], [], []>} : vector<64x32xbf16>, vector<32x32xbf16>, vector<64x32xf32> -> vector<64x32xf32>
    %249 = arith.addf %242, %248 : vector<64x32xf32>
    %c1_230 = arith.constant 1 : index
    %c2_231 = arith.constant 2 : index
    %c0_232 = arith.constant 0 : index
    %250 = vector.load %arg9[%c1_230, %c2_231, %c0_232] : memref<12x12x32xf32, #tpu.memory_space<vmem>>, vector<8x8x32xf32>
    %251 = vector.shape_cast %250 : vector<8x8x32xf32> to vector<64x32xf32>
    %252 = arith.truncf %251 : vector<64x32xf32> to vector<64x32xbf16>
    %c7_233 = arith.constant 7 : index
    %c0_234 = arith.constant 0 : index
    %c0_235 = arith.constant 0 : index
    %253 = vector.load %arg4[%c7_233, %c0_234, %c0_235] : memref<25x32x32xbf16, #tpu.memory_space<vmem>>, vector<1x32x32xbf16>
    %254 = vector.shape_cast %253 : vector<1x32x32xbf16> to vector<32x32xbf16>
    %cst_236 = arith.constant dense<0.000000e+00> : vector<64x32xf32>
    %255 = tpu.matmul %252, %254, %cst_236 {dimension_numbers = #tpu.dot_dimension_numbers<[1], [0], [0], [1], [0, 0, 1, 1], [], []>} : vector<64x32xbf16>, vector<32x32xbf16>, vector<64x32xf32> -> vector<64x32xf32>
    %256 = arith.addf %249, %255 : vector<64x32xf32>
    %c1_237 = arith.constant 1 : index
    %c3_238 = arith.constant 3 : index
    %c0_239 = arith.constant 0 : index
    %257 = vector.load %arg9[%c1_237, %c3_238, %c0_239] : memref<12x12x32xf32, #tpu.memory_space<vmem>>, vector<8x8x32xf32>
    %258 = vector.shape_cast %257 : vector<8x8x32xf32> to vector<64x32xf32>
    %259 = arith.truncf %258 : vector<64x32xf32> to vector<64x32xbf16>
    %c8_240 = arith.constant 8 : index
    %c0_241 = arith.constant 0 : index
    %c0_242 = arith.constant 0 : index
    %260 = vector.load %arg4[%c8_240, %c0_241, %c0_242] : memref<25x32x32xbf16, #tpu.memory_space<vmem>>, vector<1x32x32xbf16>
    %261 = vector.shape_cast %260 : vector<1x32x32xbf16> to vector<32x32xbf16>
    %cst_243 = arith.constant dense<0.000000e+00> : vector<64x32xf32>
    %262 = tpu.matmul %259, %261, %cst_243 {dimension_numbers = #tpu.dot_dimension_numbers<[1], [0], [0], [1], [0, 0, 1, 1], [], []>} : vector<64x32xbf16>, vector<32x32xbf16>, vector<64x32xf32> -> vector<64x32xf32>
    %263 = arith.addf %256, %262 : vector<64x32xf32>
    %c1_244 = arith.constant 1 : index
    %c4_245 = arith.constant 4 : index
    %c0_246 = arith.constant 0 : index
    %264 = vector.load %arg9[%c1_244, %c4_245, %c0_246] : memref<12x12x32xf32, #tpu.memory_space<vmem>>, vector<8x8x32xf32>
    %265 = vector.shape_cast %264 : vector<8x8x32xf32> to vector<64x32xf32>
    %266 = arith.truncf %265 : vector<64x32xf32> to vector<64x32xbf16>
    %c9_247 = arith.constant 9 : index
    %c0_248 = arith.constant 0 : index
    %c0_249 = arith.constant 0 : index
    %267 = vector.load %arg4[%c9_247, %c0_248, %c0_249] : memref<25x32x32xbf16, #tpu.memory_space<vmem>>, vector<1x32x32xbf16>
    %268 = vector.shape_cast %267 : vector<1x32x32xbf16> to vector<32x32xbf16>
    %cst_250 = arith.constant dense<0.000000e+00> : vector<64x32xf32>
    %269 = tpu.matmul %266, %268, %cst_250 {dimension_numbers = #tpu.dot_dimension_numbers<[1], [0], [0], [1], [0, 0, 1, 1], [], []>} : vector<64x32xbf16>, vector<32x32xbf16>, vector<64x32xf32> -> vector<64x32xf32>
    %270 = arith.addf %263, %269 : vector<64x32xf32>
    %c2_251 = arith.constant 2 : index
    %c0_252 = arith.constant 0 : index
    %c0_253 = arith.constant 0 : index
    %271 = vector.load %arg9[%c2_251, %c0_252, %c0_253] : memref<12x12x32xf32, #tpu.memory_space<vmem>>, vector<8x8x32xf32>
    %272 = vector.shape_cast %271 : vector<8x8x32xf32> to vector<64x32xf32>
    %273 = arith.truncf %272 : vector<64x32xf32> to vector<64x32xbf16>
    %c10_254 = arith.constant 10 : index
    %c0_255 = arith.constant 0 : index
    %c0_256 = arith.constant 0 : index
    %274 = vector.load %arg4[%c10_254, %c0_255, %c0_256] : memref<25x32x32xbf16, #tpu.memory_space<vmem>>, vector<1x32x32xbf16>
    %275 = vector.shape_cast %274 : vector<1x32x32xbf16> to vector<32x32xbf16>
    %cst_257 = arith.constant dense<0.000000e+00> : vector<64x32xf32>
    %276 = tpu.matmul %273, %275, %cst_257 {dimension_numbers = #tpu.dot_dimension_numbers<[1], [0], [0], [1], [0, 0, 1, 1], [], []>} : vector<64x32xbf16>, vector<32x32xbf16>, vector<64x32xf32> -> vector<64x32xf32>
    %277 = arith.addf %270, %276 : vector<64x32xf32>
    %c2_258 = arith.constant 2 : index
    %c1_259 = arith.constant 1 : index
    %c0_260 = arith.constant 0 : index
    %278 = vector.load %arg9[%c2_258, %c1_259, %c0_260] : memref<12x12x32xf32, #tpu.memory_space<vmem>>, vector<8x8x32xf32>
    %279 = vector.shape_cast %278 : vector<8x8x32xf32> to vector<64x32xf32>
    %280 = arith.truncf %279 : vector<64x32xf32> to vector<64x32xbf16>
    %c11_261 = arith.constant 11 : index
    %c0_262 = arith.constant 0 : index
    %c0_263 = arith.constant 0 : index
    %281 = vector.load %arg4[%c11_261, %c0_262, %c0_263] : memref<25x32x32xbf16, #tpu.memory_space<vmem>>, vector<1x32x32xbf16>
    %282 = vector.shape_cast %281 : vector<1x32x32xbf16> to vector<32x32xbf16>
    %cst_264 = arith.constant dense<0.000000e+00> : vector<64x32xf32>
    %283 = tpu.matmul %280, %282, %cst_264 {dimension_numbers = #tpu.dot_dimension_numbers<[1], [0], [0], [1], [0, 0, 1, 1], [], []>} : vector<64x32xbf16>, vector<32x32xbf16>, vector<64x32xf32> -> vector<64x32xf32>
    %284 = arith.addf %277, %283 : vector<64x32xf32>
    %c2_265 = arith.constant 2 : index
    %c2_266 = arith.constant 2 : index
    %c0_267 = arith.constant 0 : index
    %285 = vector.load %arg9[%c2_265, %c2_266, %c0_267] : memref<12x12x32xf32, #tpu.memory_space<vmem>>, vector<8x8x32xf32>
    %286 = vector.shape_cast %285 : vector<8x8x32xf32> to vector<64x32xf32>
    %287 = arith.truncf %286 : vector<64x32xf32> to vector<64x32xbf16>
    %c12_268 = arith.constant 12 : index
    %c0_269 = arith.constant 0 : index
    %c0_270 = arith.constant 0 : index
    %288 = vector.load %arg4[%c12_268, %c0_269, %c0_270] : memref<25x32x32xbf16, #tpu.memory_space<vmem>>, vector<1x32x32xbf16>
    %289 = vector.shape_cast %288 : vector<1x32x32xbf16> to vector<32x32xbf16>
    %cst_271 = arith.constant dense<0.000000e+00> : vector<64x32xf32>
    %290 = tpu.matmul %287, %289, %cst_271 {dimension_numbers = #tpu.dot_dimension_numbers<[1], [0], [0], [1], [0, 0, 1, 1], [], []>} : vector<64x32xbf16>, vector<32x32xbf16>, vector<64x32xf32> -> vector<64x32xf32>
    %291 = arith.addf %284, %290 : vector<64x32xf32>
    %c2_272 = arith.constant 2 : index
    %c3_273 = arith.constant 3 : index
    %c0_274 = arith.constant 0 : index
    %292 = vector.load %arg9[%c2_272, %c3_273, %c0_274] : memref<12x12x32xf32, #tpu.memory_space<vmem>>, vector<8x8x32xf32>
    %293 = vector.shape_cast %292 : vector<8x8x32xf32> to vector<64x32xf32>
    %294 = arith.truncf %293 : vector<64x32xf32> to vector<64x32xbf16>
    %c13_275 = arith.constant 13 : index
    %c0_276 = arith.constant 0 : index
    %c0_277 = arith.constant 0 : index
    %295 = vector.load %arg4[%c13_275, %c0_276, %c0_277] : memref<25x32x32xbf16, #tpu.memory_space<vmem>>, vector<1x32x32xbf16>
    %296 = vector.shape_cast %295 : vector<1x32x32xbf16> to vector<32x32xbf16>
    %cst_278 = arith.constant dense<0.000000e+00> : vector<64x32xf32>
    %297 = tpu.matmul %294, %296, %cst_278 {dimension_numbers = #tpu.dot_dimension_numbers<[1], [0], [0], [1], [0, 0, 1, 1], [], []>} : vector<64x32xbf16>, vector<32x32xbf16>, vector<64x32xf32> -> vector<64x32xf32>
    %298 = arith.addf %291, %297 : vector<64x32xf32>
    %c2_279 = arith.constant 2 : index
    %c4_280 = arith.constant 4 : index
    %c0_281 = arith.constant 0 : index
    %299 = vector.load %arg9[%c2_279, %c4_280, %c0_281] : memref<12x12x32xf32, #tpu.memory_space<vmem>>, vector<8x8x32xf32>
    %300 = vector.shape_cast %299 : vector<8x8x32xf32> to vector<64x32xf32>
    %301 = arith.truncf %300 : vector<64x32xf32> to vector<64x32xbf16>
    %c14_282 = arith.constant 14 : index
    %c0_283 = arith.constant 0 : index
    %c0_284 = arith.constant 0 : index
    %302 = vector.load %arg4[%c14_282, %c0_283, %c0_284] : memref<25x32x32xbf16, #tpu.memory_space<vmem>>, vector<1x32x32xbf16>
    %303 = vector.shape_cast %302 : vector<1x32x32xbf16> to vector<32x32xbf16>
    %cst_285 = arith.constant dense<0.000000e+00> : vector<64x32xf32>
    %304 = tpu.matmul %301, %303, %cst_285 {dimension_numbers = #tpu.dot_dimension_numbers<[1], [0], [0], [1], [0, 0, 1, 1], [], []>} : vector<64x32xbf16>, vector<32x32xbf16>, vector<64x32xf32> -> vector<64x32xf32>
    %305 = arith.addf %298, %304 : vector<64x32xf32>
    %c3_286 = arith.constant 3 : index
    %c0_287 = arith.constant 0 : index
    %c0_288 = arith.constant 0 : index
    %306 = vector.load %arg9[%c3_286, %c0_287, %c0_288] : memref<12x12x32xf32, #tpu.memory_space<vmem>>, vector<8x8x32xf32>
    %307 = vector.shape_cast %306 : vector<8x8x32xf32> to vector<64x32xf32>
    %308 = arith.truncf %307 : vector<64x32xf32> to vector<64x32xbf16>
    %c15_289 = arith.constant 15 : index
    %c0_290 = arith.constant 0 : index
    %c0_291 = arith.constant 0 : index
    %309 = vector.load %arg4[%c15_289, %c0_290, %c0_291] : memref<25x32x32xbf16, #tpu.memory_space<vmem>>, vector<1x32x32xbf16>
    %310 = vector.shape_cast %309 : vector<1x32x32xbf16> to vector<32x32xbf16>
    %cst_292 = arith.constant dense<0.000000e+00> : vector<64x32xf32>
    %311 = tpu.matmul %308, %310, %cst_292 {dimension_numbers = #tpu.dot_dimension_numbers<[1], [0], [0], [1], [0, 0, 1, 1], [], []>} : vector<64x32xbf16>, vector<32x32xbf16>, vector<64x32xf32> -> vector<64x32xf32>
    %312 = arith.addf %305, %311 : vector<64x32xf32>
    %c3_293 = arith.constant 3 : index
    %c1_294 = arith.constant 1 : index
    %c0_295 = arith.constant 0 : index
    %313 = vector.load %arg9[%c3_293, %c1_294, %c0_295] : memref<12x12x32xf32, #tpu.memory_space<vmem>>, vector<8x8x32xf32>
    %314 = vector.shape_cast %313 : vector<8x8x32xf32> to vector<64x32xf32>
    %315 = arith.truncf %314 : vector<64x32xf32> to vector<64x32xbf16>
    %c16_296 = arith.constant 16 : index
    %c0_297 = arith.constant 0 : index
    %c0_298 = arith.constant 0 : index
    %316 = vector.load %arg4[%c16_296, %c0_297, %c0_298] : memref<25x32x32xbf16, #tpu.memory_space<vmem>>, vector<1x32x32xbf16>
    %317 = vector.shape_cast %316 : vector<1x32x32xbf16> to vector<32x32xbf16>
    %cst_299 = arith.constant dense<0.000000e+00> : vector<64x32xf32>
    %318 = tpu.matmul %315, %317, %cst_299 {dimension_numbers = #tpu.dot_dimension_numbers<[1], [0], [0], [1], [0, 0, 1, 1], [], []>} : vector<64x32xbf16>, vector<32x32xbf16>, vector<64x32xf32> -> vector<64x32xf32>
    %319 = arith.addf %312, %318 : vector<64x32xf32>
    %c3_300 = arith.constant 3 : index
    %c2_301 = arith.constant 2 : index
    %c0_302 = arith.constant 0 : index
    %320 = vector.load %arg9[%c3_300, %c2_301, %c0_302] : memref<12x12x32xf32, #tpu.memory_space<vmem>>, vector<8x8x32xf32>
    %321 = vector.shape_cast %320 : vector<8x8x32xf32> to vector<64x32xf32>
    %322 = arith.truncf %321 : vector<64x32xf32> to vector<64x32xbf16>
    %c17_303 = arith.constant 17 : index
    %c0_304 = arith.constant 0 : index
    %c0_305 = arith.constant 0 : index
    %323 = vector.load %arg4[%c17_303, %c0_304, %c0_305] : memref<25x32x32xbf16, #tpu.memory_space<vmem>>, vector<1x32x32xbf16>
    %324 = vector.shape_cast %323 : vector<1x32x32xbf16> to vector<32x32xbf16>
    %cst_306 = arith.constant dense<0.000000e+00> : vector<64x32xf32>
    %325 = tpu.matmul %322, %324, %cst_306 {dimension_numbers = #tpu.dot_dimension_numbers<[1], [0], [0], [1], [0, 0, 1, 1], [], []>} : vector<64x32xbf16>, vector<32x32xbf16>, vector<64x32xf32> -> vector<64x32xf32>
    %326 = arith.addf %319, %325 : vector<64x32xf32>
    %c3_307 = arith.constant 3 : index
    %c3_308 = arith.constant 3 : index
    %c0_309 = arith.constant 0 : index
    %327 = vector.load %arg9[%c3_307, %c3_308, %c0_309] : memref<12x12x32xf32, #tpu.memory_space<vmem>>, vector<8x8x32xf32>
    %328 = vector.shape_cast %327 : vector<8x8x32xf32> to vector<64x32xf32>
    %329 = arith.truncf %328 : vector<64x32xf32> to vector<64x32xbf16>
    %c18_310 = arith.constant 18 : index
    %c0_311 = arith.constant 0 : index
    %c0_312 = arith.constant 0 : index
    %330 = vector.load %arg4[%c18_310, %c0_311, %c0_312] : memref<25x32x32xbf16, #tpu.memory_space<vmem>>, vector<1x32x32xbf16>
    %331 = vector.shape_cast %330 : vector<1x32x32xbf16> to vector<32x32xbf16>
    %cst_313 = arith.constant dense<0.000000e+00> : vector<64x32xf32>
    %332 = tpu.matmul %329, %331, %cst_313 {dimension_numbers = #tpu.dot_dimension_numbers<[1], [0], [0], [1], [0, 0, 1, 1], [], []>} : vector<64x32xbf16>, vector<32x32xbf16>, vector<64x32xf32> -> vector<64x32xf32>
    %333 = arith.addf %326, %332 : vector<64x32xf32>
    %c3_314 = arith.constant 3 : index
    %c4_315 = arith.constant 4 : index
    %c0_316 = arith.constant 0 : index
    %334 = vector.load %arg9[%c3_314, %c4_315, %c0_316] : memref<12x12x32xf32, #tpu.memory_space<vmem>>, vector<8x8x32xf32>
    %335 = vector.shape_cast %334 : vector<8x8x32xf32> to vector<64x32xf32>
    %336 = arith.truncf %335 : vector<64x32xf32> to vector<64x32xbf16>
    %c19_317 = arith.constant 19 : index
    %c0_318 = arith.constant 0 : index
    %c0_319 = arith.constant 0 : index
    %337 = vector.load %arg4[%c19_317, %c0_318, %c0_319] : memref<25x32x32xbf16, #tpu.memory_space<vmem>>, vector<1x32x32xbf16>
    %338 = vector.shape_cast %337 : vector<1x32x32xbf16> to vector<32x32xbf16>
    %cst_320 = arith.constant dense<0.000000e+00> : vector<64x32xf32>
    %339 = tpu.matmul %336, %338, %cst_320 {dimension_numbers = #tpu.dot_dimension_numbers<[1], [0], [0], [1], [0, 0, 1, 1], [], []>} : vector<64x32xbf16>, vector<32x32xbf16>, vector<64x32xf32> -> vector<64x32xf32>
    %340 = arith.addf %333, %339 : vector<64x32xf32>
    %c4_321 = arith.constant 4 : index
    %c0_322 = arith.constant 0 : index
    %c0_323 = arith.constant 0 : index
    %341 = vector.load %arg9[%c4_321, %c0_322, %c0_323] : memref<12x12x32xf32, #tpu.memory_space<vmem>>, vector<8x8x32xf32>
    %342 = vector.shape_cast %341 : vector<8x8x32xf32> to vector<64x32xf32>
    %343 = arith.truncf %342 : vector<64x32xf32> to vector<64x32xbf16>
    %c20_324 = arith.constant 20 : index
    %c0_325 = arith.constant 0 : index
    %c0_326 = arith.constant 0 : index
    %344 = vector.load %arg4[%c20_324, %c0_325, %c0_326] : memref<25x32x32xbf16, #tpu.memory_space<vmem>>, vector<1x32x32xbf16>
    %345 = vector.shape_cast %344 : vector<1x32x32xbf16> to vector<32x32xbf16>
    %cst_327 = arith.constant dense<0.000000e+00> : vector<64x32xf32>
    %346 = tpu.matmul %343, %345, %cst_327 {dimension_numbers = #tpu.dot_dimension_numbers<[1], [0], [0], [1], [0, 0, 1, 1], [], []>} : vector<64x32xbf16>, vector<32x32xbf16>, vector<64x32xf32> -> vector<64x32xf32>
    %347 = arith.addf %340, %346 : vector<64x32xf32>
    %c4_328 = arith.constant 4 : index
    %c1_329 = arith.constant 1 : index
    %c0_330 = arith.constant 0 : index
    %348 = vector.load %arg9[%c4_328, %c1_329, %c0_330] : memref<12x12x32xf32, #tpu.memory_space<vmem>>, vector<8x8x32xf32>
    %349 = vector.shape_cast %348 : vector<8x8x32xf32> to vector<64x32xf32>
    %350 = arith.truncf %349 : vector<64x32xf32> to vector<64x32xbf16>
    %c21_331 = arith.constant 21 : index
    %c0_332 = arith.constant 0 : index
    %c0_333 = arith.constant 0 : index
    %351 = vector.load %arg4[%c21_331, %c0_332, %c0_333] : memref<25x32x32xbf16, #tpu.memory_space<vmem>>, vector<1x32x32xbf16>
    %352 = vector.shape_cast %351 : vector<1x32x32xbf16> to vector<32x32xbf16>
    %cst_334 = arith.constant dense<0.000000e+00> : vector<64x32xf32>
    %353 = tpu.matmul %350, %352, %cst_334 {dimension_numbers = #tpu.dot_dimension_numbers<[1], [0], [0], [1], [0, 0, 1, 1], [], []>} : vector<64x32xbf16>, vector<32x32xbf16>, vector<64x32xf32> -> vector<64x32xf32>
    %354 = arith.addf %347, %353 : vector<64x32xf32>
    %c4_335 = arith.constant 4 : index
    %c2_336 = arith.constant 2 : index
    %c0_337 = arith.constant 0 : index
    %355 = vector.load %arg9[%c4_335, %c2_336, %c0_337] : memref<12x12x32xf32, #tpu.memory_space<vmem>>, vector<8x8x32xf32>
    %356 = vector.shape_cast %355 : vector<8x8x32xf32> to vector<64x32xf32>
    %357 = arith.truncf %356 : vector<64x32xf32> to vector<64x32xbf16>
    %c22_338 = arith.constant 22 : index
    %c0_339 = arith.constant 0 : index
    %c0_340 = arith.constant 0 : index
    %358 = vector.load %arg4[%c22_338, %c0_339, %c0_340] : memref<25x32x32xbf16, #tpu.memory_space<vmem>>, vector<1x32x32xbf16>
    %359 = vector.shape_cast %358 : vector<1x32x32xbf16> to vector<32x32xbf16>
    %cst_341 = arith.constant dense<0.000000e+00> : vector<64x32xf32>
    %360 = tpu.matmul %357, %359, %cst_341 {dimension_numbers = #tpu.dot_dimension_numbers<[1], [0], [0], [1], [0, 0, 1, 1], [], []>} : vector<64x32xbf16>, vector<32x32xbf16>, vector<64x32xf32> -> vector<64x32xf32>
    %361 = arith.addf %354, %360 : vector<64x32xf32>
    %c4_342 = arith.constant 4 : index
    %c3_343 = arith.constant 3 : index
    %c0_344 = arith.constant 0 : index
    %362 = vector.load %arg9[%c4_342, %c3_343, %c0_344] : memref<12x12x32xf32, #tpu.memory_space<vmem>>, vector<8x8x32xf32>
    %363 = vector.shape_cast %362 : vector<8x8x32xf32> to vector<64x32xf32>
    %364 = arith.truncf %363 : vector<64x32xf32> to vector<64x32xbf16>
    %c23_345 = arith.constant 23 : index
    %c0_346 = arith.constant 0 : index
    %c0_347 = arith.constant 0 : index
    %365 = vector.load %arg4[%c23_345, %c0_346, %c0_347] : memref<25x32x32xbf16, #tpu.memory_space<vmem>>, vector<1x32x32xbf16>
    %366 = vector.shape_cast %365 : vector<1x32x32xbf16> to vector<32x32xbf16>
    %cst_348 = arith.constant dense<0.000000e+00> : vector<64x32xf32>
    %367 = tpu.matmul %364, %366, %cst_348 {dimension_numbers = #tpu.dot_dimension_numbers<[1], [0], [0], [1], [0, 0, 1, 1], [], []>} : vector<64x32xbf16>, vector<32x32xbf16>, vector<64x32xf32> -> vector<64x32xf32>
    %368 = arith.addf %361, %367 : vector<64x32xf32>
    %c4_349 = arith.constant 4 : index
    %c4_350 = arith.constant 4 : index
    %c0_351 = arith.constant 0 : index
    %369 = vector.load %arg9[%c4_349, %c4_350, %c0_351] : memref<12x12x32xf32, #tpu.memory_space<vmem>>, vector<8x8x32xf32>
    %370 = vector.shape_cast %369 : vector<8x8x32xf32> to vector<64x32xf32>
    %371 = arith.truncf %370 : vector<64x32xf32> to vector<64x32xbf16>
    %c24_352 = arith.constant 24 : index
    %c0_353 = arith.constant 0 : index
    %c0_354 = arith.constant 0 : index
    %372 = vector.load %arg4[%c24_352, %c0_353, %c0_354] : memref<25x32x32xbf16, #tpu.memory_space<vmem>>, vector<1x32x32xbf16>
    %373 = vector.shape_cast %372 : vector<1x32x32xbf16> to vector<32x32xbf16>
    %cst_355 = arith.constant dense<0.000000e+00> : vector<64x32xf32>
    %374 = tpu.matmul %371, %373, %cst_355 {dimension_numbers = #tpu.dot_dimension_numbers<[1], [0], [0], [1], [0, 0, 1, 1], [], []>} : vector<64x32xbf16>, vector<32x32xbf16>, vector<64x32xf32> -> vector<64x32xf32>
    %375 = arith.addf %368, %374 : vector<64x32xf32>
    %c0_356 = arith.constant 0 : index
    %c0_357 = arith.constant 0 : index
    %376 = vector.load %arg5[%c0_356, %c0_357] : memref<1x32xf32, #tpu.memory_space<vmem>>, vector<1x32xf32>
    %377 = vector.broadcast %376 : vector<1x32xf32> to vector<64x32xf32>
    %378 = arith.addf %375, %377 : vector<64x32xf32>
    %cst_358 = arith.constant 0.000000e+00 : f32
    %379 = vector.broadcast %cst_358 : f32 to vector<64x32xf32>
    %380 = arith.maximumf %378, %379 : vector<64x32xf32>
    %381 = vector.shape_cast %380 : vector<64x32xf32> to vector<8x8x32xf32>
    %c0_359 = arith.constant 0 : index
    %c0_360 = arith.constant 0 : index
    %c0_361 = arith.constant 0 : index
    %382 = vector.load %arg10[%c0_359, %c0_360, %c0_361] : memref<8x8x32xf32, #tpu.memory_space<vmem>>, vector<8x8x32xf32>
    tpu.vector_store %arg10[%c0_359, %c0_360, %c0_361], %381 {strides = array<i32>} : memref<8x8x32xf32, #tpu.memory_space<vmem>>, vector<8x8x32xf32>,
    %c0_362 = arith.constant 0 : index
    %c0_363 = arith.constant 0 : index
    %c0_364 = arith.constant 0 : index
    %383 = tpu.strided_load %arg10[%c0_362, %c0_363, %c0_364] {strides = array<i32: 1, 2, 1>} : memref<8x8x32xf32, #tpu.memory_space<vmem>>, vector<8x4x32xf32>
    %c0_365 = arith.constant 0 : index
    %c1_366 = arith.constant 1 : index
    %c0_367 = arith.constant 0 : index
    %384 = tpu.strided_load %arg10[%c0_365, %c1_366, %c0_367] {strides = array<i32: 1, 2, 1>} : memref<8x8x32xf32, #tpu.memory_space<vmem>>, vector<8x4x32xf32>
    %385 = arith.maximumf %383, %384 : vector<8x4x32xf32>
    %386 = vector.shape_cast %385 : vector<8x4x32xf32> to vector<4x2x4x32xf32>
    %387 = vector.extract_strided_slice %386 {offsets = [0, 0, 0, 0], sizes = [4, 1, 4, 32], strides = [1, 1, 1, 1]} : vector<4x2x4x32xf32> to vector<4x1x4x32xf32>
    %388 = vector.shape_cast %387 : vector<4x1x4x32xf32> to vector<4x4x32xf32>
    %389 = vector.extract_strided_slice %386 {offsets = [0, 1, 0, 0], sizes = [4, 1, 4, 32], strides = [1, 1, 1, 1]} : vector<4x2x4x32xf32> to vector<4x1x4x32xf32>
    %390 = vector.shape_cast %389 : vector<4x1x4x32xf32> to vector<4x4x32xf32>
    %391 = arith.maximumf %388, %390 : vector<4x4x32xf32>
    %c0_368 = arith.constant 0 : index
    %c0_369 = arith.constant 0 : index
    %c0_370 = arith.constant 0 : index
    %c0_371 = arith.constant 0 : index
    %392 = vector.load %arg6[%c0_368, %c0_369, %c0_370, %c0_371] : memref<1x4x4x32xf32, #tpu.memory_space<vmem>>, vector<1x4x4x32xf32>
    %393 = vector.shape_cast %392 : vector<1x4x4x32xf32> to vector<4x4x32xf32>
    %394 = vector.shape_cast %391 : vector<4x4x32xf32> to vector<1x4x4x32xf32>
    tpu.vector_store %arg6[%c0_368, %c0_369, %c0_370, %c0_371], %394 {strides = array<i32>} : memref<1x4x4x32xf32, #tpu.memory_space<vmem>>, vector<1x4x4x32xf32>,
    return
  }
  func.func @transform_0(%arg0: i32) -> (i32, i32, i32, i32) {
    %c0_i32 = arith.constant 0 : i32
    %c0_i32_0 = arith.constant 0 : i32
    %c0_i32_1 = arith.constant 0 : i32
    %c0_i32_2 = arith.constant 0 : i32
    return %arg0, %c0_i32, %c0_i32_0, %c0_i32_1 : i32, i32, i32, i32
  }
  func.func @transform_1(%arg0: i32) -> (i32, i32, i32) {
    %c0_i32 = arith.constant 0 : i32
    %c0_i32_0 = arith.constant 0 : i32
    %c0_i32_1 = arith.constant 0 : i32
    %c0_i32_2 = arith.constant 0 : i32
    return %c0_i32, %c0_i32_0, %c0_i32_1 : i32, i32, i32
  }
  func.func @transform_2(%arg0: i32) -> (i32, i32) {
    %c0_i32 = arith.constant 0 : i32
    %c0_i32_0 = arith.constant 0 : i32
    %c0_i32_1 = arith.constant 0 : i32
    return %c0_i32, %c0_i32_0 : i32, i32
  }
  func.func @transform_3(%arg0: i32) -> (i32, i32, i32) {
    %c0_i32 = arith.constant 0 : i32
    %c0_i32_0 = arith.constant 0 : i32
    %c0_i32_1 = arith.constant 0 : i32
    %c0_i32_2 = arith.constant 0 : i32
    return %c0_i32, %c0_i32_0, %c0_i32_1 : i32, i32, i32
  }
  func.func @transform_4(%arg0: i32) -> (i32, i32) {
    %c0_i32 = arith.constant 0 : i32
    %c0_i32_0 = arith.constant 0 : i32
    %c0_i32_1 = arith.constant 0 : i32
    return %c0_i32, %c0_i32_0 : i32, i32
  }
  func.func @transform_5(%arg0: i32) -> (i32, i32, i32, i32) {
    %c0_i32 = arith.constant 0 : i32
    %c0_i32_0 = arith.constant 0 : i32
    %c0_i32_1 = arith.constant 0 : i32
    %c0_i32_2 = arith.constant 0 : i32
    return %arg0, %c0_i32, %c0_i32_0, %c0_i32_1 : i32, i32, i32, i32
  }
}

</mosaic_0001>

<bundles_post_ra>
// kernel: tpu_custom_call.1
= control target key start
LH: loop header
LB: loop body
LE: loop exit
PB: predicated region body
PF: predicated region fallthrough
CT: control target
= control target key end

     0   :  { %10 = vsyncpa [#allocation7], 0  ;;  %s17148_s0 = inlined_call_operand.hbm [shape: f32[2,16,16,29], index: 0, kind: input, shape index: {}]   ;;  %s17149_s1 = inlined_call_operand.hbm [shape: bf16[25,29,32], index: 1, kind: input, shape index: {}]   ;;  %s17150_s2 = inlined_call_operand.vmem [shape: f32[1,32], index: 2, kind: input, shape index: {}]   ;;  %s17151_s3 = inlined_call_operand.hbm [shape: bf16[25,32,32], index: 3, kind: input, shape index: {}]   ;;  %s17152_s4 = inlined_call_operand.vmem [shape: f32[1,32], index: 4, kind: input, shape index: {}]   ;;  %s17153_s5 = inlined_call_operand.hbm [shape: f32[2,4,4,32], index: 5, kind: output, shape index: {}]  }
   0x1   :  { %12 = vsyncpa [#allocation7 + $0x1], 0 }
   0x2   :  { %13 = vsyncpa [#allocation10], 0 }
   0x3   :  { %14 = vsyncpa [#allocation8], 0 }
   0x4   :  { %16 = vsyncpa [#allocation8 + $0x1], 0  ;;  %s15049_s18 = smov 0   ;;  %s15051_s19 = smov 0  }
   0x5   :  { %s15053_s20 = smov 0   ;;  %s15055_s21 = smov 0  }
   0x6 LB: > { %s15070_s22 = sadd.s32 4294967295, %s15005_s21   ;;  %s11287_s23 = sadd.s32 4294967294, %s15005_s21   ;;  %s15005_s21 = sphi %s15055_s21, %s17210_s21   ;;  %s15001_s20 = sphi %s15053_s20, %s17209_s20   ;;  %s14997_s19 = sphi %s15051_s19, %s17208_s19   ;;  %s14993_s18 = sphi %s15049_s18, %s17207_s18  }
   0x7   : > { %p42_p0 = scmp.ne.s32.totalorder %s14997_s19, %s14993_s18  ;;  %p17154_p1 = scmp.eq.s32.totalorder %s15070_s22, 0 }
   0x8   : > { %p156_p3 = scmp.eq.s32.totalorder %s11287_s23, 1  ;;  %p11288_p5 = scmp.ge.s32.totalorder %s15005_s21, 1 }
   0x9   : > { %p15079_p4 = por %p17154_p1, %p42_p0  ;;  %p163_p7 = scmp.lt.s32.totalorder %s15005_s21, 3 }
   0xa   : > { %p15084_p6 = por %p156_p3, %p42_p0  ;;  %s15007_s27 = smov [#allocation9]  }
   0xb   : > { %s17159_s24 = scalar_select %p15079_p4, 1, 0 }
   0xc   : > { %s17160_s25 = scalar_select %p15084_p6, 1, 0 }
   0xd   : > { %p15089_p8 = pnand %p11288_p5, %p163_p7  ;;  %s175_s28 = sshll.u32 %s15007_s27, 4  ;;  %s15093_s28 = int_to_ptr.vmem [resolvable:$true] %s175_s28 }
   0xe   : > { %s15008_s30 = smov [#allocation11]   ;;  %s14849_s9 = scalar_lea.hbm %s17149_s1, 6400 }
   0xf   : > { %p14685_p9 = pneg %p15089_p8  ;;  %s191_s6 = sshll.u32 %s15008_s30, 4  ;;  %s15104_s6 = int_to_ptr.vmem [resolvable:$true] %s191_s6 }
  0x10   : > { %p14850_p12 = scmp.ne.s32.totalorder %s17149_s1, %s14849_s9  ;;  %p14856_p5 = scmp.lt.u32.totalorder %s14849_s9, %s17149_s1 }
  0x11   : > { %p15100_p11 = pnand %p14685_p9, %p17154_p1 }
  0x13   : > { %p14851_p13 = pneg %p15100_p11 }
  0x15   : > { %p14852_p0 = pnand %p14851_p13, %p14850_p12 }
  0x17   : > { %p14853_p3 = pneg %p14852_p0 }
  0x19   : > { %p14858_p7 = pnand %p14856_p5, %p14853_p3 }
  0x1b   : > { %14861 = shalt.err (!%p14858_p7)
}
  0x1c   : > { %s14862_s14 = scalar_lea.vmem %s15093_s28, 6400  ;;  %p14870_p2 = scmp.lt.s32.totalorder %s15093_s28, %s15093_s28 }
  0x1d   : > { %p14863_p9 = scmp.ne.s32.totalorder %s15093_s28, %s14862_s14  ;;  %p14871_p12 = scmp.lt.s32.totalorder %s14862_s14, %s14862_s14 }
  0x1f   : > { %p14865_p10 = pnand %p14863_p9, %p14851_p13  ;;  %p14872_p0 = por %p14871_p12, %p14870_p2 }
  0x21   : > { %p14866_p1 = pneg %p14865_p10 }
  0x23   : > { %p14873_p6 = pnand %p14872_p0, %p14866_p1 }
  0x25   : > { %14876 = shalt.err (!%p14873_p6)
}
  0x26   : > { %s15009_s15 = smov 64   ;;  %s15010_s16 = smov 4  }
  0x27   : > { %14688 = dma.hbm_to_vmem [thread:$0]  (!%p15100_p11), %s17149_s1, 6400, %s15093_s28, [#allocation10], %s15009_s15, %s15009_s15, %s15010_s16  }
  0x28   : > { %s14877_s7 = scalar_lea.hbm %s17151_s3, 6400 }
  0x29   : > { %p14878_p2 = scmp.ne.s32.totalorder %s17151_s3, %s14877_s7  ;;  %p14884_p10 = scmp.lt.u32.totalorder %s14877_s7, %s17151_s3 }
  0x2b   : > { %p14880_p1 = pnand %p14878_p2, %p14851_p13 }
  0x2d   : > { %p14881_p6 = pneg %p14880_p1 }
  0x2f   : > { %p14886_p3 = pnand %p14884_p10, %p14881_p6 }
  0x31   : > { %14889 = shalt.err (!%p14886_p3)
}
  0x32   : > { %s14890_s28 = scalar_lea.vmem %s15104_s6, 6400  ;;  %p14898_p12 = scmp.lt.s32.totalorder %s15104_s6, %s15104_s6 }
  0x33   : > { %p14891_p5 = scmp.ne.s32.totalorder %s15104_s6, %s14890_s28  ;;  %p14899_p0 = scmp.lt.s32.totalorder %s14890_s28, %s14890_s28 }
  0x35   : > { %p14893_p7 = pnand %p14891_p5, %p14851_p13  ;;  %p14900_p2 = por %p14899_p0, %p14898_p12 }
  0x37   : > { %p14894_p9 = pneg %p14893_p7 }
  0x39   : > { %p14901_p1 = pnand %p14900_p2, %p14894_p9 }
  0x3b   : > { %14904 = shalt.err (!%p14901_p1)
}
  0x3c   : > { %14691 = dma.hbm_to_vmem [thread:$0]  (!%p15100_p11), %s17151_s3, 6400, %s15104_s6, [#allocation10], %s15009_s15, %s15009_s15, %s15010_s16  }
  0x3d   : > { %s15159_s14 = sadd.s32 1, %s15005_s21   ;;  %s29_s29 = sadd.s32 1, %s15001_s20 }
  0x3e   : > { %s26_s17 = ssub.s32 %s15005_s21, %s15159_s14  ;;  %p36_p13 = scmp.ne.s32.totalorder %s15001_s20, %s14997_s19 }
  0x3f   : > { %p27_p6 = scmp.eq.s32.totalorder %s26_s17, 0  ;;  %p37_p10 = scmp.eq.s32.totalorder %s15005_s21, 0 }
  0x40   : > { %p17163_p3 = scmp.eq.s32.totalorder %s15070_s22, 1  ;;  %p14702_p7 = scmp.lt.s32.totalorder %s15005_s21, 2 }
  0x41   : > { %s15175_s27 = scalar_select %p27_p6, %s15001_s20, %s29_s29  }
  0x42   : > { %p15169_p5 = por %p17163_p3, %p36_p13  ;;  %p38_p9 = por %p37_p10, %p36_p13 }
  0x43   : > { %s208_s30 = sand.u32 1, %s15001_s20   ;;  %s11907_s6 = sshll.u32 %s15005_s21, 12 }
  0x44   : > { %s17164_s23 = scalar_select %p15169_p5, 1, 0 }
  0x45   : > { %s11292_s7 = sshll.u32 %s208_s30, 8  ;;  %s15182_s8 = scalar_lea.hbm %s17148_s0, %s11907_s6 }
  0x46   : > { %s212_s9 = scalar_lea.vmem [#allocation6], %s11292_s7  ;;  %p15186_p11 = pnand %p14702_p7, %p38_p9 }
  0x47   : > { %s219_s10 = sshll.u32 %s212_s9, 4  ;;  %s15190_s28 = scalar_lea.sflag [#allocation7], %s208_s30  ;;  %s15184_s10 = int_to_ptr.vmem [resolvable:$true] %s219_s10 }
  0x48   : > { %s14905_s12 = scalar_lea.hbm %s15182_s8, 4096  ;;  %p14907_p0 = pneg %p15186_p11 }
  0x49   : > { %p14906_p12 = scmp.ne.s32.totalorder %s15182_s8, %s14905_s12  ;;  %s14910_s17 = scalar_lea.hbm %s17148_s0, 8192 }
  0x4a   : > { %p14911_p13 = scmp.lt.u32.totalorder %s15182_s8, %s17148_s0  ;;  %p14912_p6 = scmp.lt.u32.totalorder %s14910_s17, %s14905_s12 }
  0x4b   : > { %p14908_p2 = pnand %p14907_p0, %p14906_p12  ;;  %p14914_p3 = scmp.lt.u32.totalorder %s14905_s12, %s15182_s8 }
  0x4c   : > { %p14913_p10 = por %p14912_p6, %p14911_p13 }
  0x4d   : > { %p14909_p1 = pneg %p14908_p2 }
  0x4e   : > { %p14915_p7 = por %p14914_p3, %p14913_p10 }
  0x50   : > { %p14916_p9 = pnand %p14915_p7, %p14909_p1 }
  0x52   : > { %14919 = shalt.err (!%p14916_p9)
}
  0x53   : > { %s14920_s30 = scalar_lea.vmem %s15184_s10, 4096  ;;  %s15011_s15 = smov [#allocation6]  }
  0x54   : > { %p14921_p12 = scmp.ne.s32.totalorder %s15184_s10, %s14920_s30  ;;  %s14925_s16 = sshll.u32 %s15011_s15, 4  ;;  %s14926_s16 = int_to_ptr.vmem [resolvable:$false] %s14925_s16 }
  0x55   : > { %s14927_s9 = scalar_lea.vmem %s14926_s16, 8192  ;;  %p14928_p4 = scmp.lt.s32.totalorder %s15184_s10, %s14926_s16 }
  0x56   : > { %p14923_p2 = pnand %p14921_p12, %p14907_p0  ;;  %p14929_p13 = scmp.lt.s32.totalorder %s14927_s9, %s14920_s30 }
  0x58   : > { %p14924_p5 = pneg %p14923_p2  ;;  %p14930_p6 = por %p14929_p13, %p14928_p4 }
  0x5a   : > { %p14931_p10 = pnand %p14930_p6, %p14924_p5 }
  0x5c   : > { %14934 = shalt.err (!%p14931_p10)
}
  0x5d   : > { %s15012_s12 = smov 128   ;;  %s15013_s13 = smov 8  }
  0x5e   : > { %14695 = dma.hbm_to_vmem [thread:$0]  (!%p15186_p11), %s15182_s8, 4096, %s15184_s10, %s15190_s28, %s15012_s12, %s15012_s12, %s15013_s13  }
  0x5f   : > { %231 = sbr.rel (%p15089_p8) target bundleno = 2003 (0x7d3), region = 40 }
  0x66   : > { %s15221_s29 = sand.u32 1, %s14997_s19   ;;  %p17166_p4 = scmp.ne.s32.totalorder %s17159_s24, 0 }
  0x67   : > { %s11296_s17 = sshll.u32 %s15221_s29, 8  ;;  %s234_s7 = scalar_lea.sflag [#allocation7], %s15221_s29 }
  0x68   : > { %s15225_s6 = scalar_lea.vmem [#allocation6], %s11296_s17 }
  0x69   : > { %14980 = dma.done.wait (%p17166_p4), %s234_s7, 4096  }
  0x6a   : > { %14982 = vsyncadd (%p17166_p4), %s234_s7, 4294963200  ;;  %p17167_p5 = scmp.eq.s32.totalorder %s15070_s22, 0 }
  0x6c   : > { %14984 = dma.done.wait (%p17167_p5), [#allocation10], 12800   ;;  %p17168_p8 = pmov %p17167_p5 }
  0x6d   : > { %vm273_vm0 = vcmask 236544   ;;  %vm276_vm1 = vcmask 232448   ;;  %vm564_vm2 = vcmask 1045504   ;;  %v17157_v0 = vmov 0.0   ;;  %v14748_v3 = vld [vmem:[#allocation9 + $0x10] sm:$0xff]   ;;  %v335_v19 = vld [vmem:[%s15225_s6] sm:$0xff] }
  0x6e   : > { %14986 = vsyncadd (%p17168_p8), [#allocation10], 4294954496  ;;  %274 = vst.msk [vmem:[#allocation2] sm:$0xff] %vm273_vm0, %v17157_v0  ;;  %vm565_vm3 = vcmask 1046528   ;;  %v15015_v1 = vmov 65535   ;;  %v14749_v4 = vld [vmem:[#allocation9 + $0x90] sm:$0xff]   ;;  %12509 = vmatprep.subr.bf16.mxu1 %v14748_v3 }
  0x6f   : > { %275 = vst.msk [vmem:[#allocation2 + $0x8] sm:$0xff] %vm273_vm0, %v17157_v0  ;;  %278 = vst.msk [vmem:[#allocation2 + $0x18] sm:$0xff] %vm273_vm0, %v17157_v0  ;;  %v566_v2 = vsel %vm564_vm2, 4294967295, %v15015_v1  ;;  %v14750_v6 = vld [vmem:[#allocation9 + $0x18] sm:$0x7f]   ;;  %12833 = vmatprep.subr.bf16.mxu0 %v14749_v4  ;;  %12510 = vmatpush3.bf16.msra.mxu1 %v14748_v3  ;;  %v336_v20 = vld [vmem:[%s15225_s6 + $0x8] sm:$0xff] }
  0x70   : > { %277 = vst.msk [vmem:[#allocation2 + $0x10] sm:$0xf] %vm276_vm1, %v17157_v0  ;;  %280 = vst.msk [vmem:[#allocation2 + $0x28] sm:$0xf] %vm276_vm1, %v17157_v0  ;;  %v15356_v5 = vsel %vm565_vm3, %v566_v2, 0  ;;  %12834 = vmatpush3.bf16.msra.mxu0 %v14749_v4  ;;  %v14752_v21 = vld [vmem:[#allocation9 + $0xa0] sm:$0xff]  }
  0x71   : > { %279 = vst.msk [vmem:[#allocation2 + $0x20] sm:$0xff] %vm273_vm0, %v17157_v0  ;;  %281 = vst.msk [vmem:[#allocation2 + $0x30] sm:$0xff] %vm273_vm0, %v17157_v0  ;;  %v14751_v7 = vld [vmem:[#allocation9 + $0x98] sm:$0x7f]   ;;  %v569_v8 = vand.u32 %v14750_v6, %v15356_v5  ;;  %v337_v22 = vld [vmem:[%s15225_s6 + $0x10] sm:$0xff]  ;;  %vm8113_vm4 = vcmask 261120  }
  0x72   : > { %282 = vst.msk [vmem:[#allocation2 + $0x38] sm:$0xff] %vm273_vm0, %v17157_v0  ;;  %284 = vst.msk [vmem:[#allocation2 + $0x48] sm:$0xff] %vm273_vm0, %v17157_v0  ;;  %v15360_v12 = vand.u32 %v14751_v7, %v15356_v5  ;;  %v338_v23 = vld [vmem:[%s15225_s6 + $0x18] sm:$0xff]  ;;  %v339_v24 = vld [vmem:[%s15225_s6 + $0x20] sm:$0xff]  ;;  %vm8147_vm5 = vcmask 257024   ;;  %s11299_s11 = sshll.u32 %s15221_s29, 4 }
  0x73   : > { %283 = vst.msk [vmem:[#allocation2 + $0x40] sm:$0xf] %vm276_vm1, %v17157_v0  ;;  %286 = vst.msk [vmem:[#allocation2 + $0x58] sm:$0xf] %vm276_vm1, %v17157_v0  ;;  %12511 = vmatprep.subr.bf16.mxu1 %v569_v8  ;;  %v340_v25 = vld [vmem:[%s15225_s6 + $0x28] sm:$0xff]  ;;  %v341_v26 = vld [vmem:[%s15225_s6 + $0x30] sm:$0xff] }
  0x74   : > { %285 = vst.msk [vmem:[#allocation2 + $0x50] sm:$0xff] %vm273_vm0, %v17157_v0  ;;  %287 = vst.msk [vmem:[#allocation2 + $0x60] sm:$0xff] %vm273_vm0, %v17157_v0  ;;  %12835 = vmatprep.subr.bf16.mxu0 %v15360_v12  ;;  %12512 = vmatpush3.bf16.msra.mxu1 %v569_v8  ;;  %v342_v27 = vld [vmem:[%s15225_s6 + $0x38] sm:$0xff]  ;;  %v343_v28 = vld [vmem:[%s15225_s6 + $0x40] sm:$0xff]  ;;  %s11908_s28 = sshll.u32 %s15070_s22, 8  ;;  %s271_s30 = scalar_lea.vmem [#allocation12], %s11299_s11 }
  0x75   : > { %288 = vst.msk [vmem:[#allocation2 + $0x68] sm:$0xff] %vm273_vm0, %v17157_v0  ;;  %290 = vst.msk [vmem:[#allocation2 + $0x78] sm:$0xff] %vm273_vm0, %v17157_v0  ;;  %12836 = vmatpush3.bf16.msra.mxu0 %v15360_v12  ;;  %v344_v29 = vld [vmem:[%s15225_s6 + $0x48] sm:$0xff]  ;;  %v345_v31 = vld [vmem:[%s15225_s6 + $0x50] sm:$0xff]  ;;  %s11195_s15 = sshll.u32 %s271_s30, 4  ;;  %s17100_s9 = scalar_lea.hbm %s17153_s5, %s11908_s28  ;;  %s17102_s15 = int_to_ptr.vmem [resolvable:$true] %s11195_s15 }
  0x76   : > { %289 = vst.msk [vmem:[#allocation2 + $0x70] sm:$0xf] %vm276_vm1, %v17157_v0  ;;  %292 = vst.msk [vmem:[#allocation2 + $0x88] sm:$0xf] %vm276_vm1, %v17157_v0  ;;  %v452_v9 = vld [vmem:[#allocation2 + $0x1] sm:$0xff]  ;;  %12869 = vmatprep.subr.bf16.mxu0 %v14752_v21  ;;  %v346_v32 = vld [vmem:[%s15225_s6 + $0x58] sm:$0xff] }
  0x77   : > { %291 = vst.msk [vmem:[#allocation2 + $0x80] sm:$0xff] %vm273_vm0, %v17157_v0  ;;  %293 = vst.msk [vmem:[#allocation2 + $0x90] sm:$0xff] %vm273_vm0, %v17157_v0  ;;  %v453_v10 = vld [vmem:[#allocation2 + $0x9] sm:$0xff]  ;;  %v347_v33 = vld [vmem:[%s15225_s6 + $0x60] sm:$0xff]  ;;  %s11182_s12 = scalar_lea.sflag [#allocation8], %s15221_s29  ;;  %s14935_s13 = scalar_lea.vmem %s17102_s15, 256 }
  0x78   : > { %294 = vst.msk [vmem:[#allocation2 + $0x98] sm:$0xff] %vm273_vm0, %v17157_v0  ;;  %296 = vst.msk [vmem:[#allocation2 + $0xa8] sm:$0xff] %vm273_vm0, %v17157_v0  ;;  %v3112_v11 = vld [vmem:[#allocation2 + $0x1c] sm:$0xff]  ;;  %v484_v13 = vpack.c.bf16 %v453_v10, %v452_v9  ;;  %v3113_v14 = vld [vmem:[#allocation2 + $0x24] sm:$0xff]  ;;  %p14936_p11 = scmp.ne.s32.totalorder %s17102_s15, %s14935_s13  ;;  %p17204_p0 = scmp.ne.s32.totalorder %s17164_s23, 0 }
  0x79   : > { %295 = vst.msk [vmem:[#allocation2 + $0xa0] sm:$0xf] %vm276_vm1, %v17157_v0  ;;  %298 = vst.msk [vmem:[#allocation2 + $0xb8] sm:$0xf] %vm276_vm1, %v17157_v0  ;;  %v454_v15 = vld [vmem:[#allocation2 + $0x19] sm:$0xff]  ;;  %v455_v16 = vld [vmem:[#allocation2 + $0x21] sm:$0xff]  ;;  %v3144_v17 = vpack.c.bf16 %v3113_v14, %v3112_v11 }
  0x7a   : > { %297 = vst.msk [vmem:[#allocation2 + $0xb0] sm:$0xff] %vm273_vm0, %v17157_v0  ;;  %299 = vst.msk [vmem:[#allocation2 + $0xc0] sm:$0xff] %vm273_vm0, %v17157_v0  ;;  %v485_v18 = vpack.c.bf16 %v455_v16, %v454_v15  ;;  %12513 = vmatprep.mubr.msk.bf16.mxu1 %vm273_vm0, %v484_v13  ;;  %v14753_v30 = vld [vmem:[#allocation9 + $0xa8] sm:$0x7f]   ;;  %v349_v35 = vld [vmem:[%s15225_s6 + $0x70] sm:$0xff]  ;;  %p14937_p1 = pnand %p14936_p11, %p17204_p0  ;;  %s15016_s17 = smov [#allocation12]  }
  0x7b   : > { %300 = vst.msk [vmem:[#allocation2 + $0xc8] sm:$0xff] %vm273_vm0, %v17157_v0  ;;  %302 = vst.msk [vmem:[#allocation2 + $0xd8] sm:$0xff] %vm273_vm0, %v17157_v0  ;;  %12837 = vmatprep.mubr.msk.bf16.mxu0 %vm273_vm0, %v3144_v17  ;;  %v348_v34 = vld [vmem:[%s15225_s6 + $0x68] sm:$0xff]  ;;  %v350_v36 = vld [vmem:[%s15225_s6 + $0x78] sm:$0xff]  ;;  %v3533_v49 = vand.u32 %v14753_v30, %v15356_v5  ;;  %s14939_s7 = sshll.u32 %s15016_s17, 4  ;;  %s14940_s7 = int_to_ptr.vmem [resolvable:$false] %s14939_s7 }
  0x7c   : > { %301 = vst.msk [vmem:[#allocation2 + $0xd0] sm:$0xf] %vm276_vm1, %v17157_v0  ;;  %304 = vst.msk [vmem:[#allocation2 + $0xe8] sm:$0xf] %vm276_vm1, %v17157_v0  ;;  %12514 = vmatmul.mubr.msk.bf16.vlgmr.msra.gmra.mrb[0].mxu1 %vm273_vm0, %v485_v18  ;;  %v351_v37 = vld [vmem:[%s15225_s6 + $0x80] sm:$0xff]  ;;  %v352_v38 = vld [vmem:[%s15225_s6 + $0x88] sm:$0xff]  ;;  %p14938_p3 = pneg %p14937_p1  ;;  %p14942_p7 = scmp.lt.s32.totalorder %s17102_s15, %s14940_s7 }
  0x7d   : > { %303 = vst.msk [vmem:[#allocation2 + $0xe0] sm:$0xff] %vm273_vm0, %v17157_v0  ;;  %305 = vst.msk [vmem:[#allocation2 + $0xf0] sm:$0xff] %vm273_vm0, %v17157_v0  ;;  %v353_v10 = vld [vmem:[%s15225_s6 + $0x90] sm:$0xff]  ;;  %v354_v14 = vld [vmem:[%s15225_s6 + $0x98] sm:$0xff] }
  0x7e   : > { %306 = vst.msk [vmem:[#allocation2 + $0xf8] sm:$0xff] %vm273_vm0, %v17157_v0  ;;  %308 = vst.msk [vmem:[#allocation2 + $0x108] sm:$0xff] %vm273_vm0, %v17157_v0  ;;  %v15432_v15 = vld [vmem:[#allocation9 + $0xb0] sm:$0xff]   ;;  %v355_v18 = vld [vmem:[%s15225_s6 + $0xa0] sm:$0xff] }
  0x7f   : > { %307 = vst.msk [vmem:[#allocation2 + $0x100] sm:$0xf] %vm276_vm1, %v17157_v0  ;;  %310 = vst.msk [vmem:[#allocation2 + $0x118] sm:$0xf] %vm276_vm1, %v17157_v0  ;;  %v362_v30 = vld [vmem:[%s15225_s6 + $0xd8] sm:$0xff] }
  0x80   : > { %309 = vst.msk [vmem:[#allocation2 + $0x110] sm:$0xff] %vm273_vm0, %v17157_v0  ;;  %311 = vst.msk [vmem:[#allocation2 + $0x120] sm:$0xff] %vm273_vm0, %v17157_v0 }
  0x81   : > { %312 = vst.msk [vmem:[#allocation2 + $0x128] sm:$0xff] %vm273_vm0, %v17157_v0  ;;  %314 = vst.msk [vmem:[#allocation2 + $0x138] sm:$0xff] %vm273_vm0, %v17157_v0 }
  0x82   : > { %313 = vst.msk [vmem:[#allocation2 + $0x130] sm:$0xf] %vm276_vm1, %v17157_v0  ;;  %316 = vst.msk [vmem:[#allocation2 + $0x148] sm:$0xf] %vm276_vm1, %v17157_v0 }
  0x83   : > { %315 = vst.msk [vmem:[#allocation2 + $0x140] sm:$0xff] %vm273_vm0, %v17157_v0  ;;  %317 = vst.msk [vmem:[#allocation2 + $0x150] sm:$0xff] %vm273_vm0, %v17157_v0 }
  0x84   : > { %318 = vst.msk [vmem:[#allocation2 + $0x158] sm:$0xff] %vm273_vm0, %v17157_v0  ;;  %320 = vst.msk [vmem:[#allocation2 + $0x168] sm:$0xff] %vm273_vm0, %v17157_v0 }
  0x85   : > { %319 = vst.msk [vmem:[#allocation2 + $0x160] sm:$0xf] %vm276_vm1, %v17157_v0  ;;  %322 = vst.msk [vmem:[#allocation2 + $0x178] sm:$0xf] %vm276_vm1, %v17157_v0 }
  0x86   : > { %321 = vst.msk [vmem:[#allocation2 + $0x170] sm:$0xff] %vm273_vm0, %v17157_v0  ;;  %323 = vst.msk [vmem:[#allocation2 + $0x180] sm:$0xff] %vm273_vm0, %v17157_v0 }
  0x87   : > { %324 = vst.msk [vmem:[#allocation2 + $0x188] sm:$0xff] %vm273_vm0, %v17157_v0  ;;  %326 = vst.msk [vmem:[#allocation2 + $0x198] sm:$0xff] %vm273_vm0, %v17157_v0 }
  0x88   : > { %325 = vst.msk [vmem:[#allocation2 + $0x190] sm:$0xf] %vm276_vm1, %v17157_v0  ;;  %328 = vst.msk [vmem:[#allocation2 + $0x1a8] sm:$0xf] %vm276_vm1, %v17157_v0 }
  0x89   : > { %327 = vst.msk [vmem:[#allocation2 + $0x1a0] sm:$0xff] %vm273_vm0, %v17157_v0  ;;  %329 = vst.msk [vmem:[#allocation2 + $0x1b0] sm:$0xff] %vm273_vm0, %v17157_v0 }
  0x8a   : > { %330 = vst.msk [vmem:[#allocation2 + $0x1b8] sm:$0xff] %vm273_vm0, %v17157_v0  ;;  %332 = vst.msk [vmem:[#allocation2 + $0x1c8] sm:$0xff] %vm273_vm0, %v17157_v0 }
  0x8b   : > { %331 = vst.msk [vmem:[#allocation2 + $0x1c0] sm:$0xf] %vm276_vm1, %v17157_v0  ;;  %334 = vst.msk [vmem:[#allocation2 + $0x1d8] sm:$0xf] %vm276_vm1, %v17157_v0 }
  0x8c   : > { %333 = vst.msk [vmem:[#allocation2 + $0x1d0] sm:$0xff] %vm273_vm0, %v17157_v0  ;;  %368 = vst.msk [vmem:[#allocation2 + $0x32] sm:$0xff] %vm273_vm0, %v335_v19  ;;  %v356_v19 = vld [vmem:[%s15225_s6 + $0xa8] sm:$0xff] }
  0x8d   : > { %369 = vst.msk [vmem:[#allocation2 + $0x3a] sm:$0xff] %vm273_vm0, %v336_v20  ;;  %370 = vst.msk [vmem:[#allocation2 + $0x4a] sm:$0xff] %vm273_vm0, %v337_v22  ;;  %v358_v22 = vld [vmem:[%s15225_s6 + $0xb8] sm:$0xff] }
  0x8e   : > { %371 = vst.msk [vmem:[#allocation2 + $0x52] sm:$0xff] %vm273_vm0, %v338_v23  ;;  %372 = vst.msk [vmem:[#allocation2 + $0x62] sm:$0xff] %vm273_vm0, %v339_v24  ;;  %v359_v24 = vld [vmem:[%s15225_s6 + $0xc0] sm:$0xff] }
  0x8f   : > { %373 = vst.msk [vmem:[#allocation2 + $0x6a] sm:$0xff] %vm273_vm0, %v340_v25  ;;  %374 = vst.msk [vmem:[#allocation2 + $0x7a] sm:$0xff] %vm273_vm0, %v341_v26 }
  0x90   : > { %375 = vst.msk [vmem:[#allocation2 + $0x82] sm:$0xff] %vm273_vm0, %v342_v27  ;;  %376 = vst.msk [vmem:[#allocation2 + $0x92] sm:$0xff] %vm273_vm0, %v343_v28  ;;  %v360_v28 = vld [vmem:[%s15225_s6 + $0xc8] sm:$0xff] }
  0x91   : > { %377 = vst.msk [vmem:[#allocation2 + $0x9a] sm:$0xff] %vm273_vm0, %v344_v29  ;;  %378 = vst.msk [vmem:[#allocation2 + $0xaa] sm:$0xff] %vm273_vm0, %v345_v31  ;;  %v361_v29 = vld [vmem:[%s15225_s6 + $0xd0] sm:$0xff] }
  0x92   : > { %379 = vst.msk [vmem:[#allocation2 + $0xb2] sm:$0xff] %vm273_vm0, %v346_v32  ;;  %380 = vst.msk [vmem:[#allocation2 + $0xc2] sm:$0xff] %vm273_vm0, %v347_v33  ;;  %v14755_v32 = vld [vmem:[#allocation9] sm:$0xff]  }
  0x93   : > { %381 = vst.msk [vmem:[#allocation2 + $0xca] sm:$0xff] %vm273_vm0, %v348_v34  ;;  %382 = vst.msk [vmem:[#allocation2 + $0xda] sm:$0xff] %vm273_vm0, %v349_v35  ;;  %v456_v41 = vld [vmem:[#allocation2 + $0x31] sm:$0xff]  ;;  %12545 = vmatprep.subr.bf16.mxu1 %v14755_v32 }
  0x94   : > { %v3114_v39 = vld [vmem:[#allocation2 + $0x34] sm:$0xff]  ;;  %v3115_v40 = vld [vmem:[#allocation2 + $0x3c] sm:$0xff]  ;;  %383 = vst.msk [vmem:[#allocation2 + $0xe2] sm:$0xff] %vm273_vm0, %v350_v36  ;;  %384 = vst.msk [vmem:[#allocation2 + $0xf2] sm:$0xff] %vm273_vm0, %v351_v37  ;;  %12546 = vmatpush3.bf16.msra.mxu1 %v14755_v32 }
  0x95   : > { %385 = vst.msk [vmem:[#allocation2 + $0xfa] sm:$0xff] %vm273_vm0, %v352_v38  ;;  %v3145_v42 = vpack.c.bf16 %v3115_v40, %v3114_v39  ;;  %v457_v43 = vld [vmem:[#allocation2 + $0x39] sm:$0xff]  ;;  %v458_v44 = vld [vmem:[#allocation2 + $0x49] sm:$0xff]  ;;  %v459_v48 = vld [vmem:[#allocation2 + $0x51] sm:$0xff] }
  0x96   : > { %v15403_v45 = vpack.c.bf16 %v457_v43, %v456_v41  ;;  %v3116_v46 = vld [vmem:[#allocation2 + $0x4c] sm:$0xff]  ;;  %v3117_v47 = vld [vmem:[#allocation2 + $0x54] sm:$0xff]  ;;  %v15407_v51 = vpack.c.bf16 %v459_v48, %v458_v44  ;;  %v460_v52 = vld [vmem:[#allocation2 + $0x61] sm:$0xff]  ;;  %386 = vst.msk [vmem:[#allocation2 + $0x10a] sm:$0xff] %vm273_vm0, %v353_v10 }
  0x97   : > { %12838 = vmatmul.mubr.msk.bf16.vlgmr.msra.gmra.mrb[0].mxu0 %vm273_vm0, %v3145_v42  ;;  %v3146_v50 = vpack.c.bf16 %v3117_v47, %v3116_v46  ;;  %v3118_v53 = vld [vmem:[#allocation2 + $0x64] sm:$0xff]  ;;  %v3119_v54 = vld [vmem:[#allocation2 + $0x6c] sm:$0xff]  ;;  %v3120_v57 = vld [vmem:[#allocation2 + $0x7c] sm:$0xff]  ;;  %387 = vst.msk [vmem:[#allocation2 + $0x112] sm:$0xff] %vm273_vm0, %v354_v14 }
  0x98   : > { %12870 = vmatpush3.bf16.msra.mxu0 %v14752_v21  ;;  %12517 = vmatprep.mubr.msk.bf16.mxu1 %vm273_vm0, %v15403_v45  ;;  %v461_v55 = vld [vmem:[#allocation2 + $0x69] sm:$0xff]  ;;  %v462_v59 = vld [vmem:[#allocation2 + $0x79] sm:$0xff]  ;;  %v463_v60 = vld [vmem:[#allocation2 + $0x81] sm:$0xff]  ;;  %v3147_v61 = vpack.c.bf16 %v3119_v54, %v3118_v53  ;;  %388 = vst.msk [vmem:[#allocation2 + $0x122] sm:$0xff] %vm273_vm0, %v355_v18 }
  0x99   : > { %12841 = vmatprep.mubr.msk.bf16.mxu0 %vm273_vm0, %v3146_v50  ;;  %12518 = vmatmul.mubr.msk.bf16.gmra.mrb[4].mxu1 %vm273_vm0, %v15407_v51  ;;  %v15414_v56 = vpack.c.bf16 %v461_v55, %v460_v52  ;;  %v3121_v58 = vld [vmem:[#allocation2 + $0x84] sm:$0xff]  ;;  %v464_v62 = vld [vmem:[#allocation2 + $0x91] sm:$0xff]  ;;  %v465_v63 = vld [vmem:[#allocation2 + $0x99] sm:$0xff]  ;;  %v15418_v2 = vpack.c.bf16 %v463_v60, %v462_v59  ;;  %389 = vst.msk [vmem:[#allocation2 + $0x12a] sm:$0xff] %vm273_vm0, %v356_v19 }
  0x9a   : > { %12871 = vmatprep.subr.bf16.mxu0 %v3533_v49  ;;  %v3148_v1 = vpack.c.bf16 %v3121_v58, %v3120_v57  ;;  %v15420_v3 = vpack.c.bf16 %v465_v63, %v464_v62  ;;  %v3122_v4 = vld [vmem:[#allocation2 + $0x94] sm:$0xff]  ;;  %v3123_v6 = vld [vmem:[#allocation2 + $0x9c] sm:$0xff]  ;;  %v3124_v7 = vld [vmem:[#allocation2 + $0xac] sm:$0xff]  ;;  %391 = vst.msk [vmem:[#allocation2 + $0x142] sm:$0xff] %vm273_vm0, %v358_v22 }
  0x9b   : > { %12521 = vmatprep.mubr.msk.bf16.mxu1 %vm273_vm0, %v15414_v56  ;;  %v3125_v8 = vld [vmem:[#allocation2 + $0xb4] sm:$0xff]  ;;  %v466_v9 = vld [vmem:[#allocation2 + $0xa9] sm:$0xff]  ;;  %v468_v13 = vld [vmem:[#allocation2 + $0xc1] sm:$0xff]  ;;  %v3149_v16 = vpack.c.bf16 %v3123_v6, %v3122_v4  ;;  %392 = vst.msk [vmem:[#allocation2 + $0x152] sm:$0xff] %vm273_vm0, %v359_v24 }
  0x9c   : > { %12872 = vmatpush3.bf16.msra.mxu0 %v3533_v49  ;;  %v467_v11 = vld [vmem:[#allocation2 + $0xb1] sm:$0xff]  ;;  %v469_v17 = vld [vmem:[#allocation2 + $0xc9] sm:$0xff]  ;;  %v3150_v20 = vpack.c.bf16 %v3125_v8, %v3124_v7  ;;  %393 = vst.msk [vmem:[#allocation2 + $0x15a] sm:$0xff] %vm273_vm0, %v360_v28  ;;  %v3128_v31 = vld [vmem:[#allocation2 + $0xdc] sm:$0xff] }
  0x9d   : > { %12905 = vmatprep.subr.bf16.mxu0 %v15432_v15  ;;  %v357_v21 = vld [vmem:[%s15225_s6 + $0xb0] sm:$0xff]  ;;  %v15441_v23 = vpack.c.bf16 %v467_v11, %v466_v9  ;;  %v3126_v25 = vld [vmem:[#allocation2 + $0xc4] sm:$0xff]  ;;  %v15446_v27 = vpack.c.bf16 %v469_v17, %v468_v13  ;;  %394 = vst.msk [vmem:[#allocation2 + $0x16a] sm:$0xff] %vm273_vm0, %v361_v29  ;;  %395 = vst.msk [vmem:[#allocation2 + $0x172] sm:$0xff] %vm273_vm0, %v362_v30 }
  0x9e   : > { %390 = vst.msk [vmem:[#allocation2 + $0x13a] sm:$0xff] %vm273_vm0, %v357_v21  ;;  %v3127_v26 = vld [vmem:[#allocation2 + $0xcc] sm:$0xff]  ;;  %v3129_v33 = vld [vmem:[#allocation2 + $0xe4] sm:$0xff]  ;;  %v470_v34 = vld [vmem:[#allocation2 + $0xd9] sm:$0xff] }
  0x9f   : > { %12842 = vmatmul.mubr.msk.bf16.gmra.mrb[4].mxu0 %vm273_vm0, %v3147_v61  ;;  %v471_v35 = vld [vmem:[#allocation2 + $0xe1] sm:$0xff]  ;;  %v3151_v37 = vpack.c.bf16 %v3127_v26, %v3126_v25  ;;  %v472_v38 = vld [vmem:[#allocation2 + $0xf1] sm:$0xff]  ;;  %v473_v39 = vld [vmem:[#allocation2 + $0xf9] sm:$0xff]  ;;  %v3152_v40 = vpack.c.bf16 %v3129_v33, %v3128_v31 }
  0xa0   : > { %12845 = vmatprep.mubr.msk.bf16.mxu0 %vm273_vm0, %v3148_v1  ;;  %v14756_v36 = vld [vmem:[#allocation9 + $0x8] sm:$0x7f]   ;;  %v15462_v42 = vpack.c.bf16 %v471_v35, %v470_v34  ;;  %v15464_v43 = vpack.c.bf16 %v473_v39, %v472_v38  ;;  %v3130_v44 = vld [vmem:[#allocation2 + $0xf4] sm:$0xff]  ;;  %v3131_v46 = vld [vmem:[#allocation2 + $0xfc] sm:$0xff] }
  0xa1   : > { %12522 = vmatmul.mubr.msk.bf16.gmra.mrb[8].mxu1 %vm273_vm0, %v15418_v2  ;;  %v792_v41 = vand.u32 %v14756_v36, %v15356_v5  ;;  %v3420_v47 = vld [vmem:[#allocation2 + $0x30] sm:$0xff]  ;;  %v3421_v48 = vld [vmem:[#allocation2 + $0x38] sm:$0xff]  ;;  %v3153_v52 = vpack.c.bf16 %v3131_v46, %v3130_v44  ;;  %v476_v53 = vld [vmem:[#allocation2 + $0x121] sm:$0xff] }
  0xa2   : > { %12525 = vmatprep.mubr.msk.bf16.mxu1 %vm273_vm0, %v15420_v3  ;;  %v474_v49 = vld [vmem:[#allocation2 + $0x109] sm:$0xff]  ;;  %v475_v50 = vld [vmem:[#allocation2 + $0x111] sm:$0xff]  ;;  %v15472_v55 = vpack.c.bf16 %v3421_v48, %v3420_v47  ;;  %v363_v58 = vld [vmem:[%s15225_s6 + $0xe0] sm:$0xff] }
  0xa3   : > { %12547 = vmatprep.subr.bf16.mxu1 %v792_v41  ;;  %v477_v54 = vld [vmem:[#allocation2 + $0x129] sm:$0xff]  ;;  %v15474_v57 = vpack.c.bf16 %v475_v50, %v474_v49  ;;  %396 = vst.msk [vmem:[#allocation2 + $0x182] sm:$0xff] %vm273_vm0, %v363_v58  ;;  %v366_v1 = vld [vmem:[%s15225_s6 + $0xf8] sm:$0xff]  ;;  %v3424_v4 = vld [vmem:[#allocation2 + $0x60] sm:$0xff] }
  0xa4   : > { %12548 = vmatpush3.bf16.msra.mxu1 %v792_v41  ;;  %v364_v59 = vld [vmem:[%s15225_s6 + $0xe8] sm:$0xff]  ;;  %v3423_v61 = vld [vmem:[#allocation2 + $0x50] sm:$0xff]  ;;  %v15478_v62 = vpack.c.bf16 %v477_v54, %v476_v53  ;;  %399 = vst.msk [vmem:[#allocation2 + $0x1a2] sm:$0xff] %vm273_vm0, %v366_v1  ;;  %v14759_v6 = vld [vmem:[#allocation9 + $0x20] sm:$0xff]  }
  0xa5   : > { %v3422_v60 = vld [vmem:[#allocation2 + $0x48] sm:$0xff]  ;;  %397 = vst.msk [vmem:[#allocation2 + $0x18a] sm:$0xff] %vm273_vm0, %v364_v59  ;;  %v365_v63 = vld [vmem:[%s15225_s6 + $0xf0] sm:$0xff]  ;;  %v14757_v8 = vld [vmem:[#allocation9 + $0xb8] sm:$0x7f]   ;;  %12581 = vmatprep.subr.bf16.mxu1 %v14759_v6  ;;  %s14941_s6 = scalar_lea.vmem %s14940_s7, 512 }
  0xa6   : > { %398 = vst.msk [vmem:[#allocation2 + $0x19a] sm:$0xff] %vm273_vm0, %v365_v63  ;;  %v3425_v7 = vld [vmem:[#allocation2 + $0x68] sm:$0xff]  ;;  %v478_v9 = vld [vmem:[#allocation2 + $0x139] sm:$0xff]  ;;  %v15493_v11 = vpack.c.bf16 %v3423_v61, %v3422_v60  ;;  %v480_v13 = vld [vmem:[#allocation2 + $0x151] sm:$0xff]  ;;  %v3841_v18 = vand.u32 %v14757_v8, %v15356_v5  ;;  %p14943_p9 = scmp.lt.s32.totalorder %s14941_s6, %s14935_s13 }
  0xa7   : > { %12846 = vmatmul.mubr.msk.bf16.gmra.mrb[8].mxu0 %vm273_vm0, %v3149_v16  ;;  %v479_v10 = vld [vmem:[#allocation2 + $0x141] sm:$0xff]  ;;  %v481_v14 = vld [vmem:[#allocation2 + $0x159] sm:$0xff]  ;;  %v3454_v16 = vpack.c.bf16 %v3425_v7, %v3424_v4  ;;  %v3428_v22 = vld [vmem:[#allocation2 + $0x90] sm:$0xff] }
  0xa8   : > { %12849 = vmatprep.mubr.msk.bf16.mxu0 %vm273_vm0, %v3150_v20  ;;  %v15495_v17 = vpack.c.bf16 %v479_v10, %v478_v9  ;;  %v15498_v19 = vpack.c.bf16 %v481_v14, %v480_v13  ;;  %v3426_v20 = vld [vmem:[#allocation2 + $0x78] sm:$0xff]  ;;  %v3427_v21 = vld [vmem:[#allocation2 + $0x80] sm:$0xff]  ;;  %v482_v26 = vld [vmem:[#allocation2 + $0x169] sm:$0xff]  ;;  %p14944_p12 = por %p14943_p9, %p14942_p7 }
  0xa9   : > { %12526 = vmatmul.mubr.msk.bf16.gmra.mrb[12].mxu1 %vm273_vm0, %v15441_v23  ;;  %v3429_v24 = vld [vmem:[#allocation2 + $0x98] sm:$0xff]  ;;  %v15506_v25 = vld [vmem:[#allocation9 + $0xc0] sm:$0xff]   ;;  %v3455_v29 = vpack.c.bf16 %v3427_v21, %v3426_v20  ;;  %v3430_v34 = vld [vmem:[#allocation2 + $0xa8] sm:$0xff] }
  0xaa   : > { %12529 = vmatprep.mubr.msk.bf16.mxu1 %vm273_vm0, %v15446_v27  ;;  %v483_v28 = vld [vmem:[#allocation2 + $0x171] sm:$0xff]  ;;  %v400_v30 = vld [vmem:[#allocation2] sm:$0xff]  ;;  %v3456_v31 = vpack.c.bf16 %v3429_v24, %v3428_v22  ;;  %v3438_v59 = vld [vmem:[#allocation2 + $0x108] sm:$0xff]  ;;  %p14945_p2 = pnand %p14944_p12, %p14938_p3 }
  0xab   : > { %v15510_v32 = vpack.c.bf16 %v483_v28, %v482_v26  ;;  %v3431_v35 = vld [vmem:[#allocation2 + $0xb0] sm:$0xff]  ;;  %v3432_v36 = vld [vmem:[#allocation2 + $0xc0] sm:$0xff]  ;;  %v402_v38 = vld [vmem:[#allocation2 + $0x18] sm:$0xff] }
  0xac   : > { %v403_v39 = vld [vmem:[#allocation2 + $0x20] sm:$0xff]  ;;  %v3457_v41 = vpack.c.bf16 %v3431_v35, %v3430_v34  ;;  %v3434_v47 = vld [vmem:[#allocation2 + $0xd8] sm:$0xff]  ;;  %v3436_v50 = vld [vmem:[#allocation2 + $0xf0] sm:$0xff] }
  0xad   : > { %v433_v46 = vpack.c.bf16 %v403_v39, %v402_v38  ;;  %v3435_v48 = vld [vmem:[#allocation2 + $0xe0] sm:$0xff]  ;;  %v15522_v53 = vld [vmem:[#allocation9 + $0x30] sm:$0xff]   ;;  %v3441_v63 = vld [vmem:[#allocation2 + $0x128] sm:$0xff] }
  0xae   : > { %v3459_v54 = vpack.c.bf16 %v3435_v48, %v3434_v47  ;;  %v3439_v60 = vld [vmem:[#allocation2 + $0x110] sm:$0xff]  ;;  %v3440_v61 = vld [vmem:[#allocation2 + $0x120] sm:$0xff]  ;;  %v3442_v4 = vld [vmem:[#allocation2 + $0x138] sm:$0xff] }
  0xaf   : > { %12850 = vmatmul.mubr.msk.bf16.gmra.mrb[12].mxu0 %vm273_vm0, %v3151_v37  ;;  %v3433_v37 = vld [vmem:[#allocation2 + $0xc8] sm:$0xff]  ;;  %v3462_v1 = vpack.c.bf16 %v3441_v63, %v3440_v61  ;;  %v3444_v7 = vld [vmem:[#allocation2 + $0x150] sm:$0xff]  ;;  %v3445_v8 = vld [vmem:[#allocation2 + $0x158] sm:$0xff] }
  0xb0   : > { %12853 = vmatprep.mubr.msk.bf16.mxu0 %vm273_vm0, %v3152_v40  ;;  %v14760_v40 = vld [vmem:[#allocation9 + $0x28] sm:$0x7f]   ;;  %v3458_v44 = vpack.c.bf16 %v3433_v37, %v3432_v36  ;;  %v3464_v10 = vpack.c.bf16 %v3445_v8, %v3444_v7  ;;  %v3447_v13 = vld [vmem:[#allocation2 + $0x170] sm:$0xff]  ;;  %v3448_v14 = vld [vmem:[#allocation2 + $0x180] sm:$0xff] }
  0xb1   : > { %12530 = vmatmul.mubr.msk.bf16.gmra.mrb[16].mxu1 %vm273_vm0, %v15462_v42  ;;  %v1068_v49 = vand.u32 %v14760_v40, %v15356_v5  ;;  %v3450_v21 = vld [vmem:[#allocation2 + $0x198] sm:$0xff]  ;;  %v3451_v22 = vld [vmem:[#allocation2 + $0x1a0] sm:$0xff]  ;;  %v14761_v26 = vld [vmem:[#allocation9 + $0xc8] sm:$0x7f]  }
  0xb2   : > { %12533 = vmatprep.mubr.msk.bf16.mxu1 %vm273_vm0, %v15464_v43  ;;  %v3467_v24 = vpack.c.bf16 %v3451_v22, %v3450_v21  ;;  %v4149_v28 = vand.u32 %v14761_v26, %v15356_v5  ;;  %v962_v36 = vld [vmem:[#allocation2 + $0x52] sm:$0xff]  ;;  %v963_v37 = vld [vmem:[#allocation2 + $0x62] sm:$0xff]  ;;  %v964_v38 = vld [vmem:[#allocation2 + $0x6a] sm:$0xff] }
  0xb3   : > { %v15577_v39 = vld [vmem:[#allocation9 + $0x40] sm:$0xff]   ;;  %v15579_v40 = vpack.c.bf16 %v964_v38, %v963_v37  ;;  %v980_v8 = vld [vmem:[#allocation2 + $0x12a] sm:$0xff]  ;;  %v986_v26 = vld [vmem:[#allocation2 + $0x172] sm:$0xff] }
  0xb4   : > { %v979_v7 = vld [vmem:[#allocation2 + $0x122] sm:$0xff]  ;;  %v1272_v37 = vld [vmem:[#allocation2 + $0x6b] sm:$0xff] }
  0xb5   : > { %v15646_v22 = vld [vmem:[#allocation9 + $0xe0] sm:$0xff]   ;;  %v15671_v38 = vld [vmem:[#allocation9 + $0x50] sm:$0xff]  }
  0xb7   : > { %12854 = vmatmul.mubr.msk.bf16.gmra.mrb[16].mxu0 %vm273_vm0, %v3153_v52  ;;  %v3437_v52 = vld [vmem:[#allocation2 + $0xf8] sm:$0xff] }
  0xb8   : > { %12873 = vmatprep.mubr.msk.bf16.mxu0 %vm273_vm0, %v15472_v55  ;;  %v3460_v58 = vpack.c.bf16 %v3437_v52, %v3436_v50  ;;  %v972_v50 = vld [vmem:[#allocation2 + $0xca] sm:$0xff] }
  0xb9   : > { %12534 = vmatmul.mubr.msk.bf16.gmra.mrb[20].mxu1 %vm273_vm0, %v15474_v57 }
  0xba   : > { %12537 = vmatprep.mubr.msk.bf16.mxu1 %vm273_vm0, %v15478_v62 }
  0xbf   : > { %12874 = vmatmul.mubr.msk.bf16.vlgmr.msra.gmra.mrb[0].mxu0 %vm273_vm0, %v15493_v11 }
  0xc0   : > { %12906 = vmatpush3.bf16.msra.mxu0 %v15432_v15  ;;  %12877 = vmatprep.mubr.msk.bf16.mxu0 %vm273_vm0, %v3454_v16  ;;  %v401_v15 = vld [vmem:[#allocation2 + $0x8] sm:$0xff] }
  0xc1   : > { %12538 = vmatmul.mubr.msk.bf16.gmra.mrb[24].mxu1 %vm273_vm0, %v15495_v17  ;;  %12907 = vmatprep.subr.bf16.mxu0 %v3841_v18  ;;  %v432_v33 = vpack.c.bf16 %v401_v15, %v400_v30  ;;  %v956_v30 = vld [vmem:[#allocation2 + $0xa] sm:$0xff] }
  0xc2   : > { %12541 = vmatprep.mubr.msk.bf16.mxu1 %vm273_vm0, %v15498_v19 }
  0xc4   : > { %12908 = vmatpush3.bf16.msra.mxu0 %v3841_v18 }
  0xc5   : > { %12941 = vmatprep.subr.bf16.mxu0 %v15506_v25 }
  0xc7   : > { %12878 = vmatmul.mubr.msk.bf16.gmra.mrb[4].mxu0 %vm273_vm0, %v3455_v29 }
  0xc8   : > { %12881 = vmatprep.mubr.msk.bf16.mxu0 %vm273_vm0, %v3456_v31 }
  0xc9   : > { %12542 = vmatmul.mubr.msk.bf16.gmra.mrb[28].mxu1 %vm273_vm0, %v15510_v32 }
  0xca   : > { %12549 = vmatprep.mubr.msk.bf16.mxu1 %vm273_vm0, %v432_v33  ;;  %v14764_v33 = vld [vmem:[#allocation9 + $0x38] sm:$0x7f]  }
  0xcf   : > { %12882 = vmatmul.mubr.msk.bf16.gmra.mrb[8].mxu0 %vm273_vm0, %v3457_v41 }
  0xd0   : > { %12885 = vmatprep.mubr.msk.bf16.mxu0 %vm273_vm0, %v3458_v44 }
  0xd1   : > { %12550 = vmatmul.mubr.msk.bf16.vlgmr.msra.gmra.mrb[0].mxu1 %vm273_vm0, %v433_v46  ;;  %v968_v46 = vld [vmem:[#allocation2 + $0x9a] sm:$0xff] }
  0xd2   : > { %12553 = vmatprep.mubr.msk.bf16.mxu1 %vm273_vm0, %v15472_v55  ;;  %12582 = vmatpush3.bf16.msra.mxu1 %v14759_v6  ;;  %v3461_v55 = vpack.c.bf16 %v3439_v60, %v3438_v59  ;;  %v3443_v6 = vld [vmem:[#allocation2 + $0x140] sm:$0xff]  ;;  %v975_v59 = vld [vmem:[#allocation2 + $0xf2] sm:$0xff] }
  0xd3   : > { %12583 = vmatprep.subr.bf16.mxu1 %v1068_v49  ;;  %v3463_v9 = vpack.c.bf16 %v3443_v6, %v3442_v4  ;;  %v976_v60 = vld [vmem:[#allocation2 + $0xfa] sm:$0xff]  ;;  %v978_v4 = vld [vmem:[#allocation2 + $0x112] sm:$0xff] }
  0xd6   : > { %12584 = vmatpush3.bf16.msra.mxu1 %v1068_v49  ;;  %v971_v49 = vld [vmem:[#allocation2 + $0xc2] sm:$0xff] }
  0xd7   : > { %12886 = vmatmul.mubr.msk.bf16.gmra.mrb[12].mxu0 %vm273_vm0, %v3459_v54  ;;  %12617 = vmatprep.subr.bf16.mxu1 %v15522_v53 }
  0xd8   : > { %12889 = vmatprep.mubr.msk.bf16.mxu0 %vm273_vm0, %v3460_v58 }
  0xd9   : > { %12554 = vmatmul.mubr.msk.bf16.gmra.mrb[4].mxu1 %vm273_vm0, %v15493_v11  ;;  %v3446_v11 = vld [vmem:[#allocation2 + $0x168] sm:$0xff] }
  0xda   : > { %12557 = vmatprep.mubr.msk.bf16.mxu1 %vm273_vm0, %v3454_v16  ;;  %v3449_v16 = vld [vmem:[#allocation2 + $0x188] sm:$0xff]  ;;  %v3465_v18 = vpack.c.bf16 %v3447_v13, %v3446_v11  ;;  %v981_v11 = vld [vmem:[#allocation2 + $0x13a] sm:$0xff] }
  0xdb   : > { %v3466_v20 = vpack.c.bf16 %v3449_v16, %v3448_v14  ;;  %v982_v13 = vld [vmem:[#allocation2 + $0x142] sm:$0xff]  ;;  %v983_v14 = vld [vmem:[#allocation2 + $0x152] sm:$0xff]  ;;  %v984_v16 = vld [vmem:[#allocation2 + $0x15a] sm:$0xff] }
  0xdc   : > { %v15638_v21 = vpack.c.bf16 %v984_v16, %v983_v14  ;;  %v1292_v14 = vld [vmem:[#allocation2 + $0x15b] sm:$0xff] }
  0xdf   : > { %12890 = vmatmul.mubr.msk.bf16.gmra.mrb[16].mxu0 %vm273_vm0, %v3461_v55 }
  0xe0   : > { %12893 = vmatprep.mubr.msk.bf16.mxu0 %vm273_vm0, %v3462_v1 }
  0xe1   : > { %12558 = vmatmul.mubr.msk.bf16.gmra.mrb[8].mxu1 %vm273_vm0, %v3455_v29  ;;  %v955_v29 = vld [vmem:[#allocation2 + $0x2] sm:$0xff] }
  0xe2   : > { %12561 = vmatprep.mubr.msk.bf16.mxu1 %vm273_vm0, %v3456_v31  ;;  %v987_v15 = vpack.c.bf16 %v956_v30, %v955_v29  ;;  %v960_v31 = vld [vmem:[#allocation2 + $0x3a] sm:$0xff]  ;;  %v1264_v29 = vld [vmem:[#allocation2 + $0xb] sm:$0xff] }
  0xe7   : > { %12894 = vmatmul.mubr.msk.bf16.gmra.mrb[20].mxu0 %vm273_vm0, %v3463_v9 }
  0xe8   : > { %12897 = vmatprep.mubr.msk.bf16.mxu0 %vm273_vm0, %v3464_v10 }
  0xe9   : > { %12562 = vmatmul.mubr.msk.bf16.gmra.mrb[12].mxu1 %vm273_vm0, %v3457_v41  ;;  %v966_v41 = vld [vmem:[#allocation2 + $0x82] sm:$0xff] }
  0xea   : > { %12565 = vmatprep.mubr.msk.bf16.mxu1 %vm273_vm0, %v3458_v44  ;;  %v967_v44 = vld [vmem:[#allocation2 + $0x92] sm:$0xff] }
  0xeb   : > { %v15591_v48 = vpack.c.bf16 %v968_v46, %v967_v44  ;;  %v1276_v44 = vld [vmem:[#allocation2 + $0x9b] sm:$0xff] }
  0xef   : > { %12898 = vmatmul.mubr.msk.bf16.gmra.mrb[24].mxu0 %vm273_vm0, %v3465_v18 }
  0xf0   : > { %12901 = vmatprep.mubr.msk.bf16.mxu0 %vm273_vm0, %v3466_v20 }
  0xf1   : > { %12566 = vmatmul.mubr.msk.bf16.gmra.mrb[16].mxu1 %vm273_vm0, %v3459_v54  ;;  %v973_v54 = vld [vmem:[#allocation2 + $0xda] sm:$0xff] }
  0xf2   : > { %12569 = vmatprep.mubr.msk.bf16.mxu1 %vm273_vm0, %v3460_v58  ;;  %v974_v58 = vld [vmem:[#allocation2 + $0xe2] sm:$0xff] }
  0xf3   : > { %v15613_v63 = vpack.c.bf16 %v974_v58, %v973_v54  ;;  %v1282_v54 = vld [vmem:[#allocation2 + $0xe3] sm:$0xff]  ;;  %v1283_v58 = vld [vmem:[#allocation2 + $0xf3] sm:$0xff] }
  0xf7   : > { %12902 = vmatmul.mubr.msk.bf16.gmra.mrb[28].mxu0 %vm273_vm0, %v3467_v24  ;;  %v985_v24 = vld [vmem:[#allocation2 + $0x16a] sm:$0xff] }
  0xf8   : > { %12909 = vmatprep.mubr.msk.bf16.mxu0 %vm273_vm0, %v15403_v45  ;;  %v15556_v45 = vld [vmem:[#allocation9 + $0xd0] sm:$0xff]   ;;  %v15650_v30 = vpack.c.bf16 %v986_v26, %v985_v24 }
  0xf9   : > { %12570 = vmatmul.mubr.msk.bf16.gmra.mrb[20].mxu1 %vm273_vm0, %v3461_v55  ;;  %v15615_v55 = vpack.c.bf16 %v976_v60, %v975_v59  ;;  %v1284_v59 = vld [vmem:[#allocation2 + $0xfb] sm:$0xff]  ;;  %v1293_v24 = vld [vmem:[#allocation2 + $0x16b] sm:$0xff]  ;;  %v1294_v26 = vld [vmem:[#allocation2 + $0x173] sm:$0xff] }
  0xfa   : > { %12573 = vmatprep.mubr.msk.bf16.mxu1 %vm273_vm0, %v3462_v1  ;;  %v977_v1 = vld [vmem:[#allocation2 + $0x10a] sm:$0xff] }
  0xff   : > { %12910 = vmatmul.mubr.msk.bf16.vlgmr.msra.gmra.mrb[0].mxu0 %vm273_vm0, %v15407_v51  ;;  %v957_v51 = vld [vmem:[#allocation2 + $0x1a] sm:$0xff] }
 0x100   : > { %12942 = vmatpush3.bf16.msra.mxu0 %v15506_v25  ;;  %12913 = vmatprep.mubr.msk.bf16.mxu0 %vm273_vm0, %v15414_v56  ;;  %v958_v56 = vld [vmem:[#allocation2 + $0x22] sm:$0xff]  ;;  %v959_v25 = vld [vmem:[#allocation2 + $0x32] sm:$0xff] }
 0x101   : > { %12574 = vmatmul.mubr.msk.bf16.gmra.mrb[24].mxu1 %vm273_vm0, %v3463_v9  ;;  %12943 = vmatprep.subr.bf16.mxu0 %v4149_v28  ;;  %v988_v34 = vpack.c.bf16 %v958_v56, %v957_v51  ;;  %v15566_v35 = vpack.c.bf16 %v960_v31, %v959_v25  ;;  %v15624_v9 = vpack.c.bf16 %v978_v4, %v977_v1  ;;  %v1266_v51 = vld [vmem:[#allocation2 + $0x23] sm:$0xff]  ;;  %v1267_v56 = vld [vmem:[#allocation2 + $0x33] sm:$0xff]  ;;  %v1268_v25 = vld [vmem:[#allocation2 + $0x3b] sm:$0xff] }
 0x102   : > { %12577 = vmatprep.mubr.msk.bf16.mxu1 %vm273_vm0, %v3464_v10  ;;  %v15626_v10 = vpack.c.bf16 %v980_v8, %v979_v7  ;;  %v14768_v31 = vld [vmem:[#allocation9 + $0x48] sm:$0x7f]   ;;  %v1286_v1 = vld [vmem:[#allocation2 + $0x113] sm:$0xff] }
 0x103   : > { %v1288_v7 = vld [vmem:[#allocation2 + $0x12b] sm:$0xff] }
 0x104   : > { %12944 = vmatpush3.bf16.msra.mxu0 %v4149_v28  ;;  %v1263_v28 = vld [vmem:[#allocation2 + $0x3] sm:$0xff] }
 0x105   : > { %12977 = vmatprep.subr.bf16.mxu0 %v15556_v45 }
 0x107   : > { %12914 = vmatmul.mubr.msk.bf16.gmra.mrb[4].mxu0 %vm273_vm0, %v15418_v2  ;;  %v1376_v2 = vand.u32 %v14764_v33, %v15356_v5 }
 0x108   : > { %12917 = vmatprep.mubr.msk.bf16.mxu0 %vm273_vm0, %v15420_v3  ;;  %v961_v3 = vld [vmem:[#allocation2 + $0x4a] sm:$0xff] }
 0x109   : > { %12578 = vmatmul.mubr.msk.bf16.gmra.mrb[28].mxu1 %vm273_vm0, %v3465_v18  ;;  %v15635_v18 = vpack.c.bf16 %v982_v13, %v981_v11  ;;  %v1290_v11 = vld [vmem:[#allocation2 + $0x143] sm:$0xff]  ;;  %v1291_v13 = vld [vmem:[#allocation2 + $0x153] sm:$0xff] }
 0x10a   : > { %12585 = vmatprep.mubr.msk.bf16.mxu1 %vm273_vm0, %v987_v15  ;;  %v1265_v15 = vld [vmem:[#allocation2 + $0x1b] sm:$0xff] }
 0x10b   : > { %v1296_v33 = vpack.c.bf16 %v1266_v51, %v1265_v15  ;;  %v1574_v15 = vld [vmem:[#allocation2 + $0x24] sm:$0xff]  ;;  %v1575_v51 = vld [vmem:[#allocation2 + $0x34] sm:$0xff] }
 0x10f   : > { %12918 = vmatmul.mubr.msk.bf16.gmra.mrb[8].mxu0 %vm273_vm0, %v15441_v23  ;;  %v990_v23 = vpack.c.bf16 %v962_v36, %v961_v3  ;;  %v1270_v3 = vld [vmem:[#allocation2 + $0x53] sm:$0xff]  ;;  %v1271_v36 = vld [vmem:[#allocation2 + $0x63] sm:$0xff] }
 0x110   : > { %12921 = vmatprep.mubr.msk.bf16.mxu0 %vm273_vm0, %v15446_v27  ;;  %v965_v27 = vld [vmem:[#allocation2 + $0x7a] sm:$0xff] }
 0x111   : > { %12586 = vmatmul.mubr.msk.bf16.vlgmr.msra.gmra.mrb[0].mxu1 %vm273_vm0, %v988_v34  ;;  %v15589_v47 = vpack.c.bf16 %v966_v41, %v965_v27  ;;  %v15660_v34 = vpack.c.bf16 %v1268_v25, %v1267_v56  ;;  %v1274_v27 = vld [vmem:[#allocation2 + $0x83] sm:$0xff]  ;;  %v1275_v41 = vld [vmem:[#allocation2 + $0x93] sm:$0xff] }
 0x112   : > { %12589 = vmatprep.mubr.msk.bf16.mxu1 %vm273_vm0, %v15566_v35  ;;  %12618 = vmatpush3.bf16.msra.mxu1 %v15522_v53  ;;  %v15603_v53 = vpack.c.bf16 %v972_v50, %v971_v49  ;;  %v1280_v49 = vld [vmem:[#allocation2 + $0xcb] sm:$0xff]  ;;  %v1576_v56 = vld [vmem:[#allocation2 + $0x3c] sm:$0xff] }
 0x113   : > { %12619 = vmatprep.subr.bf16.mxu1 %v1376_v2  ;;  %v14772_v25 = vld [vmem:[#allocation9 + $0x58] sm:$0x7f]  }
 0x116   : > { %12620 = vmatpush3.bf16.msra.mxu1 %v1376_v2  ;;  %v1269_v2 = vld [vmem:[#allocation2 + $0x4b] sm:$0xff] }
 0x117   : > { %12922 = vmatmul.mubr.msk.bf16.gmra.mrb[12].mxu0 %vm273_vm0, %v15462_v42  ;;  %12653 = vmatprep.subr.bf16.mxu1 %v15577_v39  ;;  %v969_v42 = vld [vmem:[#allocation2 + $0xaa] sm:$0xff] }
 0x118   : > { %12925 = vmatprep.mubr.msk.bf16.mxu0 %vm273_vm0, %v15464_v43  ;;  %v970_v43 = vld [vmem:[#allocation2 + $0xb2] sm:$0xff] }
 0x119   : > { %12590 = vmatmul.mubr.msk.bf16.gmra.mrb[4].mxu1 %vm273_vm0, %v990_v23  ;;  %v15601_v52 = vpack.c.bf16 %v970_v43, %v969_v42  ;;  %v1278_v42 = vld [vmem:[#allocation2 + $0xb3] sm:$0xff]  ;;  %v1279_v43 = vld [vmem:[#allocation2 + $0xc3] sm:$0xff] }
 0x11a   : > { %12593 = vmatprep.mubr.msk.bf16.mxu1 %vm273_vm0, %v15579_v40 }
 0x11f   : > { %12926 = vmatmul.mubr.msk.bf16.gmra.mrb[16].mxu0 %vm273_vm0, %v15474_v57  ;;  %v3756_v57 = vld [vmem:[#allocation2 + $0x181] sm:$0xff] }
 0x120   : > { %12929 = vmatprep.mubr.msk.bf16.mxu0 %vm273_vm0, %v15478_v62  ;;  %v3757_v62 = vld [vmem:[#allocation2 + $0x189] sm:$0xff] }
 0x121   : > { %12594 = vmatmul.mubr.msk.bf16.gmra.mrb[8].mxu1 %vm273_vm0, %v15589_v47  ;;  %v3774_v61 = vpack.c.bf16 %v3757_v62, %v3756_v57  ;;  %v4065_v57 = vld [vmem:[#allocation2 + $0x18a] sm:$0xff]  ;;  %v1281_v62 = vld [vmem:[#allocation2 + $0xdb] sm:$0xff] }
 0x122   : > { %12597 = vmatprep.mubr.msk.bf16.mxu1 %vm273_vm0, %v15591_v48 }
 0x127   : > { %12930 = vmatmul.mubr.msk.bf16.gmra.mrb[20].mxu0 %vm273_vm0, %v15495_v17  ;;  %v3758_v17 = vld [vmem:[#allocation2 + $0x199] sm:$0xff] }
 0x128   : > { %12933 = vmatprep.mubr.msk.bf16.mxu0 %vm273_vm0, %v15498_v19  ;;  %v3759_v19 = vld [vmem:[#allocation2 + $0x1a1] sm:$0xff] }
 0x129   : > { %12598 = vmatmul.mubr.msk.bf16.gmra.mrb[12].mxu1 %vm273_vm0, %v15601_v52  ;;  %v3775_v6 = vpack.c.bf16 %v3759_v19, %v3758_v17  ;;  %v4067_v17 = vld [vmem:[#allocation2 + $0x1a2] sm:$0xff]  ;;  %v1285_v19 = vld [vmem:[#allocation2 + $0x10b] sm:$0xff] }
 0x12a   : > { %12601 = vmatprep.mubr.msk.bf16.mxu1 %vm273_vm0, %v15603_v53  ;;  %v15718_v8 = vpack.c.bf16 %v1286_v1, %v1285_v19  ;;  %v1594_v19 = vld [vmem:[#allocation2 + $0x114] sm:$0xff] }
 0x12f   : > { %12934 = vmatmul.mubr.msk.bf16.gmra.mrb[24].mxu0 %vm273_vm0, %v15510_v32  ;;  %v14765_v32 = vld [vmem:[#allocation9 + $0xd8] sm:$0x7f]  }
 0x130   : > { %12937 = vmatprep.mubr.msk.bf16.mxu0 %vm273_vm0, %v3774_v61  ;;  %v4457_v20 = vand.u32 %v14765_v32, %v15356_v5  ;;  %v15707_v61 = vpack.c.bf16 %v1282_v54, %v1281_v62  ;;  %v1289_v32 = vld [vmem:[#allocation2 + $0x13b] sm:$0xff]  ;;  %v1590_v62 = vld [vmem:[#allocation2 + $0xe4] sm:$0xff] }
 0x131   : > { %12602 = vmatmul.mubr.msk.bf16.gmra.mrb[16].mxu1 %vm273_vm0, %v15613_v63  ;;  %v15729_v16 = vpack.c.bf16 %v1290_v11, %v1289_v32  ;;  %v1591_v54 = vld [vmem:[#allocation2 + $0xf4] sm:$0xff]  ;;  %v1598_v32 = vld [vmem:[#allocation2 + $0x144] sm:$0xff] }
 0x132   : > { %12605 = vmatprep.mubr.msk.bf16.mxu1 %vm273_vm0, %v15615_v55  ;;  %v1599_v11 = vld [vmem:[#allocation2 + $0x154] sm:$0xff] }
 0x137   : > { %12938 = vmatmul.mubr.msk.bf16.gmra.mrb[28].mxu0 %vm273_vm0, %v3775_v6  ;;  %v1287_v6 = vld [vmem:[#allocation2 + $0x123] sm:$0xff] }
 0x138   : > { %12945 = vmatprep.mubr.msk.bf16.mxu0 %vm273_vm0, %v15566_v35  ;;  %v1684_v35 = vand.u32 %v14768_v31, %v15356_v5 }
 0x139   : > { %12606 = vmatmul.mubr.msk.bf16.gmra.mrb[20].mxu1 %vm273_vm0, %v15624_v9 }
 0x13a   : > { %12609 = vmatprep.mubr.msk.bf16.mxu1 %vm273_vm0, %v15626_v10 }
 0x13f   : > { %12946 = vmatmul.mubr.msk.bf16.vlgmr.msra.gmra.mrb[0].mxu0 %vm273_vm0, %v990_v23  ;;  %v1298_v23 = vpack.c.bf16 %v1270_v3, %v1269_v2  ;;  %v1578_v2 = vld [vmem:[#allocation2 + $0x54] sm:$0xff]  ;;  %v1579_v3 = vld [vmem:[#allocation2 + $0x64] sm:$0xff] }
 0x140   : > { %12978 = vmatpush3.bf16.msra.mxu0 %v15556_v45  ;;  %12949 = vmatprep.mubr.msk.bf16.mxu0 %vm273_vm0, %v15579_v40  ;;  %v1295_v45 = vpack.c.bf16 %v1264_v29, %v1263_v28  ;;  %v15673_v40 = vpack.c.bf16 %v1272_v37, %v1271_v36  ;;  %v1571_v28 = vld [vmem:[#allocation2 + $0x4] sm:$0xff]  ;;  %v1572_v29 = vld [vmem:[#allocation2 + $0xc] sm:$0xff] }
 0x141   : > { %12610 = vmatmul.mubr.msk.bf16.gmra.mrb[24].mxu1 %vm273_vm0, %v15635_v18  ;;  %12979 = vmatprep.subr.bf16.mxu0 %v4457_v20  ;;  %v1580_v36 = vld [vmem:[#allocation2 + $0x6c] sm:$0xff]  ;;  %v15765_v37 = vld [vmem:[#allocation9 + $0x60] sm:$0xff]  }
 0x142   : > { %12613 = vmatprep.mubr.msk.bf16.mxu1 %vm273_vm0, %v15638_v21 }
 0x144   : > { %12980 = vmatpush3.bf16.msra.mxu0 %v4457_v20  ;;  %v15732_v20 = vpack.c.bf16 %v1292_v14, %v1291_v13  ;;  %v1600_v13 = vld [vmem:[#allocation2 + $0x15c] sm:$0xff] }
 0x145   : > { %13013 = vmatprep.subr.bf16.mxu0 %v15646_v22 }
 0x147   : > { %12950 = vmatmul.mubr.msk.bf16.gmra.mrb[4].mxu0 %vm273_vm0, %v15589_v47  ;;  %v15685_v47 = vpack.c.bf16 %v1276_v44, %v1275_v41  ;;  %v1584_v41 = vld [vmem:[#allocation2 + $0x9c] sm:$0xff] }
 0x148   : > { %12953 = vmatprep.mubr.msk.bf16.mxu0 %vm273_vm0, %v15591_v48  ;;  %v1277_v48 = vld [vmem:[#allocation2 + $0xab] sm:$0xff] }
 0x149   : > { %12614 = vmatmul.mubr.msk.bf16.gmra.mrb[28].mxu1 %vm273_vm0, %v15650_v30  ;;  %v15695_v50 = vpack.c.bf16 %v1278_v42, %v1277_v48  ;;  %v1586_v48 = vld [vmem:[#allocation2 + $0xb4] sm:$0xff]  ;;  %v1587_v42 = vld [vmem:[#allocation2 + $0xc4] sm:$0xff] }
 0x14a   : > { %12621 = vmatprep.mubr.msk.bf16.mxu1 %vm273_vm0, %v1295_v45  ;;  %v1573_v45 = vld [vmem:[#allocation2 + $0x1c] sm:$0xff] }
 0x14b   : > { %v1604_v31 = vpack.c.bf16 %v1574_v15, %v1573_v45  ;;  %v1883_v45 = vld [vmem:[#allocation2 + $0x38] sm:$0xff]  ;;  %v1884_v15 = vld [vmem:[#allocation2 + $0x48] sm:$0xff] }
 0x14f   : > { %12954 = vmatmul.mubr.msk.bf16.gmra.mrb[8].mxu0 %vm273_vm0, %v15601_v52  ;;  %v15697_v52 = vpack.c.bf16 %v1280_v49, %v1279_v43  ;;  %v1588_v43 = vld [vmem:[#allocation2 + $0xcc] sm:$0xff] }
 0x150   : > { %12957 = vmatprep.mubr.msk.bf16.mxu0 %vm273_vm0, %v15603_v53  ;;  %v4064_v53 = vld [vmem:[#allocation2 + $0x182] sm:$0xff] }
 0x151   : > { %12622 = vmatmul.mubr.msk.bf16.vlgmr.msra.gmra.mrb[0].mxu1 %vm273_vm0, %v1296_v33  ;;  %v4082_v60 = vpack.c.bf16 %v4065_v57, %v4064_v53  ;;  %v15754_v33 = vpack.c.bf16 %v1576_v56, %v1575_v51  ;;  %v4373_v53 = vld [vmem:[#allocation2 + $0x18b] sm:$0xff]  ;;  %v1589_v57 = vld [vmem:[#allocation2 + $0xdc] sm:$0xff] }
 0x152   : > { %12625 = vmatprep.mubr.msk.bf16.mxu1 %vm273_vm0, %v15660_v34  ;;  %12654 = vmatpush3.bf16.msra.mxu1 %v15577_v39  ;;  %v1273_v39 = vld [vmem:[#allocation2 + $0x7b] sm:$0xff]  ;;  %v1885_v51 = vld [vmem:[#allocation2 + $0x50] sm:$0xff]  ;;  %v14776_v56 = vld [vmem:[#allocation9 + $0x68] sm:$0x7f]  }
 0x153   : > { %12655 = vmatprep.subr.bf16.mxu1 %v1684_v35  ;;  %v15683_v46 = vpack.c.bf16 %v1274_v27, %v1273_v39  ;;  %v1582_v39 = vld [vmem:[#allocation2 + $0x84] sm:$0xff]  ;;  %v1583_v27 = vld [vmem:[#allocation2 + $0x94] sm:$0xff] }
 0x156   : > { %12656 = vmatpush3.bf16.msra.mxu1 %v1684_v35  ;;  %v1577_v35 = vld [vmem:[#allocation2 + $0x4c] sm:$0xff] }
 0x157   : > { %12958 = vmatmul.mubr.msk.bf16.gmra.mrb[12].mxu0 %vm273_vm0, %v15613_v63  ;;  %12689 = vmatprep.subr.bf16.mxu1 %v15671_v38  ;;  %v15709_v63 = vpack.c.bf16 %v1284_v59, %v1283_v58  ;;  %v1592_v58 = vld [vmem:[#allocation2 + $0xfc] sm:$0xff] }
 0x158   : > { %12961 = vmatprep.mubr.msk.bf16.mxu0 %vm273_vm0, %v15615_v55  ;;  %v4066_v55 = vld [vmem:[#allocation2 + $0x19a] sm:$0xff] }
 0x159   : > { %12626 = vmatmul.mubr.msk.bf16.gmra.mrb[4].mxu1 %vm273_vm0, %v1298_v23  ;;  %v4083_v4 = vpack.c.bf16 %v4067_v17, %v4066_v55  ;;  %v4375_v55 = vld [vmem:[#allocation2 + $0x1a3] sm:$0xff]  ;;  %v1593_v17 = vld [vmem:[#allocation2 + $0x10c] sm:$0xff] }
 0x15a   : > { %12629 = vmatprep.mubr.msk.bf16.mxu1 %vm273_vm0, %v15673_v40 }
 0x15f   : > { %12962 = vmatmul.mubr.msk.bf16.gmra.mrb[16].mxu0 %vm273_vm0, %v15624_v9  ;;  %v15720_v9 = vpack.c.bf16 %v1288_v7, %v1287_v6  ;;  %v1596_v6 = vld [vmem:[#allocation2 + $0x12c] sm:$0xff]  ;;  %v15812_v7 = vpack.c.bf16 %v1594_v19, %v1593_v17 }
 0x160   : > { %12965 = vmatprep.mubr.msk.bf16.mxu0 %vm273_vm0, %v15626_v10  ;;  %v14769_v10 = vld [vmem:[#allocation9 + $0xe8] sm:$0x7f]  }
 0x161   : > { %12630 = vmatmul.mubr.msk.bf16.gmra.mrb[8].mxu1 %vm273_vm0, %v15683_v46  ;;  %v1903_v17 = vld [vmem:[#allocation2 + $0x128] sm:$0xff] }
 0x162   : > { %12633 = vmatprep.mubr.msk.bf16.mxu1 %vm273_vm0, %v15685_v47 }
 0x167   : > { %12966 = vmatmul.mubr.msk.bf16.gmra.mrb[20].mxu0 %vm273_vm0, %v15635_v18  ;;  %v4765_v18 = vand.u32 %v14769_v10, %v15356_v5  ;;  %v1597_v10 = vld [vmem:[#allocation2 + $0x13c] sm:$0xff] }
 0x168   : > { %12969 = vmatprep.mubr.msk.bf16.mxu0 %vm273_vm0, %v15638_v21  ;;  %v15740_v21 = vld [vmem:[#allocation9 + $0xf0] sm:$0xff]   ;;  %v15823_v14 = vpack.c.bf16 %v1598_v32, %v1597_v10  ;;  %v1907_v10 = vld [vmem:[#allocation2 + $0x158] sm:$0xff]  ;;  %v1908_v32 = vld [vmem:[#allocation2 + $0x168] sm:$0xff] }
 0x169   : > { %12634 = vmatmul.mubr.msk.bf16.gmra.mrb[12].mxu1 %vm273_vm0, %v15695_v50 }
 0x16a   : > { %12637 = vmatprep.mubr.msk.bf16.mxu1 %vm273_vm0, %v15697_v52 }
 0x16f   : > { %12970 = vmatmul.mubr.msk.bf16.gmra.mrb[24].mxu0 %vm273_vm0, %v15650_v30  ;;  %v15744_v30 = vpack.c.bf16 %v1294_v26, %v1293_v24  ;;  %v1601_v24 = vld [vmem:[#allocation2 + $0x16c] sm:$0xff]  ;;  %v1602_v26 = vld [vmem:[#allocation2 + $0x174] sm:$0xff] }
 0x170   : > { %12973 = vmatprep.mubr.msk.bf16.mxu0 %vm273_vm0, %v4082_v60  ;;  %v15801_v60 = vpack.c.bf16 %v1590_v62, %v1589_v57  ;;  %v1899_v57 = vld [vmem:[#allocation2 + $0xf8] sm:$0xff]  ;;  %v1900_v62 = vld [vmem:[#allocation2 + $0x108] sm:$0xff] }
 0x171   : > { %12638 = vmatmul.mubr.msk.bf16.gmra.mrb[16].mxu1 %vm273_vm0, %v15707_v61 }
 0x172   : > { %12641 = vmatprep.mubr.msk.bf16.mxu1 %vm273_vm0, %v15709_v63 }
 0x177   : > { %12974 = vmatmul.mubr.msk.bf16.gmra.mrb[28].mxu0 %vm273_vm0, %v4083_v4  ;;  %v1595_v4 = vld [vmem:[#allocation2 + $0x124] sm:$0xff] }
 0x178   : > { %12981 = vmatprep.mubr.msk.bf16.mxu0 %vm273_vm0, %v15660_v34  ;;  %v1993_v34 = vand.u32 %v14772_v25, %v15356_v5 }
 0x179   : > { %12642 = vmatmul.mubr.msk.bf16.gmra.mrb[20].mxu1 %vm273_vm0, %v15718_v8 }
 0x17a   : > { %12645 = vmatprep.mubr.msk.bf16.mxu1 %vm273_vm0, %v15720_v9 }
 0x17f   : > { %12982 = vmatmul.mubr.msk.bf16.vlgmr.msra.gmra.mrb[0].mxu0 %vm273_vm0, %v1298_v23  ;;  %v1606_v23 = vpack.c.bf16 %v1578_v2, %v1577_v35  ;;  %v1887_v35 = vld [vmem:[#allocation2 + $0x68] sm:$0xff]  ;;  %v1888_v2 = vld [vmem:[#allocation2 + $0x78] sm:$0xff] }
 0x180   : > { %13014 = vmatpush3.bf16.msra.mxu0 %v15646_v22  ;;  %12985 = vmatprep.mubr.msk.bf16.mxu0 %vm273_vm0, %v15673_v40  ;;  %v1603_v22 = vpack.c.bf16 %v1572_v29, %v1571_v28  ;;  %v15767_v40 = vpack.c.bf16 %v1580_v36, %v1579_v3  ;;  %v1880_v28 = vld [vmem:[#allocation2 + $0x18] sm:$0xff]  ;;  %v1881_v29 = vld [vmem:[#allocation2 + $0x20] sm:$0xff]  ;;  %v15859_v36 = vld [vmem:[#allocation9 + $0x70] sm:$0xff]  }
 0x181   : > { %12646 = vmatmul.mubr.msk.bf16.gmra.mrb[24].mxu1 %vm273_vm0, %v15729_v16  ;;  %13015 = vmatprep.subr.bf16.mxu0 %v4765_v18  ;;  %v1889_v3 = vld [vmem:[#allocation2 + $0x80] sm:$0xff] }
 0x182   : > { %12649 = vmatprep.mubr.msk.bf16.mxu1 %vm273_vm0, %v15732_v20 }
 0x184   : > { %13016 = vmatpush3.bf16.msra.mxu0 %v4765_v18  ;;  %v15826_v18 = vpack.c.bf16 %v1600_v13, %v1599_v11  ;;  %v1909_v11 = vld [vmem:[#allocation2 + $0x170] sm:$0xff] }
 0x185   : > { %13049 = vmatprep.subr.bf16.mxu0 %v15740_v21 }
 0x187   : > { %12986 = vmatmul.mubr.msk.bf16.gmra.mrb[4].mxu0 %vm273_vm0, %v15683_v46  ;;  %v15779_v46 = vpack.c.bf16 %v1584_v41, %v1583_v27  ;;  %v1893_v27 = vld [vmem:[#allocation2 + $0xb0] sm:$0xff] }
 0x188   : > { %12989 = vmatprep.mubr.msk.bf16.mxu0 %vm273_vm0, %v15685_v47  ;;  %v1585_v47 = vld [vmem:[#allocation2 + $0xac] sm:$0xff] }
 0x189   : > { %12650 = vmatmul.mubr.msk.bf16.gmra.mrb[28].mxu1 %vm273_vm0, %v15744_v30  ;;  %v15789_v49 = vpack.c.bf16 %v1586_v48, %v1585_v47  ;;  %v1895_v47 = vld [vmem:[#allocation2 + $0xc8] sm:$0xff]  ;;  %v1896_v48 = vld [vmem:[#allocation2 + $0xd8] sm:$0xff] }
 0x18a   : > { %12657 = vmatprep.mubr.msk.bf16.mxu1 %vm273_vm0, %v1603_v22  ;;  %v1882_v22 = vld [vmem:[#allocation2 + $0x30] sm:$0xff] }
 0x18b   : > { %v1913_v25 = vpack.c.bf16 %v1883_v45, %v1882_v22  ;;  %v2191_v22 = vld [vmem:[#allocation2 + $0x39] sm:$0xff]  ;;  %v2192_v45 = vld [vmem:[#allocation2 + $0x49] sm:$0xff] }
 0x18f   : > { %12990 = vmatmul.mubr.msk.bf16.gmra.mrb[8].mxu0 %vm273_vm0, %v15695_v50  ;;  %v15791_v50 = vpack.c.bf16 %v1588_v43, %v1587_v42  ;;  %v1897_v42 = vld [vmem:[#allocation2 + $0xe0] sm:$0xff] }
 0x190   : > { %12993 = vmatprep.mubr.msk.bf16.mxu0 %vm273_vm0, %v15697_v52  ;;  %v4372_v52 = vld [vmem:[#allocation2 + $0x183] sm:$0xff] }
 0x191   : > { %12658 = vmatmul.mubr.msk.bf16.vlgmr.msra.gmra.mrb[0].mxu1 %vm273_vm0, %v1604_v31  ;;  %v4390_v59 = vpack.c.bf16 %v4373_v53, %v4372_v52  ;;  %v15848_v31 = vpack.c.bf16 %v1885_v51, %v1884_v15  ;;  %v4681_v52 = vld [vmem:[#allocation2 + $0x18c] sm:$0xff]  ;;  %v14780_v51 = vld [vmem:[#allocation9 + $0x78] sm:$0x7f]  }
 0x192   : > { %12661 = vmatprep.mubr.msk.bf16.mxu1 %vm273_vm0, %v15754_v33  ;;  %12690 = vmatpush3.bf16.msra.mxu1 %v15671_v38  ;;  %v1581_v38 = vld [vmem:[#allocation2 + $0x7c] sm:$0xff]  ;;  %v1898_v53 = vld [vmem:[#allocation2 + $0xf0] sm:$0xff] }
 0x193   : > { %12691 = vmatprep.subr.bf16.mxu1 %v1993_v34  ;;  %v15777_v44 = vpack.c.bf16 %v1582_v39, %v1581_v38  ;;  %v1891_v38 = vld [vmem:[#allocation2 + $0x98] sm:$0xff]  ;;  %v1892_v39 = vld [vmem:[#allocation2 + $0xa8] sm:$0xff] }
 0x194   : > { %v2193_v15 = vld [vmem:[#allocation2 + $0x51] sm:$0xff] }
 0x196   : > { %12692 = vmatpush3.bf16.msra.mxu1 %v1993_v34  ;;  %v1886_v34 = vld [vmem:[#allocation2 + $0x60] sm:$0xff] }
 0x197   : > { %12994 = vmatmul.mubr.msk.bf16.gmra.mrb[12].mxu0 %vm273_vm0, %v15707_v61  ;;  %12725 = vmatprep.subr.bf16.mxu1 %v15765_v37  ;;  %v15803_v61 = vpack.c.bf16 %v1592_v58, %v1591_v54  ;;  %v1901_v54 = vld [vmem:[#allocation2 + $0x110] sm:$0xff] }
 0x198   : > { %12997 = vmatprep.mubr.msk.bf16.mxu0 %vm273_vm0, %v15709_v63  ;;  %v4374_v63 = vld [vmem:[#allocation2 + $0x19b] sm:$0xff] }
 0x199   : > { %12662 = vmatmul.mubr.msk.bf16.gmra.mrb[4].mxu1 %vm273_vm0, %v1606_v23  ;;  %v4391_v1 = vpack.c.bf16 %v4375_v55, %v4374_v63  ;;  %v4683_v63 = vld [vmem:[#allocation2 + $0x1a4] sm:$0xff] }
 0x19a   : > { %12665 = vmatprep.mubr.msk.bf16.mxu1 %vm273_vm0, %v15767_v40  ;;  %v1902_v55 = vld [vmem:[#allocation2 + $0x120] sm:$0xff] }
 0x19f   : > { %12998 = vmatmul.mubr.msk.bf16.gmra.mrb[16].mxu0 %vm273_vm0, %v15718_v8  ;;  %v15814_v8 = vpack.c.bf16 %v1596_v6, %v1595_v4  ;;  %v1905_v4 = vld [vmem:[#allocation2 + $0x140] sm:$0xff]  ;;  %v15906_v6 = vpack.c.bf16 %v1903_v17, %v1902_v55  ;;  %v2211_v55 = vld [vmem:[#allocation2 + $0x129] sm:$0xff] }
 0x1a0   : > { %13001 = vmatprep.mubr.msk.bf16.mxu0 %vm273_vm0, %v15720_v9  ;;  %v14773_v9 = vld [vmem:[#allocation9 + $0xf8] sm:$0x7f]  }
 0x1a1   : > { %12666 = vmatmul.mubr.msk.bf16.gmra.mrb[8].mxu1 %vm273_vm0, %v15777_v44 }
 0x1a2   : > { %12669 = vmatprep.mubr.msk.bf16.mxu1 %vm273_vm0, %v15779_v46 }
 0x1a7   : > { %13002 = vmatmul.mubr.msk.bf16.gmra.mrb[20].mxu0 %vm273_vm0, %v15729_v16  ;;  %v5074_v16 = vand.u32 %v14773_v9, %v15356_v5  ;;  %v1906_v9 = vld [vmem:[#allocation2 + $0x150] sm:$0xff] }
 0x1a8   : > { %13005 = vmatprep.mubr.msk.bf16.mxu0 %vm273_vm0, %v15732_v20  ;;  %v15834_v20 = vld [vmem:[#allocation9 + $0x100] sm:$0xff]   ;;  %v15917_v13 = vpack.c.bf16 %v1907_v10, %v1906_v9  ;;  %v2216_v10 = vld [vmem:[#allocation2 + $0x169] sm:$0xff] }
 0x1a9   : > { %12670 = vmatmul.mubr.msk.bf16.gmra.mrb[12].mxu1 %vm273_vm0, %v15789_v49  ;;  %v2215_v9 = vld [vmem:[#allocation2 + $0x159] sm:$0xff] }
 0x1aa   : > { %12673 = vmatprep.mubr.msk.bf16.mxu1 %vm273_vm0, %v15791_v50 }
 0x1af   : > { %13006 = vmatmul.mubr.msk.bf16.gmra.mrb[24].mxu0 %vm273_vm0, %v15744_v30  ;;  %v15838_v30 = vpack.c.bf16 %v1602_v26, %v1601_v24  ;;  %v1910_v24 = vld [vmem:[#allocation2 + $0x180] sm:$0xff]  ;;  %v1911_v26 = vld [vmem:[#allocation2 + $0x188] sm:$0xff] }
 0x1b0   : > { %13009 = vmatprep.mubr.msk.bf16.mxu0 %vm273_vm0, %v4390_v59  ;;  %v15895_v59 = vpack.c.bf16 %v1899_v57, %v1898_v53  ;;  %v2207_v53 = vld [vmem:[#allocation2 + $0xf9] sm:$0xff]  ;;  %v2208_v57 = vld [vmem:[#allocation2 + $0x109] sm:$0xff] }
 0x1b1   : > { %12674 = vmatmul.mubr.msk.bf16.gmra.mrb[16].mxu1 %vm273_vm0, %v15801_v60 }
 0x1b2   : > { %12677 = vmatprep.mubr.msk.bf16.mxu1 %vm273_vm0, %v15803_v61 }
 0x1b7   : > { %13010 = vmatmul.mubr.msk.bf16.gmra.mrb[28].mxu0 %vm273_vm0, %v4391_v1  ;;  %v1904_v1 = vld [vmem:[#allocation2 + $0x138] sm:$0xff] }
 0x1b8   : > { %13017 = vmatprep.mubr.msk.bf16.mxu0 %vm273_vm0, %v15754_v33  ;;  %v2301_v33 = vand.u32 %v14776_v56, %v15356_v5 }
 0x1b9   : > { %12678 = vmatmul.mubr.msk.bf16.gmra.mrb[20].mxu1 %vm273_vm0, %v15812_v7 }
 0x1ba   : > { %12681 = vmatprep.mubr.msk.bf16.mxu1 %vm273_vm0, %v15814_v8 }
 0x1bf   : > { %13018 = vmatmul.mubr.msk.bf16.vlgmr.msra.gmra.mrb[0].mxu0 %vm273_vm0, %v1606_v23  ;;  %v1915_v23 = vpack.c.bf16 %v1887_v35, %v1886_v34  ;;  %v2195_v34 = vld [vmem:[#allocation2 + $0x69] sm:$0xff]  ;;  %v2196_v35 = vld [vmem:[#allocation2 + $0x79] sm:$0xff] }
 0x1c0   : > { %13050 = vmatpush3.bf16.msra.mxu0 %v15740_v21  ;;  %13021 = vmatprep.mubr.msk.bf16.mxu0 %vm273_vm0, %v15767_v40  ;;  %v1912_v21 = vpack.c.bf16 %v1881_v29, %v1880_v28  ;;  %v15861_v40 = vpack.c.bf16 %v1889_v3, %v1888_v2  ;;  %v2188_v28 = vld [vmem:[#allocation2 + $0x19] sm:$0xff]  ;;  %v2189_v29 = vld [vmem:[#allocation2 + $0x21] sm:$0xff] }
 0x1c1   : > { %12682 = vmatmul.mubr.msk.bf16.gmra.mrb[24].mxu1 %vm273_vm0, %v15823_v14  ;;  %13051 = vmatprep.subr.bf16.mxu0 %v5074_v16  ;;  %v2197_v2 = vld [vmem:[#allocation2 + $0x81] sm:$0xff] }
 0x1c2   : > { %12685 = vmatprep.mubr.msk.bf16.mxu1 %vm273_vm0, %v15826_v18  ;;  %v15953_v3 = vld [vmem:[#allocation9 + $0x80] sm:$0xff]  }
 0x1c4   : > { %13052 = vmatpush3.bf16.msra.mxu0 %v5074_v16  ;;  %v15920_v16 = vpack.c.bf16 %v1909_v11, %v1908_v32  ;;  %v2217_v32 = vld [vmem:[#allocation2 + $0x171] sm:$0xff] }
 0x1c5   : > { %13085 = vmatprep.subr.bf16.mxu0 %v15834_v20 }
 0x1c7   : > { %13022 = vmatmul.mubr.msk.bf16.gmra.mrb[4].mxu0 %vm273_vm0, %v15777_v44  ;;  %v15873_v44 = vpack.c.bf16 %v1893_v27, %v1892_v39  ;;  %v2201_v39 = vld [vmem:[#allocation2 + $0xb1] sm:$0xff] }
 0x1c8   : > { %13025 = vmatprep.mubr.msk.bf16.mxu0 %vm273_vm0, %v15779_v46  ;;  %v1894_v46 = vld [vmem:[#allocation2 + $0xc0] sm:$0xff] }
 0x1c9   : > { %12686 = vmatmul.mubr.msk.bf16.gmra.mrb[28].mxu1 %vm273_vm0, %v15838_v30  ;;  %v15883_v43 = vpack.c.bf16 %v1895_v47, %v1894_v46  ;;  %v2203_v46 = vld [vmem:[#allocation2 + $0xc9] sm:$0xff]  ;;  %v2204_v47 = vld [vmem:[#allocation2 + $0xd9] sm:$0xff] }
 0x1ca   : > { %12693 = vmatprep.mubr.msk.bf16.mxu1 %vm273_vm0, %v1912_v21  ;;  %v2190_v21 = vld [vmem:[#allocation2 + $0x31] sm:$0xff] }
 0x1cb   : > { %v2221_v56 = vpack.c.bf16 %v2191_v22, %v2190_v21  ;;  %v2499_v21 = vld [vmem:[#allocation2 + $0x3a] sm:$0xff]  ;;  %v2500_v22 = vld [vmem:[#allocation2 + $0x4a] sm:$0xff] }
 0x1cf   : > { %13026 = vmatmul.mubr.msk.bf16.gmra.mrb[8].mxu0 %vm273_vm0, %v15789_v49  ;;  %v15885_v49 = vpack.c.bf16 %v1897_v42, %v1896_v48  ;;  %v2205_v48 = vld [vmem:[#allocation2 + $0xe1] sm:$0xff] }
 0x1d0   : > { %13029 = vmatprep.mubr.msk.bf16.mxu0 %vm273_vm0, %v15791_v50  ;;  %v4680_v50 = vld [vmem:[#allocation2 + $0x184] sm:$0xff] }
 0x1d1   : > { %12694 = vmatmul.mubr.msk.bf16.vlgmr.msra.gmra.mrb[0].mxu1 %vm273_vm0, %v1913_v25  ;;  %v4698_v58 = vpack.c.bf16 %v4681_v52, %v4680_v50  ;;  %v15942_v25 = vpack.c.bf16 %v2193_v15, %v2192_v45  ;;  %v4990_v50 = vld [vmem:[#allocation2 + $0x1a0] sm:$0xff]  ;;  %v2206_v52 = vld [vmem:[#allocation2 + $0xf1] sm:$0xff]  ;;  %v14784_v15 = vld [vmem:[#allocation9 + $0x88] sm:$0x7f]  }
 0x1d2   : > { %12697 = vmatprep.mubr.msk.bf16.mxu1 %vm273_vm0, %v15848_v31  ;;  %12726 = vmatpush3.bf16.msra.mxu1 %v15765_v37  ;;  %v1890_v37 = vld [vmem:[#allocation2 + $0x90] sm:$0xff] }
 0x1d3   : > { %12727 = vmatprep.subr.bf16.mxu1 %v2301_v33  ;;  %v15871_v41 = vpack.c.bf16 %v1891_v38, %v1890_v37  ;;  %v2199_v37 = vld [vmem:[#allocation2 + $0x99] sm:$0xff]  ;;  %v2200_v38 = vld [vmem:[#allocation2 + $0xa9] sm:$0xff] }
 0x1d4   : > { %v2501_v45 = vld [vmem:[#allocation2 + $0x52] sm:$0xff] }
 0x1d6   : > { %12728 = vmatpush3.bf16.msra.mxu1 %v2301_v33  ;;  %v2194_v33 = vld [vmem:[#allocation2 + $0x61] sm:$0xff] }
 0x1d7   : > { %13030 = vmatmul.mubr.msk.bf16.gmra.mrb[12].mxu0 %vm273_vm0, %v15801_v60  ;;  %12761 = vmatprep.subr.bf16.mxu1 %v15859_v36  ;;  %v15897_v60 = vpack.c.bf16 %v1901_v54, %v1900_v62  ;;  %v2209_v62 = vld [vmem:[#allocation2 + $0x111] sm:$0xff] }
 0x1d8   : > { %13033 = vmatprep.mubr.msk.bf16.mxu0 %vm273_vm0, %v15803_v61  ;;  %v4682_v61 = vld [vmem:[#allocation2 + $0x19c] sm:$0xff] }
 0x1d9   : > { %12698 = vmatmul.mubr.msk.bf16.gmra.mrb[4].mxu1 %vm273_vm0, %v1915_v23  ;;  %v4699_v19 = vpack.c.bf16 %v4683_v63, %v4682_v61  ;;  %v4992_v61 = vld [vmem:[#allocation2 + $0x1b8] sm:$0xff]  ;;  %v2210_v63 = vld [vmem:[#allocation2 + $0x121] sm:$0xff] }
 0x1da   : > { %12701 = vmatprep.mubr.msk.bf16.mxu1 %vm273_vm0, %v15861_v40 }
 0x1df   : > { %13034 = vmatmul.mubr.msk.bf16.gmra.mrb[16].mxu0 %vm273_vm0, %v15812_v7  ;;  %v15908_v7 = vpack.c.bf16 %v1905_v4, %v1904_v1  ;;  %v2213_v1 = vld [vmem:[#allocation2 + $0x141] sm:$0xff]  ;;  %v16000_v4 = vpack.c.bf16 %v2211_v55, %v2210_v63  ;;  %v2519_v63 = vld [vmem:[#allocation2 + $0x12a] sm:$0xff] }
 0x1e0   : > { %13037 = vmatprep.mubr.msk.bf16.mxu0 %vm273_vm0, %v15814_v8  ;;  %v14777_v8 = vld [vmem:[#allocation9 + $0x108] sm:$0x7f]  }
 0x1e1   : > { %12702 = vmatmul.mubr.msk.bf16.gmra.mrb[8].mxu1 %vm273_vm0, %v15871_v41 }
 0x1e2   : > { %12705 = vmatprep.mubr.msk.bf16.mxu1 %vm273_vm0, %v15873_v44 }
 0x1e7   : > { %13038 = vmatmul.mubr.msk.bf16.gmra.mrb[20].mxu0 %vm273_vm0, %v15823_v14  ;;  %v5382_v14 = vand.u32 %v14777_v8, %v15356_v5  ;;  %v2214_v8 = vld [vmem:[#allocation2 + $0x151] sm:$0xff] }
 0x1e8   : > { %13041 = vmatprep.mubr.msk.bf16.mxu0 %vm273_vm0, %v15826_v18  ;;  %v15928_v18 = vld [vmem:[#allocation9 + $0x110] sm:$0xff]   ;;  %v16011_v11 = vpack.c.bf16 %v2215_v9, %v2214_v8  ;;  %v2523_v8 = vld [vmem:[#allocation2 + $0x15a] sm:$0xff] }
 0x1e9   : > { %12706 = vmatmul.mubr.msk.bf16.gmra.mrb[12].mxu1 %vm273_vm0, %v15883_v43  ;;  %v2524_v9 = vld [vmem:[#allocation2 + $0x16a] sm:$0xff] }
 0x1ea   : > { %12709 = vmatprep.mubr.msk.bf16.mxu1 %vm273_vm0, %v15885_v49 }
 0x1ef   : > { %13042 = vmatmul.mubr.msk.bf16.gmra.mrb[24].mxu0 %vm273_vm0, %v15838_v30  ;;  %v15932_v30 = vpack.c.bf16 %v1911_v26, %v1910_v24  ;;  %v2218_v24 = vld [vmem:[#allocation2 + $0x181] sm:$0xff]  ;;  %v2219_v26 = vld [vmem:[#allocation2 + $0x189] sm:$0xff] }
 0x1f0   : > { %13045 = vmatprep.mubr.msk.bf16.mxu0 %vm273_vm0, %v4698_v58  ;;  %v15989_v58 = vpack.c.bf16 %v2207_v53, %v2206_v52  ;;  %v2515_v52 = vld [vmem:[#allocation2 + $0xfa] sm:$0xff]  ;;  %v2516_v53 = vld [vmem:[#allocation2 + $0x10a] sm:$0xff] }
 0x1f1   : > { %12710 = vmatmul.mubr.msk.bf16.gmra.mrb[16].mxu1 %vm273_vm0, %v15895_v59 }
 0x1f2   : > { %12713 = vmatprep.mubr.msk.bf16.mxu1 %vm273_vm0, %v15897_v60 }
 0x1f7   : > { %13046 = vmatmul.mubr.msk.bf16.gmra.mrb[28].mxu0 %vm273_vm0, %v4699_v19  ;;  %v2212_v19 = vld [vmem:[#allocation2 + $0x139] sm:$0xff] }
 0x1f8   : > { %13053 = vmatprep.mubr.msk.bf16.mxu0 %vm273_vm0, %v15848_v31  ;;  %v2609_v31 = vand.u32 %v14780_v51, %v15356_v5 }
 0x1f9   : > { %12714 = vmatmul.mubr.msk.bf16.gmra.mrb[20].mxu1 %vm273_vm0, %v15906_v6 }
 0x1fa   : > { %12717 = vmatprep.mubr.msk.bf16.mxu1 %vm273_vm0, %v15908_v7 }
 0x1ff   : > { %13054 = vmatmul.mubr.msk.bf16.vlgmr.msra.gmra.mrb[0].mxu0 %vm273_vm0, %v1915_v23  ;;  %v2223_v23 = vpack.c.bf16 %v2195_v34, %v2194_v33  ;;  %v2503_v33 = vld [vmem:[#allocation2 + $0x6a] sm:$0xff]  ;;  %v2504_v34 = vld [vmem:[#allocation2 + $0x7a] sm:$0xff] }
 0x200   : > { %13086 = vmatpush3.bf16.msra.mxu0 %v15834_v20  ;;  %13057 = vmatprep.mubr.msk.bf16.mxu0 %vm273_vm0, %v15861_v40  ;;  %v2220_v20 = vpack.c.bf16 %v2189_v29, %v2188_v28  ;;  %v15955_v40 = vpack.c.bf16 %v2197_v2, %v2196_v35  ;;  %v2496_v28 = vld [vmem:[#allocation2 + $0x1a] sm:$0xff]  ;;  %v2497_v29 = vld [vmem:[#allocation2 + $0x22] sm:$0xff] }
 0x201   : > { %12718 = vmatmul.mubr.msk.bf16.gmra.mrb[24].mxu1 %vm273_vm0, %v15917_v13  ;;  %13087 = vmatprep.subr.bf16.mxu0 %v5382_v14  ;;  %v2505_v35 = vld [vmem:[#allocation2 + $0x82] sm:$0xff] }
 0x202   : > { %12721 = vmatprep.mubr.msk.bf16.mxu1 %vm273_vm0, %v15920_v16 }
 0x204   : > { %13088 = vmatpush3.bf16.msra.mxu0 %v5382_v14  ;;  %v16014_v14 = vpack.c.bf16 %v2217_v32, %v2216_v10  ;;  %v2525_v10 = vld [vmem:[#allocation2 + $0x172] sm:$0xff] }
 0x205   : > { %13121 = vmatprep.subr.bf16.mxu0 %v15928_v18 }
 0x207   : > { %13058 = vmatmul.mubr.msk.bf16.gmra.mrb[4].mxu0 %vm273_vm0, %v15871_v41  ;;  %v15967_v41 = vpack.c.bf16 %v2201_v39, %v2200_v38  ;;  %v2509_v38 = vld [vmem:[#allocation2 + $0xb2] sm:$0xff] }
 0x208   : > { %13061 = vmatprep.mubr.msk.bf16.mxu0 %vm273_vm0, %v15873_v44  ;;  %v2202_v44 = vld [vmem:[#allocation2 + $0xc1] sm:$0xff] }
 0x209   : > { %12722 = vmatmul.mubr.msk.bf16.gmra.mrb[28].mxu1 %vm273_vm0, %v15932_v30  ;;  %v15977_v42 = vpack.c.bf16 %v2203_v46, %v2202_v44  ;;  %v2511_v44 = vld [vmem:[#allocation2 + $0xca] sm:$0xff]  ;;  %v2512_v46 = vld [vmem:[#allocation2 + $0xda] sm:$0xff] }
 0x20a   : > { %12729 = vmatprep.mubr.msk.bf16.mxu1 %vm273_vm0, %v2220_v20  ;;  %v2498_v20 = vld [vmem:[#allocation2 + $0x32] sm:$0xff] }
 0x20b   : > { %v2529_v51 = vpack.c.bf16 %v2499_v21, %v2498_v20  ;;  %v2807_v20 = vld [vmem:[#allocation2 + $0x3b] sm:$0xff]  ;;  %v2808_v21 = vld [vmem:[#allocation2 + $0x4b] sm:$0xff] }
 0x20f   : > { %13062 = vmatmul.mubr.msk.bf16.gmra.mrb[8].mxu0 %vm273_vm0, %v15883_v43  ;;  %v15979_v43 = vpack.c.bf16 %v2205_v48, %v2204_v47  ;;  %v2513_v47 = vld [vmem:[#allocation2 + $0xe2] sm:$0xff] }
 0x210   : > { %13065 = vmatprep.mubr.msk.bf16.mxu0 %vm273_vm0, %v15885_v49  ;;  %v4989_v49 = vld [vmem:[#allocation2 + $0x198] sm:$0xff] }
 0x211   : > { %12730 = vmatmul.mubr.msk.bf16.vlgmr.msra.gmra.mrb[0].mxu1 %vm273_vm0, %v2221_v56  ;;  %v5007_v54 = vpack.c.bf16 %v4990_v50, %v4989_v49  ;;  %v16036_v56 = vpack.c.bf16 %v2501_v45, %v2500_v22  ;;  %v5298_v49 = vld [vmem:[#allocation2 + $0x1a1] sm:$0xff]  ;;  %v2514_v50 = vld [vmem:[#allocation2 + $0xf2] sm:$0xff] }
 0x212   : > { %12733 = vmatprep.mubr.msk.bf16.mxu1 %vm273_vm0, %v15942_v25  ;;  %12762 = vmatpush3.bf16.msra.mxu1 %v15859_v36  ;;  %v2198_v36 = vld [vmem:[#allocation2 + $0x91] sm:$0xff] }
 0x213   : > { %12763 = vmatprep.subr.bf16.mxu1 %v2609_v31  ;;  %v15965_v27 = vpack.c.bf16 %v2199_v37, %v2198_v36  ;;  %v2507_v36 = vld [vmem:[#allocation2 + $0x9a] sm:$0xff]  ;;  %v2508_v37 = vld [vmem:[#allocation2 + $0xaa] sm:$0xff] }
 0x214   : > { %v2809_v22 = vld [vmem:[#allocation2 + $0x53] sm:$0xff] }
 0x216   : > { %12764 = vmatpush3.bf16.msra.mxu1 %v2609_v31  ;;  %v2502_v31 = vld [vmem:[#allocation2 + $0x62] sm:$0xff] }
 0x217   : > { %13066 = vmatmul.mubr.msk.bf16.gmra.mrb[12].mxu0 %vm273_vm0, %v15895_v59  ;;  %12797 = vmatprep.subr.bf16.mxu1 %v15953_v3  ;;  %v15991_v59 = vpack.c.bf16 %v2209_v62, %v2208_v57  ;;  %v16047_v2 = vpack.c.bf16 %v2503_v33, %v2502_v31  ;;  %v2517_v57 = vld [vmem:[#allocation2 + $0x112] sm:$0xff]  ;;  %v2813_v31 = vld [vmem:[#allocation2 + $0x83] sm:$0xff] }
 0x218   : > { %13069 = vmatprep.mubr.msk.bf16.mxu0 %vm273_vm0, %v15897_v60  ;;  %v4991_v60 = vld [vmem:[#allocation2 + $0x1b0] sm:$0xff] }
 0x219   : > { %12734 = vmatmul.mubr.msk.bf16.gmra.mrb[4].mxu1 %vm273_vm0, %v2223_v23  ;;  %v5008_v17 = vpack.c.bf16 %v4992_v61, %v4991_v60  ;;  %v5300_v60 = vld [vmem:[#allocation2 + $0x1b9] sm:$0xff]  ;;  %v2518_v61 = vld [vmem:[#allocation2 + $0x122] sm:$0xff] }
 0x21a   : > { %12737 = vmatprep.mubr.msk.bf16.mxu1 %vm273_vm0, %v15955_v40 }
 0x21f   : > { %13070 = vmatmul.mubr.msk.bf16.gmra.mrb[16].mxu0 %vm273_vm0, %v15906_v6  ;;  %v16002_v6 = vpack.c.bf16 %v2213_v1, %v2212_v19  ;;  %v2521_v19 = vld [vmem:[#allocation2 + $0x142] sm:$0xff]  ;;  %v2539_v1 = vpack.c.bf16 %v2519_v63, %v2518_v61 }
 0x220   : > { %13073 = vmatprep.mubr.msk.bf16.mxu0 %vm273_vm0, %v15908_v7  ;;  %v14781_v7 = vld [vmem:[#allocation9 + $0x118] sm:$0x7f]  }
 0x221   : > { %12738 = vmatmul.mubr.msk.bf16.gmra.mrb[8].mxu1 %vm273_vm0, %v15965_v27 }
 0x222   : > { %12741 = vmatprep.mubr.msk.bf16.mxu1 %vm273_vm0, %v15967_v41 }
 0x227   : > { %13074 = vmatmul.mubr.msk.bf16.gmra.mrb[20].mxu0 %vm273_vm0, %v15917_v13  ;;  %v5690_v13 = vand.u32 %v14781_v7, %v15356_v5  ;;  %v2522_v7 = vld [vmem:[#allocation2 + $0x152] sm:$0xff] }
 0x228   : > { %13077 = vmatprep.mubr.msk.bf16.mxu0 %vm273_vm0, %v15920_v16  ;;  %v16022_v16 = vld [vmem:[#allocation9 + $0x120] sm:$0xff]   ;;  %v2541_v32 = vpack.c.bf16 %v2523_v8, %v2522_v7 }
 0x229   : > { %12742 = vmatmul.mubr.msk.bf16.gmra.mrb[12].mxu1 %vm273_vm0, %v15977_v42 }
 0x22a   : > { %12745 = vmatprep.mubr.msk.bf16.mxu1 %vm273_vm0, %v15979_v43 }
 0x22f   : > { %13078 = vmatmul.mubr.msk.bf16.gmra.mrb[24].mxu0 %vm273_vm0, %v15932_v30  ;;  %v16026_v30 = vpack.c.bf16 %v2219_v26, %v2218_v24  ;;  %v2526_v24 = vld [vmem:[#allocation2 + $0x182] sm:$0xff]  ;;  %v2527_v26 = vld [vmem:[#allocation2 + $0x18a] sm:$0xff] }
 0x230   : > { %13081 = vmatprep.mubr.msk.bf16.mxu0 %vm273_vm0, %v5007_v54  ;;  %v16086_v54 = vpack.c.bf16 %v2515_v52, %v2514_v50 }
 0x231   : > { %12746 = vmatmul.mubr.msk.bf16.gmra.mrb[16].mxu1 %vm273_vm0, %v15989_v58 }
 0x232   : > { %12749 = vmatprep.mubr.msk.bf16.mxu1 %vm273_vm0, %v15991_v59 }
 0x237   : > { %13082 = vmatmul.mubr.msk.bf16.gmra.mrb[28].mxu0 %vm273_vm0, %v5008_v17  ;;  %v2520_v17 = vld [vmem:[#allocation2 + $0x13a] sm:$0xff] }
 0x238   : > { %13089 = vmatprep.mubr.msk.bf16.mxu0 %vm273_vm0, %v15942_v25  ;;  %v2917_v25 = vand.u32 %v14784_v15, %v15356_v5  ;;  %v2838_v15 = vpack.c.bf16 %v2809_v22, %v2808_v21  ;;  %v3139_v21 = vld [vmem:[#allocation2 + $0x15c] sm:$0xff]  ;;  %v3140_v22 = vld [vmem:[#allocation2 + $0x16c] sm:$0xff] }
 0x239   : > { %12750 = vmatmul.mubr.msk.bf16.gmra.mrb[20].mxu1 %vm273_vm0, %v16000_v4 }
 0x23a   : > { %12753 = vmatprep.mubr.msk.bf16.mxu1 %vm273_vm0, %v16002_v6 }
 0x23f   : > { %13090 = vmatmul.mubr.msk.bf16.vlgmr.msra.gmra.mrb[0].mxu0 %vm273_vm0, %v2223_v23  ;;  %v16049_v23 = vpack.c.bf16 %v2505_v35, %v2504_v34  ;;  %v2814_v35 = vld [vmem:[#allocation2 + $0x93] sm:$0xff] }
 0x240   : > { %13122 = vmatpush3.bf16.msra.mxu0 %v15928_v18  ;;  %13093 = vmatprep.mubr.msk.bf16.mxu0 %vm273_vm0, %v15955_v40  ;;  %v2528_v18 = vpack.c.bf16 %v2497_v29, %v2496_v28  ;;  %v16053_v40 = vld [vmem:[#allocation9 + $0x90] sm:$0xff]   ;;  %v2804_v28 = vld [vmem:[#allocation2 + $0x1b] sm:$0xff]  ;;  %v2805_v29 = vld [vmem:[#allocation2 + $0x23] sm:$0xff] }
 0x241   : > { %12754 = vmatmul.mubr.msk.bf16.gmra.mrb[24].mxu1 %vm273_vm0, %v16011_v11  ;;  %13123 = vmatprep.subr.bf16.mxu0 %v5690_v13 }
 0x242   : > { %12757 = vmatprep.mubr.msk.bf16.mxu1 %vm273_vm0, %v16014_v14 }
 0x244   : > { %13124 = vmatpush3.bf16.msra.mxu0 %v5690_v13  ;;  %v2542_v13 = vpack.c.bf16 %v2525_v10, %v2524_v9  ;;  %v16194_v9 = vld [vmem:[#allocation9 + $0x140] sm:$0xff]  }
 0x245   : > { %13157 = vmatprep.subr.bf16.mxu0 %v16022_v16  ;;  %v2834_v10 = vld [vmem:[#allocation2 + $0x183] sm:$0xff] }
 0x247   : > { %13094 = vmatmul.mubr.msk.bf16.gmra.mrb[4].mxu0 %vm273_vm0, %v15965_v27  ;;  %v16064_v27 = vpack.c.bf16 %v2509_v38, %v2508_v37  ;;  %v2819_v37 = vld [vmem:[#allocation2 + $0xcb] sm:$0xff]  ;;  %v2820_v38 = vld [vmem:[#allocation2 + $0xdb] sm:$0xff] }
 0x248   : > { %13097 = vmatprep.mubr.msk.bf16.mxu0 %vm273_vm0, %v15967_v41  ;;  %v2510_v41 = vld [vmem:[#allocation2 + $0xc2] sm:$0xff] }
 0x249   : > { %12758 = vmatmul.mubr.msk.bf16.gmra.mrb[28].mxu1 %vm273_vm0, %v16026_v30  ;;  %v16074_v48 = vpack.c.bf16 %v2511_v44, %v2510_v41  ;;  %v5605_v44 = vld [vmem:[#allocation2 + $0x19a] sm:$0xff] }
 0x24a   : > { %12765 = vmatprep.mubr.msk.bf16.mxu1 %vm273_vm0, %v2528_v18  ;;  %v2836_v18 = vpack.c.bf16 %v2805_v29, %v2804_v28  ;;  %v3135_v28 = vld [vmem:[#allocation2 + $0x12c] sm:$0xff]  ;;  %v3136_v29 = vld [vmem:[#allocation2 + $0x13c] sm:$0xff] }
 0x24f   : > { %13098 = vmatmul.mubr.msk.bf16.gmra.mrb[8].mxu0 %vm273_vm0, %v15977_v42  ;;  %v16076_v42 = vpack.c.bf16 %v2513_v47, %v2512_v46  ;;  %v5606_v46 = vld [vmem:[#allocation2 + $0x1a2] sm:$0xff]  ;;  %v2822_v47 = vld [vmem:[#allocation2 + $0xf3] sm:$0xff] }
 0x250   : > { %13101 = vmatprep.mubr.msk.bf16.mxu0 %vm273_vm0, %v15979_v43  ;;  %v5297_v43 = vld [vmem:[#allocation2 + $0x199] sm:$0xff] }
 0x251   : > { %12766 = vmatmul.mubr.msk.bf16.vlgmr.msra.gmra.mrb[0].mxu1 %vm273_vm0, %v2529_v51  ;;  %v5315_v62 = vpack.c.bf16 %v5298_v49, %v5297_v43  ;;  %v2810_v51 = vld [vmem:[#allocation2 + $0x63] sm:$0xff]  ;;  %v2825_v43 = vld [vmem:[#allocation2 + $0x113] sm:$0xff]  ;;  %v16157_v49 = vpack.c.bf16 %v5606_v46, %v5605_v44 }
 0x252   : > { %12769 = vmatprep.mubr.msk.bf16.mxu1 %vm273_vm0, %v16036_v56  ;;  %12798 = vmatpush3.bf16.msra.mxu1 %v15953_v3  ;;  %v2506_v3 = vld [vmem:[#allocation2 + $0x92] sm:$0xff]  ;;  %v6195_v44 = vld [vmem:[#allocation2 + $0x64] sm:$0xff] }
 0x253   : > { %12799 = vmatprep.subr.bf16.mxu1 %v2917_v25  ;;  %v16062_v39 = vpack.c.bf16 %v2507_v36, %v2506_v3  ;;  %v6196_v46 = vld [vmem:[#allocation2 + $0x6c] sm:$0xff] }
 0x256   : > { %12800 = vmatpush3.bf16.msra.mxu1 %v2917_v25  ;;  %v2812_v25 = vld [vmem:[#allocation2 + $0x7b] sm:$0xff] }
 0x257   : > { %13102 = vmatmul.mubr.msk.bf16.gmra.mrb[12].mxu0 %vm273_vm0, %v15989_v58  ;;  %13709 = vmatprep.subr.bf16.mxu1 %v16053_v40  ;;  %v16088_v58 = vpack.c.bf16 %v2517_v57, %v2516_v53  ;;  %v16127_v34 = vpack.c.bf16 %v2813_v31, %v2812_v25  ;;  %v5607_v53 = vld [vmem:[#allocation2 + $0x1b2] sm:$0xff]  ;;  %v5608_v57 = vld [vmem:[#allocation2 + $0x1ba] sm:$0xff] }
 0x258   : > { %13105 = vmatprep.mubr.msk.bf16.mxu0 %vm273_vm0, %v15991_v59  ;;  %v5299_v59 = vld [vmem:[#allocation2 + $0x1b1] sm:$0xff] }
 0x259   : > { %12770 = vmatmul.mubr.msk.bf16.gmra.mrb[4].mxu1 %vm273_vm0, %v16047_v2  ;;  %v5316_v55 = vpack.c.bf16 %v5300_v60, %v5299_v59  ;;  %v2828_v59 = vld [vmem:[#allocation2 + $0x13b] sm:$0xff]  ;;  %v2829_v60 = vld [vmem:[#allocation2 + $0x143] sm:$0xff]  ;;  %v3143_v25 = vld [vmem:[#allocation2 + $0x18c] sm:$0xff] }
 0x25a   : > { %12773 = vmatprep.mubr.msk.bf16.mxu1 %vm273_vm0, %v16049_v23  ;;  %v16174_v63 = vpack.c.bf16 %v2829_v60, %v2828_v59  ;;  %v6201_v59 = vld [vmem:[#allocation2 + $0xac] sm:$0xff]  ;;  %v6202_v60 = vld [vmem:[#allocation2 + $0xb4] sm:$0xff] }
 0x25f   : > { %13106 = vmatmul.mubr.msk.bf16.gmra.mrb[16].mxu0 %vm273_vm0, %v16000_v4  ;;  %v2540_v4 = vpack.c.bf16 %v2521_v19, %v2520_v17  ;;  %v2830_v17 = vld [vmem:[#allocation2 + $0x153] sm:$0xff]  ;;  %v2831_v19 = vld [vmem:[#allocation2 + $0x15b] sm:$0xff] }
 0x260   : > { %13109 = vmatprep.mubr.msk.bf16.mxu0 %vm273_vm0, %v16002_v6  ;;  %v14785_v6 = vld [vmem:[#allocation9 + $0x128] sm:$0x7f]  }
 0x261   : > { %12774 = vmatmul.mubr.msk.bf16.gmra.mrb[8].mxu1 %vm273_vm0, %v16062_v39 }
 0x262   : > { %12777 = vmatprep.mubr.msk.bf16.mxu1 %vm273_vm0, %v16064_v27 }
 0x267   : > { %13110 = vmatmul.mubr.msk.bf16.gmra.mrb[20].mxu0 %vm273_vm0, %v16011_v11  ;;  %v5998_v11 = vand.u32 %v14785_v6, %v15356_v5  ;;  %v16183_v6 = vpack.c.bf16 %v2831_v19, %v2830_v17  ;;  %v16270_v19 = vpack.c.bf16 %v6202_v60, %v6201_v59  ;;  %v6512_v59 = vld [vmem:[#allocation2 + $0xd8] sm:$0xff]  ;;  %v6513_v60 = vld [vmem:[#allocation2 + $0xe0] sm:$0xff] }
 0x268   : > { %13113 = vmatprep.mubr.msk.bf16.mxu0 %vm273_vm0, %v16014_v14  ;;  %v16109_v14 = vld [vmem:[#allocation9 + $0x130] sm:$0xff]  }
 0x269   : > { %12778 = vmatmul.mubr.msk.bf16.gmra.mrb[12].mxu1 %vm273_vm0, %v16074_v48 }
 0x26a   : > { %12781 = vmatprep.mubr.msk.bf16.mxu1 %vm273_vm0, %v16076_v42 }
 0x26f   : > { %13114 = vmatmul.mubr.msk.bf16.gmra.mrb[24].mxu0 %vm273_vm0, %v16026_v30  ;;  %v2543_v30 = vpack.c.bf16 %v2527_v26, %v2526_v24  ;;  %v3134_v26 = vld [vmem:[#allocation2 + $0x124] sm:$0xff] }
 0x270   : > { %13117 = vmatprep.mubr.msk.bf16.mxu0 %vm273_vm0, %v5315_v62  ;;  %v2826_v62 = vld [vmem:[#allocation2 + $0x123] sm:$0xff] }
 0x271   : > { %12782 = vmatmul.mubr.msk.bf16.gmra.mrb[16].mxu1 %vm273_vm0, %v16086_v54 }
 0x272   : > { %12785 = vmatprep.mubr.msk.bf16.mxu1 %vm273_vm0, %v16088_v58 }
 0x277   : > { %13118 = vmatmul.mubr.msk.bf16.gmra.mrb[28].mxu0 %vm273_vm0, %v5316_v55  ;;  %v14787_v55 = vld [vmem:[#allocation9 + $0x138] sm:$0x7f]  }
 0x278   : > { %13125 = vmatprep.mubr.msk.bf16.mxu0 %vm273_vm0, %v16036_v56  ;;  %v2811_v56 = vld [vmem:[#allocation2 + $0x6b] sm:$0xff]  ;;  %v6306_v7 = vand.u32 %v14787_v55, %v15356_v5 }
 0x279   : > { %12786 = vmatmul.mubr.msk.bf16.gmra.mrb[20].mxu1 %vm273_vm0, %v2539_v1  ;;  %v2839_v33 = vpack.c.bf16 %v2811_v56, %v2810_v51  ;;  %v3142_v56 = vld [vmem:[#allocation2 + $0x184] sm:$0xff]  ;;  %v14790_v55 = vld [vmem:[#allocation9 + $0x150] sm:$0xff]  }
 0x27a   : > { %12789 = vmatprep.mubr.msk.bf16.mxu1 %vm273_vm0, %v2540_v4  ;;  %v16235_v31 = vpack.c.bf16 %v3143_v25, %v3142_v56 }
 0x27f   : > { %13126 = vmatmul.mubr.msk.bf16.vlgmr.msra.gmra.mrb[0].mxu0 %vm273_vm0, %v16047_v2  ;;  %v2815_v2 = vld [vmem:[#allocation2 + $0x9b] sm:$0xff] }
 0x280   : > { %13158 = vmatpush3.bf16.msra.mxu0 %v16022_v16  ;;  %13129 = vmatprep.mubr.msk.bf16.mxu0 %vm273_vm0, %v16049_v23  ;;  %v2806_v16 = vld [vmem:[#allocation2 + $0x33] sm:$0xff]  ;;  %v2816_v23 = vld [vmem:[#allocation2 + $0xab] sm:$0xff]  ;;  %v16137_v3 = vpack.c.bf16 %v2815_v2, %v2814_v35  ;;  %v5914_v35 = vld [vmem:[#allocation2 + $0x1a3] sm:$0xff] }
 0x281   : > { %12790 = vmatmul.mubr.msk.bf16.gmra.mrb[24].mxu1 %vm273_vm0, %v2541_v32  ;;  %13159 = vmatprep.subr.bf16.mxu0 %v5998_v11  ;;  %v2837_v45 = vpack.c.bf16 %v2807_v20, %v2806_v16  ;;  %v3138_v20 = vld [vmem:[#allocation2 + $0x154] sm:$0xff] }
 0x282   : > { %12793 = vmatprep.mubr.msk.bf16.mxu1 %vm273_vm0, %v2542_v13 }
 0x284   : > { %13160 = vmatpush3.bf16.msra.mxu0 %v5998_v11  ;;  %v3132_v11 = vld [vmem:[#allocation2 + $0x10c] sm:$0xff] }
 0x285   : > { %13193 = vmatprep.subr.bf16.mxu0 %v16109_v14 }
 0x287   : > { %13130 = vmatmul.mubr.msk.bf16.gmra.mrb[4].mxu0 %vm273_vm0, %v16062_v39  ;;  %v2821_v39 = vld [vmem:[#allocation2 + $0xe3] sm:$0xff] }
 0x288   : > { %13133 = vmatprep.mubr.msk.bf16.mxu0 %vm273_vm0, %v16064_v27  ;;  %v16149_v41 = vpack.c.bf16 %v2821_v39, %v2820_v38 }
 0x289   : > { %12794 = vmatmul.mubr.msk.bf16.gmra.mrb[28].mxu1 %vm273_vm0, %v2543_v30 }
 0x28a   : > { %12801 = vmatprep.mubr.msk.bf16.mxu1 %vm273_vm0, %v2836_v18  ;;  %v16211_v18 = vpack.c.bf16 %v3135_v28, %v3134_v26  ;;  %v6221_v28 = vld [vmem:[#allocation2 + $0x19c] sm:$0xff] }
 0x28f   : > { %13134 = vmatmul.mubr.msk.bf16.gmra.mrb[8].mxu0 %vm273_vm0, %v16074_v48  ;;  %v2823_v48 = vld [vmem:[#allocation2 + $0xfb] sm:$0xff] }
 0x290   : > { %13137 = vmatprep.mubr.msk.bf16.mxu0 %vm273_vm0, %v16076_v42  ;;  %v2824_v42 = vld [vmem:[#allocation2 + $0x10b] sm:$0xff]  ;;  %v16159_v50 = vpack.c.bf16 %v2823_v48, %v2822_v47  ;;  %v6197_v47 = vld [vmem:[#allocation2 + $0x7c] sm:$0xff] }
 0x291   : > { %12802 = vmatmul.mubr.msk.bf16.vlgmr.msra.gmra.mrb[0].mxu1 %vm273_vm0, %v2837_v45  ;;  %v16161_v52 = vpack.c.bf16 %v2825_v43, %v2824_v42  ;;  %v3141_v45 = vld [vmem:[#allocation2 + $0x174] sm:$0xff]  ;;  %v6198_v48 = vld [vmem:[#allocation2 + $0x84] sm:$0xff]  ;;  %v16258_v43 = vpack.c.bf16 %v6196_v46, %v6195_v44 }
 0x292   : > { %12805 = vmatprep.mubr.msk.bf16.mxu1 %vm273_vm0, %v2838_v15  ;;  %13711 = vmatpush3.bf16.msra.mxu1 %v16053_v40  ;;  %v2817_v40 = vld [vmem:[#allocation2 + $0xb3] sm:$0xff]  ;;  %v16225_v51 = vpack.c.bf16 %v3141_v45, %v3140_v22  ;;  %v14789_v42 = vld [vmem:[#allocation9 + $0x148] sm:$0x7f]   ;;  %v6502_v22 = vld [vmem:[#allocation2 + $0x60] sm:$0xff] }
 0x293   : > { %13710 = vmatprep.subr.bf16.mxu1 %v15360_v12  ;;  %v16139_v36 = vpack.c.bf16 %v2817_v40, %v2816_v23  ;;  %v5915_v23 = vld [vmem:[#allocation2 + $0x1b3] sm:$0xff]  ;;  %v5916_v40 = vld [vmem:[#allocation2 + $0x1bb] sm:$0xff]  ;;  %v6503_v45 = vld [vmem:[#allocation2 + $0x68] sm:$0xff] }
 0x294   : > { %v16253_v38 = vpack.c.bf16 %v5916_v40, %v5915_v23  ;;  %v6534_v25 = vpack.c.bf16 %v6503_v45, %v6502_v22  ;;  %v6506_v23 = vld [vmem:[#allocation2 + $0x90] sm:$0xff]  ;;  %v6507_v40 = vld [vmem:[#allocation2 + $0x98] sm:$0xff]  ;;  %v6508_v46 = vld [vmem:[#allocation2 + $0xa8] sm:$0xff] }
 0x295   : > { %v6521_v22 = vld [vmem:[#allocation2 + $0x140] sm:$0xff]  ;;  %v6522_v45 = vld [vmem:[#allocation2 + $0x150] sm:$0xff] }
 0x296   : > { %13712 = vmatpush3.bf16.msra.mxu1 %v15360_v12  ;;  %v2818_v12 = vld [vmem:[#allocation2 + $0xc3] sm:$0xff] }
 0x297   : > { %13138 = vmatmul.mubr.msk.bf16.gmra.mrb[12].mxu0 %vm273_vm0, %v16086_v54  ;;  %v16147_v27 = vpack.c.bf16 %v2819_v37, %v2818_v12  ;;  %v2827_v54 = vld [vmem:[#allocation2 + $0x12b] sm:$0xff]  ;;  %v6194_v37 = vld [vmem:[#allocation2 + $0x54] sm:$0xff] }
 0x298   : > { %13141 = vmatprep.mubr.msk.bf16.mxu0 %vm273_vm0, %v16088_v58  ;;  %v16170_v58 = vpack.c.bf16 %v5608_v57, %v5607_v53  ;;  %v16172_v61 = vpack.c.bf16 %v2827_v54, %v2826_v62  ;;  %v6193_v12 = vld [vmem:[#allocation2 + $0x4c] sm:$0xff]  ;;  %v16260_v53 = vpack.c.bf16 %v6198_v48, %v6197_v47  ;;  %v6615_v57 = vand.u32 %v14789_v42, %v15356_v5  ;;  %v6199_v62 = vld [vmem:[#allocation2 + $0x94] sm:$0xff]  ;;  %v6200_v54 = vld [vmem:[#allocation2 + $0x9c] sm:$0xff] }
 0x299   : > { %12806 = vmatmul.mubr.msk.bf16.gmra.mrb[4].mxu1 %vm273_vm0, %v2839_v33  ;;  %v6225_v39 = vpack.c.bf16 %v6194_v37, %v6193_v12  ;;  %v16268_v17 = vpack.c.bf16 %v6200_v54, %v6199_v62  ;;  %v14791_v12 = vld [vmem:[#allocation9 + $0x158] sm:$0x7f]   ;;  %v6509_v47 = vld [vmem:[#allocation2 + $0xb0] sm:$0xff]  ;;  %v6510_v48 = vld [vmem:[#allocation2 + $0xc0] sm:$0xff] }
 0x29a   : > { %12809 = vmatprep.mubr.msk.bf16.mxu1 %vm273_vm0, %v16127_v34  ;;  %v6923_v44 = vand.u32 %v14791_v12, %v15356_v5  ;;  %v6511_v42 = vld [vmem:[#allocation2 + $0xc8] sm:$0xff]  ;;  %v6537_v62 = vpack.c.bf16 %v6509_v47, %v6508_v46  ;;  %v6526_v12 = vld [vmem:[#allocation2 + $0x180] sm:$0xff] }
 0x29b   : > { %v6538_v54 = vpack.c.bf16 %v6511_v42, %v6510_v48 }
 0x29f   : > { %13142 = vmatmul.mubr.msk.bf16.gmra.mrb[16].mxu0 %vm273_vm0, %v2539_v1  ;;  %v2832_v1 = vld [vmem:[#allocation2 + $0x16b] sm:$0xff] }
 0x2a0   : > { %13145 = vmatprep.mubr.msk.bf16.mxu0 %vm273_vm0, %v2540_v4  ;;  %v2833_v4 = vld [vmem:[#allocation2 + $0x173] sm:$0xff] }
 0x2a1   : > { %12810 = vmatmul.mubr.msk.bf16.gmra.mrb[8].mxu1 %vm273_vm0, %v16137_v3  ;;  %v16186_v8 = vpack.c.bf16 %v2833_v4, %v2832_v1  ;;  %v6203_v1 = vld [vmem:[#allocation2 + $0xc4] sm:$0xff]  ;;  %v6204_v4 = vld [vmem:[#allocation2 + $0xcc] sm:$0xff] }
 0x2a2   : > { %12813 = vmatprep.mubr.msk.bf16.mxu1 %vm273_vm0, %v16139_v36 }
 0x2a7   : > { %13146 = vmatmul.mubr.msk.bf16.gmra.mrb[20].mxu0 %vm273_vm0, %v2541_v32  ;;  %v2835_v32 = vld [vmem:[#allocation2 + $0x18b] sm:$0xff] }
 0x2a8   : > { %13149 = vmatprep.mubr.msk.bf16.mxu0 %vm273_vm0, %v2542_v13  ;;  %v3133_v13 = vld [vmem:[#allocation2 + $0x114] sm:$0xff]  ;;  %v16198_v24 = vpack.c.bf16 %v2835_v32, %v2834_v10  ;;  %v16276_v10 = vpack.c.bf16 %v6204_v4, %v6203_v1  ;;  %v6539_v4 = vpack.c.bf16 %v6513_v60, %v6512_v59 }
 0x2a9   : > { %12814 = vmatmul.mubr.msk.bf16.gmra.mrb[12].mxu1 %vm273_vm0, %v16147_v27  ;;  %v6515_v1 = vld [vmem:[#allocation2 + $0xf8] sm:$0xff]  ;;  %v6530_v59 = vld [vmem:[#allocation2 + $0x1b0] sm:$0xff] }
 0x2aa   : > { %12817 = vmatprep.mubr.msk.bf16.mxu1 %vm273_vm0, %v16149_v41  ;;  %v6531_v60 = vld [vmem:[#allocation2 + $0x1b8] sm:$0xff] }
 0x2af   : > { %13150 = vmatmul.mubr.msk.bf16.gmra.mrb[24].mxu0 %vm273_vm0, %v2543_v30  ;;  %v3137_v30 = vld [vmem:[#allocation2 + $0x144] sm:$0xff] }
 0x2b0   : > { %13153 = vmatprep.mubr.msk.bf16.mxu0 %vm273_vm0, %v16157_v49  ;;  %v16213_v16 = vpack.c.bf16 %v3137_v30, %v3136_v29  ;;  %v6222_v29 = vld [vmem:[#allocation2 + $0x1a4] sm:$0xff] }
 0x2b1   : > { %12818 = vmatmul.mubr.msk.bf16.gmra.mrb[16].mxu1 %vm273_vm0, %v16159_v50  ;;  %v16298_v30 = vpack.c.bf16 %v6222_v29, %v6221_v28  ;;  %v6519_v28 = vld [vmem:[#allocation2 + $0x128] sm:$0xff] }
 0x2b2   : > { %12821 = vmatprep.mubr.msk.bf16.mxu1 %vm273_vm0, %v16161_v52 }
 0x2b7   : > { %13154 = vmatmul.mubr.msk.bf16.gmra.mrb[28].mxu0 %vm273_vm0, %v16170_v58 }
 0x2b8   : > { %13161 = vmatprep.mubr.msk.bf16.mxu0 %vm273_vm0, %v2838_v15  ;;  %v16223_v15 = vpack.c.bf16 %v3139_v21, %v3138_v20  ;;  %v6223_v20 = vld [vmem:[#allocation2 + $0x1b4] sm:$0xff]  ;;  %v6224_v21 = vld [vmem:[#allocation2 + $0x1bc] sm:$0xff] }
 0x2b9   : > { %12822 = vmatmul.mubr.msk.bf16.gmra.mrb[20].mxu1 %vm273_vm0, %v16172_v61  ;;  %v16304_v56 = vpack.c.bf16 %v6224_v21, %v6223_v20  ;;  %v6520_v21 = vld [vmem:[#allocation2 + $0x138] sm:$0xff] }
 0x2ba   : > { %12825 = vmatprep.mubr.msk.bf16.mxu1 %vm273_vm0, %v16174_v63 }
 0x2bf   : > { %13162 = vmatmul.mubr.msk.bf16.vlgmr.msra.gmra.mrb[0].mxu0 %vm273_vm0, %v2839_v33  ;;  %v5913_v33 = vld [vmem:[#allocation2 + $0x19b] sm:$0xff] }
 0x2c0   : > { %13194 = vmatpush3.bf16.msra.mxu0 %v16109_v14  ;;  %13165 = vmatprep.mubr.msk.bf16.mxu0 %vm273_vm0, %v16127_v34  ;;  %v16201_v14 = vpack.c.bf16 %v3133_v13, %v3132_v11  ;;  %v16247_v2 = vpack.c.bf16 %v5914_v35, %v5913_v33  ;;  %v6207_v11 = vld [vmem:[#allocation2 + $0xf4] sm:$0xff]  ;;  %v6208_v13 = vld [vmem:[#allocation2 + $0xfc] sm:$0xff] }
 0x2c1   : > { %12826 = vmatmul.mubr.msk.bf16.gmra.mrb[24].mxu1 %vm273_vm0, %v16183_v6  ;;  %13195 = vmatprep.subr.bf16.mxu0 %v6306_v7  ;;  %v16284_v26 = vpack.c.bf16 %v6208_v13, %v6207_v11  ;;  %v6504_v33 = vld [vmem:[#allocation2 + $0x78] sm:$0xff]  ;;  %v6505_v35 = vld [vmem:[#allocation2 + $0x80] sm:$0xff]  ;;  %v6517_v11 = vld [vmem:[#allocation2 + $0x110] sm:$0xff] }
 0x2c2   : > { %12829 = vmatprep.mubr.msk.bf16.mxu1 %vm273_vm0, %v16186_v8  ;;  %v6535_v37 = vpack.c.bf16 %v6505_v35, %v6504_v33  ;;  %v6518_v13 = vld [vmem:[#allocation2 + $0x120] sm:$0xff]  ;;  %v6543_v33 = vpack.c.bf16 %v6521_v22, %v6520_v21 }
 0x2c3   : > { %v6542_v20 = vpack.c.bf16 %v6519_v28, %v6518_v13  ;;  %v6532_v13 = vld [vmem:[#allocation2 + $0x1c8] sm:$0xff]  ;;  %v6533_v28 = vld [vmem:[#allocation2 + $0x1d0] sm:$0xff] }
 0x2c4   : > { %13196 = vmatpush3.bf16.msra.mxu0 %v6306_v7  ;;  %v6205_v7 = vld [vmem:[#allocation2 + $0xdc] sm:$0xff]  ;;  %v6549_v21 = vpack.c.bf16 %v6533_v28, %v6532_v13  ;;  %v6816_v13 = vld [vmem:[#allocation2 + $0xa9] sm:$0xff]  ;;  %v6817_v28 = vld [vmem:[#allocation2 + $0xb1] sm:$0xff] }
 0x2c5   : > { %13229 = vmatprep.subr.bf16.mxu0 %v16194_v9 }
 0x2c7   : > { %13166 = vmatmul.mubr.msk.bf16.gmra.mrb[4].mxu0 %vm273_vm0, %v16137_v3 }
 0x2c8   : > { %13169 = vmatprep.mubr.msk.bf16.mxu0 %vm273_vm0, %v16139_v36 }
 0x2c9   : > { %12830 = vmatmul.mubr.msk.bf16.gmra.mrb[28].mxu1 %vm273_vm0, %v16198_v24 }
 0x2ca   : > { %12857 = vmatprep.mubr.msk.bf16.mxu1 %vm273_vm0, %v16201_v14 }
 0x2cf   : > { %13170 = vmatmul.mubr.msk.bf16.gmra.mrb[8].mxu0 %vm273_vm0, %v16147_v27 }
 0x2d0   : > { %13173 = vmatprep.mubr.msk.bf16.mxu0 %vm273_vm0, %v16149_v41 }
 0x2d1   : > { %12858 = vmatmul.mubr.msk.bf16.vlgmr.msra.gmra.mrb[20].mxu1 %vm273_vm0, %v16211_v18 }
 0x2d2   : > { %12861 = vmatprep.mubr.msk.bf16.mxu1 %vm273_vm0, %v16213_v16 }
 0x2d7   : > { %13174 = vmatmul.mubr.msk.bf16.gmra.mrb[12].mxu0 %vm273_vm0, %v16159_v50 }
 0x2d8   : > { %13177 = vmatprep.mubr.msk.bf16.mxu0 %vm273_vm0, %v16161_v52 }
 0x2d9   : > { %12862 = vmatmul.mubr.msk.bf16.gmra.mrb[24].mxu1 %vm273_vm0, %v16223_v15 }
 0x2da   : > { %12865 = vmatprep.mubr.msk.bf16.mxu1 %vm273_vm0, %v16225_v51 }
 0x2df   : > { %13178 = vmatmul.mubr.msk.bf16.gmra.mrb[16].mxu0 %vm273_vm0, %v16172_v61 }
 0x2e0   : > { %13181 = vmatprep.mubr.msk.bf16.mxu0 %vm273_vm0, %v16174_v63 }
 0x2e1   : > { %12866 = vmatmul.mubr.msk.bf16.gmra.mrb[28].mxu1 %vm273_vm0, %v16235_v31 }
 0x2e7   : > { %13182 = vmatmul.mubr.msk.bf16.gmra.mrb[20].mxu0 %vm273_vm0, %v16183_v6 }
 0x2e8   : > { %13185 = vmatprep.mubr.msk.bf16.mxu0 %vm273_vm0, %v16186_v8 }
 0x2ef   : > { %13186 = vmatmul.mubr.msk.bf16.gmra.mrb[24].mxu0 %vm273_vm0, %v16198_v24 }
 0x2f0   : > { %13189 = vmatprep.mubr.msk.bf16.mxu0 %vm273_vm0, %v16247_v2 }
 0x2f7   : > { %13190 = vmatmul.mubr.msk.bf16.gmra.mrb[28].mxu0 %vm273_vm0, %v16253_v38 }
 0x2f8   : > { %13197 = vmatprep.mubr.msk.bf16.mxu0 %vm273_vm0, %v6225_v39  ;;  %v6536_v39 = vpack.c.bf16 %v6507_v40, %v6506_v23  ;;  %v6524_v23 = vld [vmem:[#allocation2 + $0x168] sm:$0xff]  ;;  %v6525_v40 = vld [vmem:[#allocation2 + $0x170] sm:$0xff] }
 0x2ff   : > { %13198 = vmatmul.mubr.msk.bf16.vlgmr.msra.gmra.mrb[0].mxu0 %vm273_vm0, %v16258_v43 }
 0x300   : > { %13230 = vmatpush3.bf16.msra.mxu0 %v16194_v9  ;;  %13201 = vmatprep.mubr.msk.bf16.mxu0 %vm273_vm0, %v16260_v53  ;;  %v6206_v9 = vld [vmem:[#allocation2 + $0xe4] sm:$0xff] }
 0x301   : > { %13231 = vmatprep.subr.bf16.mxu0 %v6615_v57  ;;  %v16278_v32 = vpack.c.bf16 %v6206_v9, %v6205_v7  ;;  %v6516_v9 = vld [vmem:[#allocation2 + $0x108] sm:$0xff] }
 0x302   : > { %v6541_v29 = vpack.c.bf16 %v6517_v11, %v6516_v9 }
 0x304   : > { %13232 = vmatpush3.bf16.msra.mxu0 %v6615_v57  ;;  %v16312_v57 = vld [vmem:[#allocation9 + $0x160] sm:$0xff]  }
 0x305   : > { %13265 = vmatprep.subr.bf16.mxu0 %v14790_v55 }
 0x307   : > { %13202 = vmatmul.mubr.msk.bf16.gmra.mrb[4].mxu0 %vm273_vm0, %v16268_v17 }
 0x308   : > { %13205 = vmatprep.mubr.msk.bf16.mxu0 %vm273_vm0, %v16270_v19 }
 0x30f   : > { %13206 = vmatmul.mubr.msk.bf16.gmra.mrb[8].mxu0 %vm273_vm0, %v16276_v10 }
 0x310   : > { %13209 = vmatprep.mubr.msk.bf16.mxu0 %vm273_vm0, %v16278_v32 }
 0x317   : > { %13210 = vmatmul.mubr.msk.bf16.gmra.mrb[12].mxu0 %vm273_vm0, %v16284_v26 }
 0x318   : > { %13213 = vmatprep.mubr.msk.bf16.mxu0 %vm273_vm0, %v16201_v14 }
 0x31f   : > { %13214 = vmatmul.mubr.msk.bf16.gmra.mrb[16].mxu0 %vm273_vm0, %v16211_v18 }
 0x320   : > { %13217 = vmatprep.mubr.msk.bf16.mxu0 %vm273_vm0, %v16213_v16 }
 0x327   : > { %13218 = vmatmul.mubr.msk.bf16.gmra.mrb[20].mxu0 %vm273_vm0, %v16223_v15 }
 0x328   : > { %13221 = vmatprep.mubr.msk.bf16.mxu0 %vm273_vm0, %v16225_v51 }
 0x32f   : > { %13222 = vmatmul.mubr.msk.bf16.gmra.mrb[24].mxu0 %vm273_vm0, %v16235_v31 }
 0x330   : > { %13225 = vmatprep.mubr.msk.bf16.mxu0 %vm273_vm0, %v16298_v30 }
 0x337   : > { %13226 = vmatmul.mubr.msk.bf16.gmra.mrb[28].mxu0 %vm273_vm0, %v16304_v56 }
 0x338   : > { %13233 = vmatprep.mubr.msk.bf16.mxu0 %vm273_vm0, %v6534_v25  ;;  %v6523_v25 = vld [vmem:[#allocation2 + $0x158] sm:$0xff] }
 0x339   : > { %v6544_v35 = vpack.c.bf16 %v6523_v25, %v6522_v45 }
 0x33f   : > { %13234 = vmatmul.mubr.msk.bf16.vlgmr.msra.gmra.mrb[0].mxu0 %vm273_vm0, %v6535_v37  ;;  %v6527_v37 = vld [vmem:[#allocation2 + $0x188] sm:$0xff] }
 0x340   : > { %13266 = vmatpush3.bf16.msra.mxu0 %v14790_v55  ;;  %13237 = vmatprep.mubr.msk.bf16.mxu0 %vm273_vm0, %v6536_v39  ;;  %v6514_v55 = vld [vmem:[#allocation2 + $0xf0] sm:$0xff]  ;;  %v6545_v39 = vpack.c.bf16 %v6525_v40, %v6524_v23  ;;  %v6546_v46 = vpack.c.bf16 %v6527_v37, %v6526_v12  ;;  %v6812_v23 = vld [vmem:[#allocation2 + $0x79] sm:$0xff]  ;;  %v6813_v40 = vld [vmem:[#allocation2 + $0x81] sm:$0xff] }
 0x341   : > { %13267 = vmatprep.subr.bf16.mxu0 %v6923_v44  ;;  %v6540_v7 = vpack.c.bf16 %v6515_v1, %v6514_v55  ;;  %v6814_v12 = vld [vmem:[#allocation2 + $0x91] sm:$0xff]  ;;  %v6815_v37 = vld [vmem:[#allocation2 + $0x99] sm:$0xff] }
 0x344   : > { %13268 = vmatpush3.bf16.msra.mxu0 %v6923_v44 }
 0x345   : > { %13301 = vmatprep.subr.bf16.mxu0 %v16312_v57 }
 0x347   : > { %13238 = vmatmul.mubr.msk.bf16.gmra.mrb[4].mxu0 %vm273_vm0, %v6537_v62  ;;  %v6528_v62 = vld [vmem:[#allocation2 + $0x198] sm:$0xff] }
 0x348   : > { %13241 = vmatprep.mubr.msk.bf16.mxu0 %vm273_vm0, %v6538_v54  ;;  %v6529_v54 = vld [vmem:[#allocation2 + $0x1a0] sm:$0xff] }
 0x349   : > { %v6547_v55 = vpack.c.bf16 %v6529_v54, %v6528_v62  ;;  %v6844_v54 = vpack.c.bf16 %v6815_v37, %v6814_v12 }
 0x34f   : > { %13242 = vmatmul.mubr.msk.bf16.gmra.mrb[8].mxu0 %vm273_vm0, %v6539_v4  ;;  %v6548_v4 = vpack.c.bf16 %v6531_v60, %v6530_v59 }
 0x350   : > { %13245 = vmatprep.mubr.msk.bf16.mxu0 %vm273_vm0, %v6540_v7 }
 0x357   : > { %13246 = vmatmul.mubr.msk.bf16.gmra.mrb[12].mxu0 %vm273_vm0, %v6541_v29  ;;  %v6810_v29 = vld [vmem:[#allocation2 + $0x61] sm:$0xff] }
 0x358   : > { %13249 = vmatprep.mubr.msk.bf16.mxu0 %vm273_vm0, %v6542_v20  ;;  %v6811_v20 = vld [vmem:[#allocation2 + $0x69] sm:$0xff] }
 0x359   : > { %v6842_v45 = vpack.c.bf16 %v6811_v20, %v6810_v29  ;;  %v6818_v29 = vld [vmem:[#allocation2 + $0xc1] sm:$0xff]  ;;  %v6819_v20 = vld [vmem:[#allocation2 + $0xc9] sm:$0xff] }
 0x35f   : > { %13250 = vmatmul.mubr.msk.bf16.gmra.mrb[16].mxu0 %vm273_vm0, %v6543_v33 }
 0x360   : > { %13253 = vmatprep.mubr.msk.bf16.mxu0 %vm273_vm0, %v6544_v35 }
 0x364   : > { %v16323_v44 = vpop.f32.mrb[0].mxu1 }
 0x365   : > { %v16325_v47 = vpop.f32.mrb[1].mxu1 }
 0x366   : > { %v16327_v48 = vpop.f32.mrb[2].mxu1 }
 0x367   : > { %13254 = vmatmul.mubr.msk.bf16.gmra.mrb[20].mxu0 %vm273_vm0, %v6545_v39  ;;  %v16330_v42 = vpop.f32.mrb[3].mxu1  ;;  %v14793_v39 = vld [vmem:[#allocation9 + $0x168] sm:$0x7f]  }
 0x368   : > { %13257 = vmatprep.mubr.msk.bf16.mxu0 %vm273_vm0, %v6546_v46  ;;  %v6843_v46 = vpack.c.bf16 %v6813_v40, %v6812_v23  ;;  %v7231_v60 = vand.u32 %v14793_v39, %v15356_v5  ;;  %v6846_v40 = vpack.c.bf16 %v6819_v20, %v6818_v29  ;;  %v6820_v39 = vld [vmem:[#allocation2 + $0xd9] sm:$0xff]  ;;  %v6825_v29 = vld [vmem:[#allocation2 + $0x111] sm:$0xff]  ;;  %v6826_v20 = vld [vmem:[#allocation2 + $0x121] sm:$0xff] }
 0x36c   : > { %v16333_v1 = vpop.f32.mrb[4].mxu1 }
 0x36d   : > { %v16335_v7 = vpop.f32.mrb[5].mxu1 }
 0x36e   : > { %v16337_v9 = vpop.f32.mrb[6].mxu1 }
 0x36f   : > { %13258 = vmatmul.mubr.msk.bf16.gmra.mrb[24].mxu0 %vm273_vm0, %v6547_v55  ;;  %v16340_v11 = vpop.f32.mrb[7].mxu1 }
 0x370   : > { %13261 = vmatprep.mubr.msk.bf16.mxu0 %vm273_vm0, %v6548_v4 }
 0x374   : > { %v16343_v22 = vpop.f32.mrb[8].mxu1 }
 0x375   : > { %v16345_v25 = vpop.f32.mrb[9].mxu1 }
 0x376   : > { %v16347_v33 = vpop.f32.mrb[10].mxu1 }
 0x377   : > { %13262 = vmatmul.mubr.msk.bf16.gmra.mrb[28].mxu0 %vm273_vm0, %v6549_v21  ;;  %v16350_v35 = vpop.f32.mrb[11].mxu1  ;;  %v16365_v21 = vld [vmem:[#allocation9 + $0x170] sm:$0xff]  }
 0x378   : > { %13269 = vmatprep.mubr.msk.bf16.mxu0 %vm273_vm0, %v6842_v45  ;;  %v6845_v45 = vpack.c.bf16 %v6817_v28, %v6816_v13  ;;  %v6823_v13 = vld [vmem:[#allocation2 + $0xf9] sm:$0xff] }
 0x37c   : > { %v16353_v62 = vpop.f32.mrb[12].mxu1 }
 0x37d   : > { %v16355_v59 = vpop.f32.mrb[13].mxu1 }
 0x37e   : > { %v16358_v55 = vpop.f32.mrb[14].mxu1 }
 0x37f   : > { %13270 = vmatmul.mubr.msk.bf16.vlgmr.msra.gmra.mrb[0].mxu0 %vm273_vm0, %v6843_v46  ;;  %v16361_v4 = vpop.f32.mrb[15].mxu1  ;;  %v6821_v46 = vld [vmem:[#allocation2 + $0xe1] sm:$0xff] }
 0x380   : > { %17169 = vst [vmem:[#allocation16_spill] sm:$0xff] %v16361_v4  ;;  %13302 = vmatpush3.bf16.msra.mxu0 %v16312_v57  ;;  %13273 = vmatprep.mubr.msk.bf16.mxu0 %vm273_vm0, %v6844_v54  ;;  %v6822_v54 = vld [vmem:[#allocation2 + $0xf1] sm:$0xff]  ;;  %v6847_v28 = vpack.c.bf16 %v6821_v46, %v6820_v39  ;;  %v6831_v4 = vld [vmem:[#allocation2 + $0x159] sm:$0xff] }
 0x381   : > { %13303 = vmatprep.subr.bf16.mxu0 %v7231_v60  ;;  %v6848_v0 = vpack.c.bf16 %v6823_v13, %v6822_v54  ;;  %v6833_v54 = vld [vmem:[#allocation2 + $0x171] sm:$0xff]  ;;  %v6834_v13 = vld [vmem:[#allocation2 + $0x181] sm:$0xff] }
 0x384   : > { %v16367_v23 = vpop.f32.mrb[16].mxu1  ;;  %13304 = vmatpush3.bf16.msra.mxu0 %v7231_v60  ;;  %v6824_v60 = vld [vmem:[#allocation2 + $0x109] sm:$0xff] }
 0x385   : > { %17170 = vst [vmem:[#allocation17_spill] sm:$0xff] %v16367_v23  ;;  %v16369_v12 = vpop.f32.mrb[17].mxu1  ;;  %13337 = vmatprep.subr.bf16.mxu0 %v16365_v21  ;;  %v6830_v23 = vld [vmem:[#allocation2 + $0x151] sm:$0xff] }
 0x386   : > { %17171 = vst [vmem:[#allocation18_spill] sm:$0xff] %v16369_v12  ;;  %v16372_v37 = vpop.f32.mrb[18].mxu1  ;;  %v6849_v12 = vpack.c.bf16 %v6825_v29, %v6824_v60  ;;  %v6852_v46 = vpack.c.bf16 %v6831_v4, %v6830_v23  ;;  %v6836_v4 = vld [vmem:[#allocation2 + $0x199] sm:$0xff]  ;;  %v6837_v23 = vld [vmem:[#allocation2 + $0x1a1] sm:$0xff] }
 0x387   : > { %17172 = vst [vmem:[#allocation19_spill] sm:$0xff] %v16372_v37  ;;  %13274 = vmatmul.mubr.msk.bf16.gmra.mrb[4].mxu0 %vm273_vm0, %v6845_v45  ;;  %v16375_v57 = vpop.f32.mrb[19].mxu1  ;;  %v6827_v37 = vld [vmem:[#allocation2 + $0x129] sm:$0xff] }
 0x388   : > { %17173 = vst [vmem:[#allocation20_spill] sm:$0xff] %v16375_v57  ;;  %13277 = vmatprep.mubr.msk.bf16.mxu0 %vm273_vm0, %v6846_v40  ;;  %v6850_v45 = vpack.c.bf16 %v6827_v37, %v6826_v20  ;;  %v6828_v40 = vld [vmem:[#allocation2 + $0x139] sm:$0xff]  ;;  %v6829_v57 = vld [vmem:[#allocation2 + $0x141] sm:$0xff] }
 0x389   : > { %v6851_v39 = vpack.c.bf16 %v6829_v57, %v6828_v40  ;;  %v6839_v40 = vld [vmem:[#allocation2 + $0x1b9] sm:$0xff] }
 0x38f   : > { %13278 = vmatmul.mubr.msk.bf16.gmra.mrb[8].mxu0 %vm273_vm0, %v6847_v28  ;;  %v6835_v28 = vld [vmem:[#allocation2 + $0x189] sm:$0xff] }
 0x390   : > { %13281 = vmatprep.mubr.msk.bf16.mxu0 %vm273_vm0, %v6848_v0  ;;  %v6832_v0 = vld [vmem:[#allocation2 + $0x169] sm:$0xff] }
 0x391   : > { %v6853_v60 = vpack.c.bf16 %v6833_v54, %v6832_v0 }
 0x397   : > { %13282 = vmatmul.mubr.msk.bf16.gmra.mrb[12].mxu0 %vm273_vm0, %v6849_v12  ;;  %v6854_v12 = vpack.c.bf16 %v6835_v28, %v6834_v13 }
 0x398   : > { %13285 = vmatprep.mubr.msk.bf16.mxu0 %vm273_vm0, %v6850_v45  ;;  %v6838_v45 = vld [vmem:[#allocation2 + $0x1b1] sm:$0xff] }
 0x399   : > { %v6856_v0 = vpack.c.bf16 %v6839_v40, %v6838_v45 }
 0x39f   : > { %13286 = vmatmul.mubr.msk.bf16.gmra.mrb[16].mxu0 %vm273_vm0, %v6851_v39  ;;  %v6855_v39 = vpack.c.bf16 %v6837_v23, %v6836_v4 }
 0x3a0   : > { %13289 = vmatprep.mubr.msk.bf16.mxu0 %vm273_vm0, %v6852_v46 }
 0x3a4   : > { %v16384_v37 = vpop.f32.mrb[20].mxu1 }
 0x3a5   : > { %17174 = vst [vmem:[#allocation21_spill] sm:$0xff] %v16384_v37  ;;  %v16386_v29 = vpop.f32.mrb[21].mxu1 }
 0x3a6   : > { %17175 = vst [vmem:[#allocation22_spill] sm:$0xff] %v16386_v29  ;;  %v16388_v20 = vpop.f32.mrb[22].mxu1 }
 0x3a7   : > { %17176 = vst [vmem:[#allocation23_spill] sm:$0xff] %v16388_v20  ;;  %13290 = vmatmul.mubr.msk.bf16.gmra.mrb[20].mxu0 %vm273_vm0, %v6853_v60  ;;  %v16391_v57 = vpop.f32.mrb[23].mxu1  ;;  %v6840_v60 = vld [vmem:[#allocation2 + $0x1c9] sm:$0xff] }
 0x3a8   : > { %17177 = vst [vmem:[#allocation24_spill] sm:$0xff] %v16391_v57  ;;  %13293 = vmatprep.mubr.msk.bf16.mxu0 %vm273_vm0, %v6854_v12  ;;  %v6841_v12 = vld [vmem:[#allocation2 + $0x1d1] sm:$0xff]  ;;  %v7118_v57 = vld [vmem:[#allocation2 + $0x62] sm:$0xff] }
 0x3a9   : > { %v7119_v20 = vld [vmem:[#allocation2 + $0x6a] sm:$0xff]  ;;  %v6857_v29 = vpack.c.bf16 %v6841_v12, %v6840_v60 }
 0x3aa   : > { %v7150_v4 = vpack.c.bf16 %v7119_v20, %v7118_v57  ;;  %v7125_v20 = vld [vmem:[#allocation2 + $0xb2] sm:$0xff]  ;;  %v7126_v57 = vld [vmem:[#allocation2 + $0xc2] sm:$0xff] }
 0x3ac   : > { %v16394_v46 = vpop.f32.mrb[24].mxu1 }
 0x3ad   : > { %17178 = vst [vmem:[#allocation25_spill] sm:$0xff] %v16394_v46  ;;  %v16396_v54 = vpop.f32.mrb[25].mxu1 }
 0x3ae   : > { %17179 = vst [vmem:[#allocation26_spill] sm:$0xff] %v16396_v54  ;;  %v16398_v13 = vpop.f32.mrb[26].mxu1  ;;  %v14795_v54 = vld [vmem:[#allocation9 + $0x178] sm:$0x7f]  }
 0x3af   : > { %17180 = vst [vmem:[#allocation27_spill] sm:$0xff] %v16398_v13  ;;  %13294 = vmatmul.mubr.msk.bf16.gmra.mrb[24].mxu0 %vm273_vm0, %v6855_v39  ;;  %v16401_v28 = vpop.f32.mrb[27].mxu1  ;;  %v7120_v39 = vld [vmem:[#allocation2 + $0x7a] sm:$0xff]  ;;  %v7539_v12 = vand.u32 %v14795_v54, %v15356_v5 }
 0x3b0   : > { %17181 = vst [vmem:[#allocation28_spill] sm:$0xff] %v16401_v28  ;;  %13297 = vmatprep.mubr.msk.bf16.mxu0 %vm273_vm0, %v6856_v0  ;;  %v7121_v0 = vld [vmem:[#allocation2 + $0x82] sm:$0xff]  ;;  %v7122_v28 = vld [vmem:[#allocation2 + $0x92] sm:$0xff]  ;;  %v7123_v13 = vld [vmem:[#allocation2 + $0x9a] sm:$0xff] }
 0x3b1   : > { %v7151_v46 = vpack.c.bf16 %v7121_v0, %v7120_v39  ;;  %v7152_v60 = vpack.c.bf16 %v7123_v13, %v7122_v28  ;;  %v7128_v54 = vld [vmem:[#allocation2 + $0xda] sm:$0xff]  ;;  %v7130_v13 = vld [vmem:[#allocation2 + $0xf2] sm:$0xff]  ;;  %v7132_v0 = vld [vmem:[#allocation2 + $0x10a] sm:$0xff] }
 0x3b4   : > { %v16404_v37 = vpop.f32.mrb[28].mxu1 }
 0x3b5   : > { %17182 = vst [vmem:[#allocation29_spill] sm:$0xff] %v16404_v37  ;;  %v16406_v23 = vpop.f32.mrb[29].mxu1  ;;  %v7139_v37 = vld [vmem:[#allocation2 + $0x15a] sm:$0xff] }
 0x3b6   : > { %17183 = vst [vmem:[#allocation30_spill] sm:$0xff] %v16406_v23  ;;  %v16408_v45 = vpop.f32.mrb[30].mxu1 }
 0x3b7   : > { %17184 = vst [vmem:[#allocation31_spill] sm:$0xff] %v16408_v45  ;;  %13298 = vmatmul.mubr.msk.bf16.gmra.mrb[28].mxu0 %vm273_vm0, %v6857_v29  ;;  %v16411_v40 = vpop.f32.mrb[31].mxu1  ;;  %v7124_v29 = vld [vmem:[#allocation2 + $0xaa] sm:$0xff] }
 0x3b8   : > { %17185 = vst [vmem:[#allocation32_spill] sm:$0xff] %v16411_v40  ;;  %13305 = vmatprep.mubr.msk.bf16.mxu0 %vm273_vm0, %v7150_v4  ;;  %v7127_v40 = vld [vmem:[#allocation2 + $0xca] sm:$0xff]  ;;  %v14796_v4 = vld [vmem:[#allocation9 + $0x180] sm:$0xff]   ;;  %v7153_v45 = vpack.c.bf16 %v7125_v20, %v7124_v29 }
 0x3b9   : > { %v7154_v23 = vpack.c.bf16 %v7127_v40, %v7126_v57  ;;  %v7134_v29 = vld [vmem:[#allocation2 + $0x122] sm:$0xff]  ;;  %v7135_v40 = vld [vmem:[#allocation2 + $0x12a] sm:$0xff]  ;;  %v7138_v57 = vld [vmem:[#allocation2 + $0x152] sm:$0xff] }
 0x3ba   : > { %v7158_v20 = vpack.c.bf16 %v7135_v40, %v7134_v29  ;;  %v7149_v29 = vld [vmem:[#allocation2 + $0x1d2] sm:$0xff]  ;;  %v7426_v40 = vld [vmem:[#allocation2 + $0x63] sm:$0xff] }
 0x3bf   : > { %13306 = vmatmul.mubr.msk.bf16.vlgmr.msra.gmra.mrb[0].mxu0 %vm273_vm0, %v7151_v46  ;;  %v7129_v46 = vld [vmem:[#allocation2 + $0xe2] sm:$0xff] }
 0x3c0   : > { %13338 = vmatpush3.bf16.msra.mxu0 %v16365_v21  ;;  %13309 = vmatprep.mubr.msk.bf16.mxu0 %vm273_vm0, %v7152_v60  ;;  %v7131_v21 = vld [vmem:[#allocation2 + $0xfa] sm:$0xff]  ;;  %v7155_v28 = vpack.c.bf16 %v7129_v46, %v7128_v54  ;;  %v7133_v60 = vld [vmem:[#allocation2 + $0x112] sm:$0xff]  ;;  %v7160_v46 = vpack.c.bf16 %v7139_v37, %v7138_v57  ;;  %v7148_v37 = vld [vmem:[#allocation2 + $0x1ca] sm:$0xff] }
 0x3c1   : > { %13339 = vmatprep.subr.bf16.mxu0 %v7539_v12  ;;  %v7156_v39 = vpack.c.bf16 %v7131_v21, %v7130_v13  ;;  %v7140_v13 = vld [vmem:[#allocation2 + $0x16a] sm:$0xff]  ;;  %v7141_v21 = vld [vmem:[#allocation2 + $0x172] sm:$0xff] }
 0x3c4   : > { %13340 = vmatpush3.bf16.msra.mxu0 %v7539_v12  ;;  %v7157_v12 = vpack.c.bf16 %v7133_v60, %v7132_v0  ;;  %v7161_v0 = vpack.c.bf16 %v7141_v21, %v7140_v13 }
 0x3c5   : > { %13373 = vmatprep.subr.bf16.mxu0 %v14796_v4 }
 0x3c7   : > { %13310 = vmatmul.mubr.msk.bf16.gmra.mrb[4].mxu0 %vm273_vm0, %v7153_v45  ;;  %v7137_v45 = vld [vmem:[#allocation2 + $0x142] sm:$0xff] }
 0x3c8   : > { %13313 = vmatprep.mubr.msk.bf16.mxu0 %vm273_vm0, %v7154_v23  ;;  %v7136_v23 = vld [vmem:[#allocation2 + $0x13a] sm:$0xff] }
 0x3c9   : > { %v7159_v54 = vpack.c.bf16 %v7137_v45, %v7136_v23  ;;  %v14797_v45 = vld [vmem:[#allocation9 + $0x188] sm:$0x7f]  }
 0x3ca   : > { %v7847_v57 = vand.u32 %v14797_v45, %v15356_v5  ;;  %v7456_v5 = vld [vmem:[#allocation2 + $0x1cb] sm:$0xff] }
 0x3cf   : > { %13314 = vmatmul.mubr.msk.bf16.gmra.mrb[8].mxu0 %vm273_vm0, %v7155_v28  ;;  %v7142_v28 = vld [vmem:[#allocation2 + $0x182] sm:$0xff] }
 0x3d0   : > { %13317 = vmatprep.mubr.msk.bf16.mxu0 %vm273_vm0, %v7156_v39  ;;  %v7143_v39 = vld [vmem:[#allocation2 + $0x18a] sm:$0xff] }
 0x3d1   : > { %v7162_v60 = vpack.c.bf16 %v7143_v39, %v7142_v28 }
 0x3d7   : > { %13318 = vmatmul.mubr.msk.bf16.gmra.mrb[12].mxu0 %vm273_vm0, %v7157_v12  ;;  %v7427_v12 = vld [vmem:[#allocation2 + $0x6b] sm:$0xff] }
 0x3d8   : > { %13321 = vmatprep.mubr.msk.bf16.mxu0 %vm273_vm0, %v7158_v20  ;;  %v7165_v20 = vpack.c.bf16 %v7149_v29, %v7148_v37  ;;  %v7458_v23 = vpack.c.bf16 %v7427_v12, %v7426_v40 }
 0x3df   : > { %13322 = vmatmul.mubr.msk.bf16.gmra.mrb[16].mxu0 %vm273_vm0, %v7159_v54 }
 0x3e0   : > { %13325 = vmatprep.mubr.msk.bf16.mxu0 %vm273_vm0, %v7160_v46 }
 0x3e7   : > { %13326 = vmatmul.mubr.msk.bf16.gmra.mrb[20].mxu0 %vm273_vm0, %v7161_v0 }
 0x3e8   : > { %13329 = vmatprep.mubr.msk.bf16.mxu0 %vm273_vm0, %v7162_v60 }
 0x3ef   : > { %13330 = vmatmul.mubr.msk.bf16.gmra.mrb[24].mxu0 %vm273_vm0, %v16157_v49  ;;  %v17186_v49 = vmov 0.0  }
 0x3f0   : > { %13333 = vmatprep.mubr.msk.bf16.mxu0 %vm273_vm0, %v16170_v58  ;;  %8146 = vst.msk [vmem:[#allocation4] sm:$0xff] %vm8113_vm4, %v17186_v49  ;;  %8149 = vst.msk [vmem:[#allocation4 + $0x10] sm:$0xff] %vm8113_vm4, %v17186_v49 }
 0x3f1   : > { %8151 = vst.msk [vmem:[#allocation4 + $0x20] sm:$0xff] %vm8113_vm4, %v17186_v49  ;;  %8153 = vst.msk [vmem:[#allocation4 + $0x30] sm:$0xff] %vm8113_vm4, %v17186_v49 }
 0x3f2   : > { %8155 = vst.msk [vmem:[#allocation4 + $0x40] sm:$0xff] %vm8113_vm4, %v17186_v49  ;;  %8157 = vst.msk [vmem:[#allocation4 + $0x50] sm:$0xff] %vm8113_vm4, %v17186_v49 }
 0x3f3   : > { %8159 = vst.msk [vmem:[#allocation4 + $0x60] sm:$0xff] %vm8113_vm4, %v17186_v49  ;;  %8161 = vst.msk [vmem:[#allocation4 + $0x70] sm:$0xff] %vm8113_vm4, %v17186_v49 }
 0x3f4   : > { %8163 = vst.msk [vmem:[#allocation4 + $0x80] sm:$0xff] %vm8113_vm4, %v17186_v49  ;;  %8165 = vst.msk [vmem:[#allocation4 + $0x90] sm:$0xff] %vm8113_vm4, %v17186_v49 }
 0x3f5   : > { %8167 = vst.msk [vmem:[#allocation4 + $0xa0] sm:$0xff] %vm8113_vm4, %v17186_v49  ;;  %8169 = vst.msk [vmem:[#allocation4 + $0xb0] sm:$0xff] %vm8113_vm4, %v17186_v49 }
 0x3f6   : > { %8148 = vst.msk [vmem:[#allocation4 + $0x8] sm:$0xf] %vm8147_vm5, %v17186_v49  ;;  %8150 = vst.msk [vmem:[#allocation4 + $0x18] sm:$0xf] %vm8147_vm5, %v17186_v49 }
 0x3f7   : > { %13334 = vmatmul.mubr.msk.bf16.gmra.mrb[28].mxu0 %vm273_vm0, %v7165_v20  ;;  %8152 = vst.msk [vmem:[#allocation4 + $0x28] sm:$0xf] %vm8147_vm5, %v17186_v49  ;;  %8154 = vst.msk [vmem:[#allocation4 + $0x38] sm:$0xf] %vm8147_vm5, %v17186_v49 }
 0x3f8   : > { %13341 = vmatprep.mubr.msk.bf16.mxu0 %vm273_vm0, %v7458_v23  ;;  %8156 = vst.msk [vmem:[#allocation4 + $0x48] sm:$0xf] %vm8147_vm5, %v17186_v49  ;;  %8158 = vst.msk [vmem:[#allocation4 + $0x58] sm:$0xf] %vm8147_vm5, %v17186_v49 }
 0x3f9   : > { %8160 = vst.msk [vmem:[#allocation4 + $0x68] sm:$0xf] %vm8147_vm5, %v17186_v49  ;;  %8162 = vst.msk [vmem:[#allocation4 + $0x78] sm:$0xf] %vm8147_vm5, %v17186_v49 }
 0x3fa   : > { %8164 = vst.msk [vmem:[#allocation4 + $0x88] sm:$0xf] %vm8147_vm5, %v17186_v49  ;;  %8166 = vst.msk [vmem:[#allocation4 + $0x98] sm:$0xf] %vm8147_vm5, %v17186_v49 }
 0x3fb   : > { %8168 = vst.msk [vmem:[#allocation4 + $0xa8] sm:$0xf] %vm8147_vm5, %v17186_v49  ;;  %8170 = vst.msk [vmem:[#allocation4 + $0xb8] sm:$0xf] %vm8147_vm5, %v17186_v49 }
 0x3fd   : > { %v8283_v58 = vld [vmem:[#allocation4 + $0x1] sm:$0xff] }
 0x3ff   : > { %13342 = vmatmul.mubr.msk.bf16.vlgmr.msra.gmra.mrb[0].mxu0 %vm273_vm0, %v16127_v34  ;;  %v7457_v34 = vld [vmem:[#allocation2 + $0x1d3] sm:$0xff] }
 0x400   : > { %13374 = vmatpush3.bf16.msra.mxu0 %v14796_v4  ;;  %13345 = vmatprep.mubr.msk.bf16.mxu0 %vm273_vm0, %v16137_v3  ;;  %v7473_v3 = vpack.c.bf16 %v7457_v34, %v7456_v5 }
 0x401   : > { %13375 = vmatprep.subr.bf16.mxu0 %v7847_v57 }
 0x404   : > { %13376 = vmatpush3.bf16.msra.mxu0 %v7847_v57 }
 0x407   : > { %13346 = vmatmul.mubr.msk.bf16.gmra.mrb[4].mxu0 %vm273_vm0, %v16139_v36  ;;  %v7764_v36 = vld [vmem:[#allocation2 + $0x1cc] sm:$0xff] }
 0x408   : > { %13349 = vmatprep.mubr.msk.bf16.mxu0 %vm273_vm0, %v16147_v27  ;;  %v7765_v27 = vld [vmem:[#allocation2 + $0x1d4] sm:$0xff] }
 0x40f   : > { %13350 = vmatmul.mubr.msk.bf16.gmra.mrb[8].mxu0 %vm273_vm0, %v16149_v41  ;;  %v7781_v41 = vpack.c.bf16 %v7765_v27, %v7764_v36 }
 0x410   : > { %13353 = vmatprep.mubr.msk.bf16.mxu0 %vm273_vm0, %v16159_v50  ;;  %v14798_v50 = vld [vmem:[#allocation11 + $0x10] sm:$0xff]  }
 0x411   : > { %13409 = vmatprep.subr.bf16.mxu1 %v14798_v50 }
 0x412   : > { %13410 = vmatpush3.bf16.msra.mxu1 %v14798_v50 }
 0x417   : > { %13354 = vmatmul.mubr.msk.bf16.gmra.mrb[12].mxu0 %vm273_vm0, %v16161_v52  ;;  %v14799_v52 = vld [vmem:[#allocation11 + $0x18] sm:$0xff]  }
 0x418   : > { %13357 = vmatprep.mubr.msk.bf16.mxu0 %vm273_vm0, %v16172_v61  ;;  %13411 = vmatprep.subr.bf16.mxu1 %v14799_v52  ;;  %v16543_v61 = vld [vmem:[#allocation4 + $0x11] sm:$0xff] }
 0x419   : > { %13412 = vmatpush3.bf16.msra.mxu1 %v14799_v52 }
 0x41f   : > { %13358 = vmatmul.mubr.msk.bf16.gmra.mrb[16].mxu0 %vm273_vm0, %v16174_v63  ;;  %v8291_v63 = vpack.c.bf16 %v16543_v61, %v8283_v58 }
 0x420   : > { %13361 = vmatprep.mubr.msk.bf16.mxu0 %vm273_vm0, %v16183_v6  ;;  %v16547_v6 = vld [vmem:[#allocation11] sm:$0xff]  }
 0x421   : > { %13413 = vmatprep.mubr.msk.bf16.mxu1 %vm8113_vm4, %v8291_v63  ;;  %13421 = vmatprep.subr.bf16.mxu1 %v16547_v6 }
 0x427   : > { %13362 = vmatmul.mubr.msk.bf16.gmra.mrb[20].mxu0 %vm273_vm0, %v16186_v8 }
 0x428   : > { %13365 = vmatprep.mubr.msk.bf16.mxu0 %vm273_vm0, %v16198_v24  ;;  %v16553_v24 = vld [vmem:[%s17150_s2] ss:$0 sm:$0xff] }
 0x42f   : > { %13366 = vmatmul.mubr.msk.bf16.gmra.mrb[24].mxu0 %vm273_vm0, %v16247_v2 }
 0x430   : > { %13369 = vmatprep.mubr.msk.bf16.mxu0 %vm273_vm0, %v16253_v38 }
 0x437   : > { %13370 = vmatmul.mubr.msk.bf16.gmra.mrb[28].mxu0 %vm273_vm0, %v7473_v3 }
 0x438   : > { %13377 = vmatprep.mubr.msk.bf16.mxu0 %vm273_vm0, %v16258_v43 }
 0x43f   : > { %13378 = vmatmul.mubr.msk.bf16.vlgmr.msra.gmra.mrb[0].mxu0 %vm273_vm0, %v16260_v53 }
 0x440   : > { %13381 = vmatprep.mubr.msk.bf16.mxu0 %vm273_vm0, %v16268_v17 }
 0x447   : > { %13382 = vmatmul.mubr.msk.bf16.gmra.mrb[4].mxu0 %vm273_vm0, %v16270_v19 }
 0x448   : > { %13385 = vmatprep.mubr.msk.bf16.mxu0 %vm273_vm0, %v16276_v10 }
 0x44f   : > { %13386 = vmatmul.mubr.msk.bf16.gmra.mrb[8].mxu0 %vm273_vm0, %v16278_v32 }
 0x450   : > { %13389 = vmatprep.mubr.msk.bf16.mxu0 %vm273_vm0, %v16284_v26 }
 0x457   : > { %13390 = vmatmul.mubr.msk.bf16.gmra.mrb[12].mxu0 %vm273_vm0, %v16201_v14 }
 0x458   : > { %13393 = vmatprep.mubr.msk.bf16.mxu0 %vm273_vm0, %v16211_v18 }
 0x45f   : > { %13394 = vmatmul.mubr.msk.bf16.gmra.mrb[16].mxu0 %vm273_vm0, %v16213_v16 }
 0x460   : > { %13397 = vmatprep.mubr.msk.bf16.mxu0 %vm273_vm0, %v16223_v15 }
 0x467   : > { %13398 = vmatmul.mubr.msk.bf16.gmra.mrb[20].mxu0 %vm273_vm0, %v16225_v51 }
 0x468   : > { %13401 = vmatprep.mubr.msk.bf16.mxu0 %vm273_vm0, %v16235_v31 }
 0x46f   : > { %13402 = vmatmul.mubr.msk.bf16.gmra.mrb[24].mxu0 %vm273_vm0, %v16298_v30 }
 0x470   : > { %13405 = vmatprep.mubr.msk.bf16.mxu0 %vm273_vm0, %v16304_v56 }
 0x477   : > { %13406 = vmatmul.mubr.msk.bf16.gmra.mrb[28].mxu0 %vm273_vm0, %v7781_v41 }
 0x512   : > { %v13379_v8 = vpop.f32.mrb[0].mxu0 }
 0x513   : > { %v13713_v14 = vadd.f32 %v13379_v8, %v16323_v44  ;;  %v7883_v18 = vpop.f32.mrb[1].mxu0 }
 0x514   : > { %v13714_v16 = vadd.f32 %v7883_v18, %v16325_v47  ;;  %v13380_v15 = vpop.f32.mrb[2].mxu0 }
 0x515   : > { %v8051_v51 = vadd.f32 %v13713_v14, %v16553_v24  ;;  %v13715_v31 = vadd.f32 %v13380_v15, %v16327_v48  ;;  %v7886_v2 = vpop.f32.mrb[3].mxu0 }
 0x516   : > { %v8049_v38 = vadd.f32 %v13714_v16, %v16553_v24  ;;  %v13716_v43 = vadd.f32 %v7886_v2, %v16330_v42 }
 0x517   : > { %v8083_v53 = vmax.f32 %v8051_v51, 0.0  ;;  %v8052_v17 = vadd.f32 %v13715_v31, %v16553_v24 }
 0x518   : > { %v8081_v19 = vmax.f32 %v8049_v38, 0.0  ;;  %v8050_v10 = vadd.f32 %v13716_v43, %v16553_v24 }
 0x519   : > { %8116 = vst.msk [vmem:[#allocation3 + $0x10] sm:$0xff] %vm8113_vm4, %v8083_v53  ;;  %v8084_v32 = vmax.f32 %v8052_v17, 0.0 }
 0x51a   : > { %8114 = vst.msk [vmem:[#allocation3] sm:$0xff] %vm8113_vm4, %v8081_v19  ;;  %v8082_v26 = vmax.f32 %v8050_v10, 0.0  ;;  %v13383_v30 = vpop.f32.mrb[4].mxu0  ;;  %v17187_v10 = vld [vmem:[#allocation16_spill] sm:$0xff] }
 0x51b   : > { %8117 = vst.msk [vmem:[#allocation3 + $0x18] sm:$0xff] %vm8113_vm4, %v8084_v32  ;;  %v13717_v56 = vadd.f32 %v13383_v30, %v16333_v1  ;;  %v7899_v44 = vpop.f32.mrb[5].mxu0 }
 0x51c   : > { %8115 = vst.msk [vmem:[#allocation3 + $0x8] sm:$0xff] %vm8113_vm4, %v8082_v26  ;;  %v13718_v47 = vadd.f32 %v7899_v44, %v16335_v7  ;;  %v13384_v48 = vpop.f32.mrb[6].mxu0  ;;  %v16598_v26 = vld [vmem:[#allocation4 + $0x13] sm:$0xff] }
 0x51d   : > { %v8055_v42 = vadd.f32 %v13717_v56, %v16553_v24  ;;  %v13719_v4 = vadd.f32 %v13384_v48, %v16337_v9  ;;  %v7902_v54 = vpop.f32.mrb[7].mxu0 }
 0x51e   : > { %v8053_v46 = vadd.f32 %v13718_v47, %v16553_v24  ;;  %v13720_v13 = vadd.f32 %v7902_v54, %v16340_v11 }
 0x51f   : > { %v8087_v21 = vmax.f32 %v8055_v42, 0.0  ;;  %v8056_v28 = vadd.f32 %v13719_v4, %v16553_v24 }
 0x520   : > { %v8085_v39 = vmax.f32 %v8053_v46, 0.0  ;;  %v8054_v1 = vadd.f32 %v13720_v13, %v16553_v24 }
 0x521   : > { %8120 = vst.msk [vmem:[#allocation3 + $0x30] sm:$0xff] %vm8113_vm4, %v8087_v21  ;;  %v8088_v0 = vmax.f32 %v8056_v28, 0.0 }
 0x522   : > { %v8173_v7 = vld [vmem:[#allocation3 + $0x10] ss:$2 sm:$0xff]  ;;  %v8205_v60 = vld [vmem:[#allocation3 + $0x11] ss:$2 sm:$0xff]  ;;  %8118 = vst.msk [vmem:[#allocation3 + $0x20] sm:$0xff] %vm8113_vm4, %v8085_v39  ;;  %v8086_v37 = vmax.f32 %v8054_v1, 0.0 }
 0x523   : > { %v13387_v9 = vpop.f32.mrb[8].mxu0  ;;  %v8235_v29 = vmax.f32 %v8173_v7, %v8205_v60  ;;  %v8171_v40 = vld [vmem:[#allocation3] ss:$2 sm:$0xff]  ;;  %v8203_v12 = vld [vmem:[#allocation3 + $0x1] ss:$2 sm:$0xff]  ;;  %8121 = vst.msk [vmem:[#allocation3 + $0x38] sm:$0xff] %vm8113_vm4, %v8088_v0 }
 0x524   : > { %v13721_v11 = vadd.f32 %v13387_v9, %v16343_v22  ;;  %v7915_v20 = vpop.f32.mrb[9].mxu0  ;;  %v8234_v23 = vmax.f32 %v8171_v40, %v8203_v12  ;;  %8119 = vst.msk [vmem:[#allocation3 + $0x28] sm:$0xff] %vm8113_vm4, %v8086_v37  ;;  %v17188_v0 = vld [vmem:[#allocation17_spill] sm:$0xff]  ;;  %v17189_v9 = vld [vmem:[#allocation18_spill] sm:$0xff] }
 0x525   : > { %v13722_v45 = vadd.f32 %v7915_v20, %v16345_v25  ;;  %v13388_v57 = vpop.f32.mrb[10].mxu0 }
 0x526   : > { %v8059_v5 = vadd.f32 %v13721_v11, %v16553_v24  ;;  %v13723_v34 = vadd.f32 %v13388_v57, %v16347_v33  ;;  %v7918_v3 = vpop.f32.mrb[11].mxu0  ;;  %v8250_v36 = vmax.f32 %v8234_v23, %v8235_v29  ;;  %v17190_v11 = vld [vmem:[#allocation19_spill] sm:$0xff] }
 0x527   : > { %v8057_v27 = vadd.f32 %v13722_v45, %v16553_v24  ;;  %v13724_v41 = vadd.f32 %v7918_v3, %v16350_v35 }
 0x528   : > { %v8091_v49 = vmax.f32 %v8059_v5, 0.0  ;;  %v8060_v22 = vadd.f32 %v13723_v34, %v16553_v24  ;;  %8259 = vst.msk [vmem:[#allocation4 + $0x22] sm:$0xff] %vm8113_vm4, %v8250_v36  ;;  %v17191_v5 = vld [vmem:[#allocation20_spill] sm:$0xff] }
 0x529   : > { %v8089_v50 = vmax.f32 %v8057_v27, 0.0  ;;  %v8058_v52 = vadd.f32 %v13724_v41, %v16553_v24 }
 0x52a   : > { %8124 = vst.msk [vmem:[#allocation3 + $0x50] sm:$0xff] %vm8113_vm4, %v8091_v49  ;;  %v8092_v25 = vmax.f32 %v8060_v22, 0.0  ;;  %v8177_v58 = vld [vmem:[#allocation3 + $0x30] ss:$2 sm:$0xff]  ;;  %v8209_v63 = vld [vmem:[#allocation3 + $0x31] ss:$2 sm:$0xff] }
 0x52b   : > { %8122 = vst.msk [vmem:[#allocation3 + $0x40] sm:$0xff] %vm8113_vm4, %v8089_v50  ;;  %v8090_v33 = vmax.f32 %v8058_v52, 0.0  ;;  %v13391_v8 = vpop.f32.mrb[12].mxu0  ;;  %v8237_v14 = vmax.f32 %v8177_v58, %v8209_v63  ;;  %v8175_v18 = vld [vmem:[#allocation3 + $0x20] ss:$2 sm:$0xff]  ;;  %v14801_v52 = vld [vmem:[#allocation11 + $0x8] sm:$0xff]  }
 0x52c   : > { %v8207_v35 = vld [vmem:[#allocation3 + $0x21] ss:$2 sm:$0xff]  ;;  %8125 = vst.msk [vmem:[#allocation3 + $0x58] sm:$0xff] %vm8113_vm4, %v8092_v25  ;;  %v13725_v16 = vadd.f32 %v13391_v8, %v16353_v62  ;;  %v7931_v15 = vpop.f32.mrb[13].mxu0  ;;  %v16600_v62 = vld [vmem:[#allocation4 + $0x14] sm:$0xff] }
 0x52d   : > { %v8236_v51 = vmax.f32 %v8175_v18, %v8207_v35  ;;  %8123 = vst.msk [vmem:[#allocation3 + $0x48] sm:$0xff] %vm8113_vm4, %v8090_v33  ;;  %v13726_v31 = vadd.f32 %v7931_v15, %v16355_v59  ;;  %v13392_v2 = vpop.f32.mrb[14].mxu0 }
 0x52e   : > { %v8063_v38 = vadd.f32 %v13725_v16, %v16553_v24  ;;  %v13727_v43 = vadd.f32 %v13392_v2, %v16358_v55  ;;  %v7934_v53 = vpop.f32.mrb[15].mxu0  ;;  %v17192_v16 = vld [vmem:[#allocation21_spill] sm:$0xff]  ;;  %v17193_v2 = vld [vmem:[#allocation22_spill] sm:$0xff] }
 0x52f   : > { %v8251_v17 = vmax.f32 %v8236_v51, %v8237_v14  ;;  %v8061_v19 = vadd.f32 %v13726_v31, %v16553_v24  ;;  %v13728_v32 = vadd.f32 %v7934_v53, %v17187_v10  ;;  %v16605_v47 = vld [vmem:[#allocation4 + $0x23] sm:$0xff]  ;;  %v16640_v53 = vld [vmem:[#allocation11 + $0x20] sm:$0xff]  }
 0x530   : > { %v8095_v30 = vmax.f32 %v8063_v38, 0.0  ;;  %v8064_v56 = vadd.f32 %v13727_v43, %v16553_v24  ;;  %v16607_v55 = vld [vmem:[#allocation4 + $0x24] sm:$0xff]  ;;  %v9171_v42 = vpack.c.bf16 %v16605_v47, %v16598_v26 }
 0x531   : > { %v8093_v44 = vmax.f32 %v8061_v19, 0.0  ;;  %v8062_v59 = vadd.f32 %v13728_v32, %v16553_v24  ;;  %8260 = vst.msk [vmem:[#allocation4 + $0x32] sm:$0xff] %vm8113_vm4, %v8251_v17  ;;  %v9285_v4 = vpack.c.bf16 %v16607_v55, %v16600_v62  ;;  %v16624_v27 = vld [vmem:[#allocation4 + $0x21] sm:$0xff]  ;;  %v17194_v19 = vld [vmem:[#allocation23_spill] sm:$0xff] }
 0x532   : > { %8128 = vst.msk [vmem:[#allocation3 + $0x70] sm:$0xff] %vm8113_vm4, %v8095_v30  ;;  %v8096_v48 = vmax.f32 %v8064_v56, 0.0  ;;  %v13395_v21 = vpop.f32.mrb[16].mxu0 }
 0x533   : > { %v8181_v54 = vld [vmem:[#allocation3 + $0x50] ss:$2 sm:$0xff]  ;;  %v8213_v46 = vld [vmem:[#allocation3 + $0x51] ss:$2 sm:$0xff]  ;;  %8126 = vst.msk [vmem:[#allocation3 + $0x60] sm:$0xff] %vm8113_vm4, %v8093_v44  ;;  %v8094_v13 = vmax.f32 %v8062_v59, 0.0  ;;  %v13729_v7 = vadd.f32 %v13395_v21, %v17188_v0 }
 0x534   : > { %v8239_v28 = vmax.f32 %v8181_v54, %v8213_v46  ;;  %v8179_v39 = vld [vmem:[#allocation3 + $0x40] ss:$2 sm:$0xff]  ;;  %v8211_v1 = vld [vmem:[#allocation3 + $0x41] ss:$2 sm:$0xff]  ;;  %8129 = vst.msk [vmem:[#allocation3 + $0x78] sm:$0xff] %vm8113_vm4, %v8096_v48  ;;  %v7947_v60 = vpop.f32.mrb[17].mxu0 }
 0x535   : > { %v8238_v37 = vmax.f32 %v8179_v39, %v8211_v1  ;;  %8127 = vst.msk [vmem:[#allocation3 + $0x68] sm:$0xff] %vm8113_vm4, %v8094_v13  ;;  %v13730_v29 = vadd.f32 %v7947_v60, %v17189_v9  ;;  %v13396_v40 = vpop.f32.mrb[18].mxu0  ;;  %v8067_v12 = vadd.f32 %v13729_v7, %v16553_v24  ;;  %v17195_v44 = vld [vmem:[#allocation24_spill] sm:$0xff] }
 0x536   : > { %v13731_v20 = vadd.f32 %v13396_v40, %v17190_v11  ;;  %v7950_v23 = vpop.f32.mrb[19].mxu0 }
 0x537   : > { %v8252_v45 = vmax.f32 %v8238_v37, %v8239_v28  ;;  %v8065_v57 = vadd.f32 %v13730_v29, %v16553_v24  ;;  %v13732_v34 = vadd.f32 %v7950_v23, %v17191_v5  ;;  %v8099_v3 = vmax.f32 %v8067_v12, 0.0 }
 0x538   : > { %v8068_v36 = vadd.f32 %v13731_v20, %v16553_v24  ;;  %v8286_v41 = vld [vmem:[#allocation4 + $0x31] sm:$0xff] }
 0x539   : > { %v8097_v49 = vmax.f32 %v8065_v57, 0.0  ;;  %v8066_v22 = vadd.f32 %v13732_v34, %v16553_v24  ;;  %8261 = vst.msk [vmem:[#allocation4 + $0x42] sm:$0xff] %vm8113_vm4, %v8252_v45  ;;  %v16629_v50 = vpack.c.bf16 %v8286_v41, %v16624_v27  ;;  %8132 = vst.msk [vmem:[#allocation3 + $0x90] sm:$0xff] %vm8113_vm4, %v8099_v3  ;;  %v16651_v21 = vld [vmem:[#allocation4 + $0x33] sm:$0xff]  ;;  %v17196_v34 = vld [vmem:[#allocation25_spill] sm:$0xff] }
 0x53a   : > { %v8100_v25 = vmax.f32 %v8068_v36, 0.0  ;;  %v13399_v8 = vpop.f32.mrb[20].mxu0  ;;  %v16658_v0 = vld [vmem:[#allocation4 + $0x34] sm:$0xff] }
 0x53b   : > { %v8185_v58 = vld [vmem:[#allocation3 + $0x70] ss:$2 sm:$0xff]  ;;  %v8217_v63 = vld [vmem:[#allocation3 + $0x71] ss:$2 sm:$0xff]  ;;  %8130 = vst.msk [vmem:[#allocation3 + $0x80] sm:$0xff] %vm8113_vm4, %v8097_v49  ;;  %v8098_v33 = vmax.f32 %v8066_v22, 0.0  ;;  %13414 = vmatmul.mubr.msk.bf16.vlgmr.msra.gmra.mrb[32].mxu1 %vm8113_vm4, %v16629_v50  ;;  %v13733_v15 = vadd.f32 %v13399_v8, %v17192_v16 }
 0x53c   : > { %v8241_v14 = vmax.f32 %v8185_v58, %v8217_v63  ;;  %v8183_v18 = vld [vmem:[#allocation3 + $0x60] ss:$2 sm:$0xff]  ;;  %v8215_v35 = vld [vmem:[#allocation3 + $0x61] ss:$2 sm:$0xff]  ;;  %8133 = vst.msk [vmem:[#allocation3 + $0x98] sm:$0xff] %vm8113_vm4, %v8100_v25  ;;  %v7963_v51 = vpop.f32.mrb[21].mxu0  ;;  %13422 = vmatpush3.bf16.msra.mxu1 %v16547_v6 }
 0x53d   : > { %v8240_v31 = vmax.f32 %v8183_v18, %v8215_v35  ;;  %8131 = vst.msk [vmem:[#allocation3 + $0x88] sm:$0xff] %vm8113_vm4, %v8098_v33  ;;  %v13734_v38 = vadd.f32 %v7963_v51, %v17193_v2  ;;  %v13400_v43 = vpop.f32.mrb[22].mxu0  ;;  %13423 = vmatprep.subr.bf16.mxu1 %v14801_v52  ;;  %v8071_v17 = vadd.f32 %v13733_v15, %v16553_v24  ;;  %v16646_v6 = vld [vmem:[#allocation4 + $0x32] sm:$0xff]  ;;  %v17199_v18 = vld [vmem:[#allocation28_spill] sm:$0xff] }
 0x53e   : > { %v13735_v10 = vadd.f32 %v13400_v43, %v17194_v19  ;;  %v7966_v32 = vpop.f32.mrb[23].mxu0  ;;  %v17197_v49 = vld [vmem:[#allocation26_spill] sm:$0xff]  ;;  %v17198_v58 = vld [vmem:[#allocation27_spill] sm:$0xff] }
 0x53f   : > { %v8253_v30 = vmax.f32 %v8240_v31, %v8241_v14  ;;  %v8069_v56 = vadd.f32 %v13734_v38, %v16553_v24  ;;  %v13736_v59 = vadd.f32 %v7966_v32, %v17195_v44  ;;  %v8103_v48 = vmax.f32 %v8071_v17, 0.0 }
 0x540   : > { %v8072_v54 = vadd.f32 %v13735_v10, %v16553_v24  ;;  %v8287_v46 = vld [vmem:[#allocation4 + $0x41] sm:$0xff]  ;;  %13424 = vmatpush3.bf16.msra.mxu1 %v14801_v52 }
 0x541   : > { %v16649_v13 = vld [vmem:[#allocation4 + $0x42] sm:$0xff]  ;;  %8262 = vst.msk [vmem:[#allocation4 + $0x52] sm:$0xff] %vm8113_vm4, %v8253_v30  ;;  %v8101_v28 = vmax.f32 %v8069_v56, 0.0  ;;  %v8070_v39 = vadd.f32 %v13736_v59, %v16553_v24  ;;  %13433 = vmatprep.subr.bf16.mxu1 %v16640_v53  ;;  %v16662_v60 = vpack.c.bf16 %v8287_v46, %v8286_v41  ;;  %8136 = vst.msk [vmem:[#allocation3 + $0xb0] sm:$0xff] %vm8113_vm4, %v8103_v48 }
 0x542   : > { %v16656_v1 = vld [vmem:[#allocation4 + $0x43] sm:$0xff]  ;;  %v8104_v37 = vmax.f32 %v8072_v54, 0.0  ;;  %v16667_v9 = vpack.c.bf16 %v16649_v13, %v16646_v6  ;;  %v13403_v23 = vpop.f32.mrb[24].mxu0 }
 0x543   : > { %v16660_v7 = vld [vmem:[#allocation4 + $0x44] sm:$0xff]  ;;  %v16671_v29 = vpack.c.bf16 %v16656_v1, %v16651_v21  ;;  %v8189_v12 = vld [vmem:[#allocation3 + $0x90] ss:$2 sm:$0xff]  ;;  %v8221_v11 = vld [vmem:[#allocation3 + $0x91] ss:$2 sm:$0xff]  ;;  %8134 = vst.msk [vmem:[#allocation3 + $0xa0] sm:$0xff] %vm8113_vm4, %v8101_v28  ;;  %v13737_v3 = vadd.f32 %v13403_v23, %v17196_v34 }
 0x544   : > { %v16675_v40 = vpack.c.bf16 %v16660_v7, %v16658_v0  ;;  %v8102_v20 = vmax.f32 %v8070_v39, 0.0  ;;  %v8243_v45 = vmax.f32 %v8189_v12, %v8221_v11  ;;  %v8187_v57 = vld [vmem:[#allocation3 + $0x80] ss:$2 sm:$0xff]  ;;  %v8219_v5 = vld [vmem:[#allocation3 + $0x81] ss:$2 sm:$0xff]  ;;  %8137 = vst.msk [vmem:[#allocation3 + $0xb8] sm:$0xff] %vm8113_vm4, %v8104_v37 }
 0x545   : > { %v7979_v36 = vpop.f32.mrb[25].mxu0  ;;  %v8242_v41 = vmax.f32 %v8187_v57, %v8219_v5  ;;  %v8075_v25 = vadd.f32 %v13737_v3, %v16553_v24  ;;  %v17200_v59 = vld [vmem:[#allocation29_spill] sm:$0xff]  ;;  %v17201_v28 = vld [vmem:[#allocation30_spill] sm:$0xff]  ;;  %v17202_v11 = vld [vmem:[#allocation31_spill] sm:$0xff] }
 0x546   : > { %8135 = vst.msk [vmem:[#allocation3 + $0xa8] sm:$0xff] %vm8113_vm4, %v8102_v20  ;;  %v13738_v22 = vadd.f32 %v7979_v36, %v17197_v49  ;;  %v13404_v52 = vpop.f32.mrb[26].mxu0  ;;  %v17203_v5 = vld [vmem:[#allocation32_spill] sm:$0xff] }
 0x547   : > { %v13739_v63 = vadd.f32 %v13404_v52, %v17198_v58  ;;  %v7982_v33 = vpop.f32.mrb[27].mxu0  ;;  %v8254_v8 = vmax.f32 %v8242_v41, %v8243_v45  ;;  %v8107_v16 = vmax.f32 %v8075_v25, 0.0 }
 0x548   : > { %v8073_v14 = vadd.f32 %v13738_v22, %v16553_v24  ;;  %v13740_v35 = vadd.f32 %v7982_v33, %v17199_v18  ;;  %v8288_v51 = vld [vmem:[#allocation4 + $0x51] sm:$0xff] }
 0x549   : > { %v8076_v15 = vadd.f32 %v13739_v63, %v16553_v24  ;;  %8263 = vst.msk [vmem:[#allocation4 + $0x62] sm:$0xff] %vm8113_vm4, %v8254_v8  ;;  %v16689_v38 = vpack.c.bf16 %v8288_v51, %v8287_v46  ;;  %8140 = vst.msk [vmem:[#allocation3 + $0xd0] sm:$0xff] %vm8113_vm4, %v8107_v16  ;;  %v16703_v3 = vld [vmem:[#allocation4 + $0x52] sm:$0xff] }
 0x54a   : > { %v8105_v31 = vmax.f32 %v8073_v14, 0.0  ;;  %v8074_v2 = vadd.f32 %v13740_v35, %v16553_v24  ;;  %v13407_v32 = vpop.f32.mrb[28].mxu0  ;;  %v16708_v52 = vld [vmem:[#allocation4 + $0x53] sm:$0xff] }
 0x54b   : > { %v8108_v43 = vmax.f32 %v8076_v15, 0.0  ;;  %v8193_v17 = vld [vmem:[#allocation3 + $0xb0] ss:$2 sm:$0xff]  ;;  %v8225_v19 = vld [vmem:[#allocation3 + $0xb1] ss:$2 sm:$0xff]  ;;  %13417 = vmatprep.mubr.msk.bf16.mxu1 %vm8113_vm4, %v16689_v38  ;;  %v13741_v48 = vadd.f32 %v13407_v32, %v17200_v59  ;;  %v7995_v54 = vpop.f32.mrb[29].mxu0 }
 0x54c   : > { %8138 = vst.msk [vmem:[#allocation3 + $0xc0] sm:$0xff] %vm8113_vm4, %v8105_v31  ;;  %v8106_v10 = vmax.f32 %v8074_v2, 0.0  ;;  %v8245_v30 = vmax.f32 %v8193_v17, %v8225_v19  ;;  %v13742_v39 = vadd.f32 %v7995_v54, %v17201_v28  ;;  %v13408_v37 = vpop.f32.mrb[30].mxu0  ;;  %v16714_v33 = vld [vmem:[#allocation4 + $0x54] sm:$0xff] }
 0x54d   : > { %v8191_v56 = vld [vmem:[#allocation3 + $0xa0] ss:$2 sm:$0xff]  ;;  %v8223_v44 = vld [vmem:[#allocation3 + $0xa1] ss:$2 sm:$0xff]  ;;  %8141 = vst.msk [vmem:[#allocation3 + $0xd8] sm:$0xff] %vm8113_vm4, %v8108_v43  ;;  %v8079_v12 = vadd.f32 %v13741_v48, %v16553_v24  ;;  %v13743_v20 = vadd.f32 %v13408_v37, %v17202_v11  ;;  %v7998_v23 = vpop.f32.mrb[31].mxu0 }
 0x54e   : > { %v8244_v46 = vmax.f32 %v8191_v56, %v8223_v44  ;;  %8139 = vst.msk [vmem:[#allocation3 + $0xc8] sm:$0xff] %vm8113_vm4, %v8106_v10  ;;  %v8077_v57 = vadd.f32 %v13742_v39, %v16553_v24  ;;  %v13744_v34 = vadd.f32 %v7998_v23, %v17203_v5  ;;  %v8267_v10 = vld [vmem:[#allocation4] sm:$0xff]  ;;  %v14803_v5 = vld [vmem:[#allocation11 + $0x28] sm:$0xff]  }
 0x54f   : > { %v8111_v36 = vmax.f32 %v8079_v12, 0.0  ;;  %v8080_v41 = vadd.f32 %v13743_v20, %v16553_v24  ;;  %v16748_v12 = vld [vmem:[#allocation4 + $0x30] sm:$0xff]  ;;  %v16752_v23 = vld [vmem:[#allocation4 + $0x20] sm:$0xff] }
 0x550   : > { %v8255_v45 = vmax.f32 %v8244_v46, %v8245_v30  ;;  %v8289_v49 = vld [vmem:[#allocation4 + $0x61] sm:$0xff]  ;;  %v8109_v25 = vmax.f32 %v8077_v57, 0.0  ;;  %v8078_v58 = vadd.f32 %v13744_v34, %v16553_v24  ;;  %v16736_v30 = vld [vmem:[#allocation4 + $0x10] sm:$0xff] }
 0x551   : > { %v16706_v22 = vld [vmem:[#allocation4 + $0x62] sm:$0xff]  ;;  %v16718_v14 = vpack.c.bf16 %v8289_v49, %v8288_v51  ;;  %8144 = vst.msk [vmem:[#allocation3 + $0xf0] sm:$0xff] %vm8113_vm4, %v8111_v36  ;;  %v8112_v18 = vmax.f32 %v8080_v41, 0.0  ;;  %v8275_v44 = vpack.c.bf16 %v16736_v30, %v8267_v10  ;;  %v16750_v20 = vld [vmem:[#allocation4 + $0x50] sm:$0xff] }
 0x552   : > { %8264 = vst.msk [vmem:[#allocation4 + $0x72] sm:$0xff] %vm8113_vm4, %v8255_v45  ;;  %v16712_v63 = vld [vmem:[#allocation4 + $0x63] sm:$0xff]  ;;  %v16723_v35 = vpack.c.bf16 %v16706_v22, %v16703_v3  ;;  %8142 = vst.msk [vmem:[#allocation3 + $0xe0] sm:$0xff] %vm8113_vm4, %v8109_v25  ;;  %v8110_v51 = vmax.f32 %v8078_v58, 0.0  ;;  %v16757_v45 = vpack.c.bf16 %v16748_v12, %v16752_v23  ;;  %v16772_v25 = vld [vmem:[#allocation4 + $0x12] sm:$0xff] }
 0x553   : > { %v16716_v8 = vld [vmem:[#allocation4 + $0x64] sm:$0xff]  ;;  %v16727_v16 = vpack.c.bf16 %v16712_v63, %v16708_v52  ;;  %8145 = vst.msk [vmem:[#allocation3 + $0xf8] sm:$0xff] %vm8113_vm4, %v8112_v18 }
 0x554   : > { %v16731_v24 = vpack.c.bf16 %v16716_v8, %v16714_v33  ;;  %v8197_v15 = vld [vmem:[#allocation3 + $0xd0] ss:$2 sm:$0xff]  ;;  %v8229_v31 = vld [vmem:[#allocation3 + $0xd1] ss:$2 sm:$0xff]  ;;  %8143 = vst.msk [vmem:[#allocation3 + $0xe8] sm:$0xff] %vm8113_vm4, %v8110_v51  ;;  %v16759_v57 = vld [vmem:[#allocation4 + $0x40] sm:$0xff] }
 0x555   : > { %v8247_v2 = vmax.f32 %v8197_v15, %v8229_v31  ;;  %v8195_v43 = vld [vmem:[#allocation3 + $0xc0] ss:$2 sm:$0xff]  ;;  %v8227_v17 = vld [vmem:[#allocation3 + $0xc1] ss:$2 sm:$0xff]  ;;  %v16763_v34 = vpack.c.bf16 %v16750_v20, %v16759_v57 }
 0x556   : > { %v8246_v19 = vmax.f32 %v8195_v43, %v8227_v17  ;;  %v8478_v36 = vld [vmem:[#allocation4 + $0x2] sm:$0xff]  ;;  %v14806_v17 = vld [vmem:[#allocation11 + $0x40] sm:$0xff]  }
 0x557   : > { %v14804_v41 = vld [vmem:[#allocation11 + $0x30] sm:$0xff]   ;;  %v8486_v18 = vpack.c.bf16 %v16772_v25, %v8478_v36  ;;  %v14805_v51 = vld [vmem:[#allocation11 + $0x38] sm:$0xff]  }
 0x558   : > { %v8256_v32 = vmax.f32 %v8246_v19, %v8247_v2  ;;  %v8273_v58 = vld [vmem:[#allocation4 + $0x60] sm:$0xff]  ;;  %v16789_v2 = vpack.c.bf16 %v16703_v3, %v16649_v13  ;;  %v16807_v13 = vpack.c.bf16 %v16651_v21, %v16605_v47  ;;  %v14807_v3 = vld [vmem:[#allocation11 + $0x48] sm:$0xff]  }
 0x559   : > { %v16738_v56 = vld [vmem:[#allocation4 + $0x71] sm:$0xff]  ;;  %v8592_v43 = vld [vmem:[#allocation4 + $0x3] sm:$0xff] }
 0x55a   : > { %8265 = vst.msk [vmem:[#allocation4 + $0x82] sm:$0xff] %vm8113_vm4, %v8256_v32  ;;  %v16743_v59 = vpack.c.bf16 %v16738_v56, %v8289_v49  ;;  %v8201_v48 = vld [vmem:[#allocation3 + $0xf0] ss:$2 sm:$0xff]  ;;  %v8233_v54 = vld [vmem:[#allocation3 + $0xf1] ss:$2 sm:$0xff]  ;;  %v16811_v32 = vpack.c.bf16 %v16708_v52, %v16656_v1  ;;  %v16829_v1 = vpack.c.bf16 %v16658_v0, %v16607_v55  ;;  %v14809_v52 = vld [vmem:[#allocation11 + $0x58] sm:$0xff]  }
 0x55b   : > { %v8249_v46 = vmax.f32 %v8201_v48, %v8233_v54  ;;  %v8199_v28 = vld [vmem:[#allocation3 + $0xe0] ss:$2 sm:$0xff]  ;;  %v8231_v39 = vld [vmem:[#allocation3 + $0xe1] ss:$2 sm:$0xff]  ;;  %v16770_v49 = vld [vmem:[#allocation4 + $0x70] sm:$0xff] }
 0x55c   : > { %13418 = vmatmul.mubr.msk.bf16.gmra.mrb[36].mxu1 %vm8113_vm4, %v16743_v59  ;;  %v8248_v37 = vmax.f32 %v8199_v28, %v8231_v39  ;;  %v16776_v15 = vpack.c.bf16 %v16770_v49, %v8273_v58  ;;  %v16795_v19 = vld [vmem:[#allocation4 + $0x72] sm:$0xff]  ;;  %v14820_v47 = vld [vmem:[#allocation11 + $0xb0] sm:$0xff]  }
 0x55d   : > { %13425 = vmatprep.mubr.msk.bf16.mxu1 %vm8113_vm4, %v8275_v44  ;;  %v16800_v10 = vpack.c.bf16 %v16795_v19, %v16706_v22  ;;  %v8706_v22 = vld [vmem:[#allocation4 + $0x4] sm:$0xff]  ;;  %v16817_v48 = vld [vmem:[#allocation4 + $0x73] sm:$0xff] }
 0x55e   : > { %v8257_v11 = vmax.f32 %v8248_v37, %v8249_v46  ;;  %v14808_v44 = vld [vmem:[#allocation11 + $0x50] sm:$0xff]   ;;  %v8714_v21 = vpack.c.bf16 %v16600_v62, %v8706_v22  ;;  %v16822_v54 = vpack.c.bf16 %v16817_v48, %v16712_v63  ;;  %v16833_v46 = vpack.c.bf16 %v16714_v33, %v16660_v7  ;;  %v14810_v63 = vld [vmem:[#allocation11 + $0x60] sm:$0xff]   ;;  %v14811_v39 = vld [vmem:[#allocation11 + $0x68] sm:$0xff]  }
 0x55f   : > { %v16839_v28 = vld [vmem:[#allocation4 + $0x74] sm:$0xff]  ;;  %v8829_v7 = vpack.c.bf16 %v16752_v23, %v16736_v30  ;;  %v16852_v33 = vpack.c.bf16 %v16759_v57, %v16748_v12  ;;  %v16855_v37 = vpack.c.bf16 %v8273_v58, %v16750_v20  ;;  %v14813_v20 = vld [vmem:[#allocation11 + $0x78] sm:$0xff]  }
 0x560   : > { %8266 = vst.msk [vmem:[#allocation4 + $0x92] sm:$0xff] %vm8113_vm4, %v8257_v11  ;;  %v16843_v0 = vpack.c.bf16 %v16839_v28, %v16716_v8  ;;  %v14812_v8 = vld [vmem:[#allocation11 + $0x70] sm:$0xff]   ;;  %v8943_v11 = vpack.c.bf16 %v16624_v27, %v16543_v61  ;;  %v14814_v23 = vld [vmem:[#allocation11 + $0x80] sm:$0xff]   ;;  %v14821_v62 = vld [vmem:[#allocation11 + $0xb8] sm:$0xff]  }
 0x561   : > { %v16861_v30 = vld [vmem:[#allocation4 + $0x80] sm:$0xff]  ;;  %v14822_v55 = vld [vmem:[#allocation11 + $0xc0] sm:$0xff]  }
 0x562   : > { %v16865_v12 = vpack.c.bf16 %v16861_v30, %v16770_v49  ;;  %v16876_v57 = vld [vmem:[#allocation4 + $0x81] sm:$0xff] }
 0x563   : > { %v16880_v61 = vpack.c.bf16 %v16876_v57, %v16738_v56  ;;  %v14816_v56 = vld [vmem:[#allocation11 + $0x90] sm:$0xff]   ;;  %v14817_v49 = vld [vmem:[#allocation11 + $0x98] sm:$0xff]  }
 0x564   : > { %13426 = vmatmul.mubr.msk.bf16.vlgmr.msra.gmra.mrb[32].mxu1 %vm8113_vm4, %v16757_v45  ;;  %v9056_v36 = vld [vmem:[#allocation4 + $0x82] sm:$0xff] }
 0x565   : > { %13429 = vmatprep.mubr.msk.bf16.mxu1 %vm8113_vm4, %v16763_v34  ;;  %13434 = vmatpush3.bf16.msra.mxu1 %v16640_v53  ;;  %v16781_v53 = vld [vmem:[#allocation4 + $0x22] sm:$0xff] }
 0x566   : > { %13435 = vmatprep.subr.bf16.mxu1 %v14803_v5  ;;  %v16785_v31 = vpack.c.bf16 %v16646_v6, %v16781_v53  ;;  %v8600_v6 = vpack.c.bf16 %v16598_v26, %v8592_v43  ;;  %v9057_v27 = vpack.c.bf16 %v16781_v53, %v16772_v25  ;;  %v14818_v25 = vld [vmem:[#allocation11 + $0xa0] sm:$0xff]   ;;  %v9170_v58 = vld [vmem:[#allocation4 + $0x83] sm:$0xff]  ;;  %v14819_v26 = vld [vmem:[#allocation11 + $0xa8] sm:$0xff]  }
 0x567   : > { %v14824_v43 = vld [vmem:[#allocation11 + $0xd0] sm:$0xff]   ;;  %v16969_v22 = vld [vmem:[#allocation4 + $0x93] sm:$0xff] }
 0x569   : > { %13436 = vmatpush3.bf16.msra.mxu1 %v14803_v5  ;;  %v14815_v5 = vld [vmem:[#allocation11 + $0x88] sm:$0xff]  }
 0x56a   : > { %13445 = vmatprep.subr.bf16.mxu1 %v14804_v41 }
 0x56c   : > { %13430 = vmatmul.mubr.msk.bf16.gmra.mrb[36].mxu1 %vm8113_vm4, %v16776_v15 }
 0x56d   : > { %13437 = vmatprep.mubr.msk.bf16.mxu1 %vm8113_vm4, %v8486_v18  ;;  %v16905_v18 = vpack.c.bf16 %v9170_v58, %v16817_v48  ;;  %v14830_v48 = vld [vmem:[#allocation11 + $0x100] sm:$0xff]  }
 0x574   : > { %13438 = vmatmul.mubr.msk.bf16.vlgmr.msra.gmra.mrb[32].mxu1 %vm8113_vm4, %v16785_v31 }
 0x575   : > { %13441 = vmatprep.mubr.msk.bf16.mxu1 %vm8113_vm4, %v16789_v2  ;;  %13446 = vmatpush3.bf16.msra.mxu1 %v14804_v41  ;;  %v16892_v41 = vpack.c.bf16 %v9056_v36, %v16795_v19 }
 0x576   : > { %13447 = vmatprep.subr.bf16.mxu1 %v14805_v51 }
 0x579   : > { %13448 = vmatpush3.bf16.msra.mxu1 %v14805_v51 }
 0x57a   : > { %13457 = vmatprep.subr.bf16.mxu1 %v14806_v17 }
 0x57c   : > { %13442 = vmatmul.mubr.msk.bf16.gmra.mrb[36].mxu1 %vm8113_vm4, %v16800_v10 }
 0x57d   : > { %13449 = vmatprep.mubr.msk.bf16.mxu1 %vm8113_vm4, %v8600_v6 }
 0x584   : > { %13450 = vmatmul.mubr.msk.bf16.vlgmr.msra.gmra.mrb[32].mxu1 %vm8113_vm4, %v16807_v13 }
 0x585   : > { %13453 = vmatprep.mubr.msk.bf16.mxu1 %vm8113_vm4, %v16811_v32  ;;  %13458 = vmatpush3.bf16.msra.mxu1 %v14806_v17  ;;  %v16942_v17 = vld [vmem:[#allocation4 + $0x91] sm:$0xff] }
 0x586   : > { %13459 = vmatprep.subr.bf16.mxu1 %v14807_v3  ;;  %v16946_v19 = vpack.c.bf16 %v16942_v17, %v16876_v57 }
 0x589   : > { %13460 = vmatpush3.bf16.msra.mxu1 %v14807_v3  ;;  %v14828_v3 = vld [vmem:[#allocation11 + $0xf0] sm:$0xff]  }
 0x58a   : > { %13469 = vmatprep.subr.bf16.mxu1 %v14808_v44 }
 0x58c   : > { %13454 = vmatmul.mubr.msk.bf16.gmra.mrb[36].mxu1 %vm8113_vm4, %v16822_v54 }
 0x58d   : > { %13461 = vmatprep.mubr.msk.bf16.mxu1 %vm8113_vm4, %v8714_v21  ;;  %v16982_v21 = vld [vmem:[#allocation4 + $0x94] sm:$0xff] }
 0x594   : > { %13462 = vmatmul.mubr.msk.bf16.vlgmr.msra.gmra.mrb[32].mxu1 %vm8113_vm4, %v16829_v1 }
 0x595   : > { %13465 = vmatprep.mubr.msk.bf16.mxu1 %vm8113_vm4, %v16833_v46  ;;  %13470 = vmatpush3.bf16.msra.mxu1 %v14808_v44  ;;  %v16972_v44 = vpack.c.bf16 %v16969_v22, %v9170_v58  ;;  %v14844_v58 = vld [vmem:[#allocation11 + $0x170] sm:$0xff]  }
 0x596   : > { %13471 = vmatprep.subr.bf16.mxu1 %v14809_v52 }
 0x599   : > { %13472 = vmatpush3.bf16.msra.mxu1 %v14809_v52 }
 0x59a   : > { %13481 = vmatprep.subr.bf16.mxu1 %v14810_v63 }
 0x59c   : > { %13466 = vmatmul.mubr.msk.bf16.gmra.mrb[36].mxu1 %vm8113_vm4, %v16843_v0 }
 0x59d   : > { %13473 = vmatprep.mubr.msk.bf16.mxu1 %vm8113_vm4, %v8829_v7 }
 0x5a4   : > { %13474 = vmatmul.mubr.msk.bf16.vlgmr.msra.gmra.mrb[32].mxu1 %vm8113_vm4, %v16852_v33 }
 0x5a5   : > { %13477 = vmatprep.mubr.msk.bf16.mxu1 %vm8113_vm4, %v16855_v37  ;;  %13482 = vmatpush3.bf16.msra.mxu1 %v14810_v63  ;;  %v14832_v63 = vld [vmem:[#allocation11 + $0x110] sm:$0xff]  }
 0x5a6   : > { %13483 = vmatprep.subr.bf16.mxu1 %v14811_v39 }
 0x5a9   : > { %13484 = vmatpush3.bf16.msra.mxu1 %v14811_v39  ;;  %v14834_v39 = vld [vmem:[#allocation11 + $0x120] sm:$0xff]  }
 0x5aa   : > { %13493 = vmatprep.subr.bf16.mxu1 %v14812_v8 }
 0x5ac   : > { %13478 = vmatmul.mubr.msk.bf16.gmra.mrb[36].mxu1 %vm8113_vm4, %v16865_v12 }
 0x5ad   : > { %13485 = vmatprep.mubr.msk.bf16.mxu1 %vm8113_vm4, %v8943_v11  ;;  %v17028_v11 = vld [vmem:[#allocation4 + $0xa3] sm:$0xff] }
 0x5b4   : > { %13486 = vmatmul.mubr.msk.bf16.vlgmr.msra.gmra.mrb[32].mxu1 %vm8113_vm4, %v16662_v60 }
 0x5b5   : > { %13489 = vmatprep.mubr.msk.bf16.mxu1 %vm8113_vm4, %v16718_v14  ;;  %13494 = vmatpush3.bf16.msra.mxu1 %v14812_v8 }
 0x5b6   : > { %13495 = vmatprep.subr.bf16.mxu1 %v14813_v20 }
 0x5b9   : > { %13496 = vmatpush3.bf16.msra.mxu1 %v14813_v20  ;;  %v10315_v20 = vpack.c.bf16 %v17028_v11, %v16969_v22 }
 0x5ba   : > { %13505 = vmatprep.subr.bf16.mxu1 %v14814_v23 }
 0x5bc   : > { %13490 = vmatmul.mubr.msk.bf16.gmra.mrb[36].mxu1 %vm8113_vm4, %v16880_v61 }
 0x5bd   : > { %13497 = vmatprep.mubr.msk.bf16.mxu1 %vm8113_vm4, %v9057_v27 }
 0x5c4   : > { %13498 = vmatmul.mubr.msk.bf16.vlgmr.msra.gmra.mrb[32].mxu1 %vm8113_vm4, %v16667_v9 }
 0x5c5   : > { %13501 = vmatprep.mubr.msk.bf16.mxu1 %vm8113_vm4, %v16723_v35  ;;  %13506 = vmatpush3.bf16.msra.mxu1 %v14814_v23  ;;  %v17039_v23 = vld [vmem:[#allocation4 + $0xa4] sm:$0xff] }
 0x5c6   : > { %13507 = vmatprep.subr.bf16.mxu1 %v14815_v5  ;;  %v10429_v57 = vpack.c.bf16 %v17039_v23, %v16982_v21 }
 0x5c9   : > { %13508 = vmatpush3.bf16.msra.mxu1 %v14815_v5  ;;  %v10648_v5 = vld [vmem:[#allocation4 + $0x51] sm:$0xff] }
 0x5ca   : > { %13517 = vmatprep.subr.bf16.mxu1 %v14816_v56 }
 0x5cc   : > { %13502 = vmatmul.mubr.msk.bf16.gmra.mrb[36].mxu1 %vm8113_vm4, %v16892_v41 }
 0x5cd   : > { %13509 = vmatprep.mubr.msk.bf16.mxu1 %vm8113_vm4, %v9171_v42  ;;  %v9284_v42 = vld [vmem:[#allocation4 + $0x84] sm:$0xff] }
 0x5ce   : > { %v16918_v53 = vpack.c.bf16 %v9284_v42, %v16839_v28  ;;  %v16985_v52 = vpack.c.bf16 %v16982_v21, %v9284_v42  ;;  %v16995_v28 = vld [vmem:[#allocation4 + $0xa0] sm:$0xff]  ;;  %v14846_v42 = vld [vmem:[#allocation11 + $0x180] sm:$0xff]  }
 0x5d4   : > { %13510 = vmatmul.mubr.msk.bf16.vlgmr.msra.gmra.mrb[32].mxu1 %vm8113_vm4, %v16671_v29 }
 0x5d5   : > { %13513 = vmatprep.mubr.msk.bf16.mxu1 %vm8113_vm4, %v16727_v16  ;;  %13518 = vmatpush3.bf16.msra.mxu1 %v14816_v56  ;;  %v10647_v56 = vld [vmem:[#allocation4 + $0x41] sm:$0xff] }
 0x5d6   : > { %13519 = vmatprep.subr.bf16.mxu1 %v14817_v49 }
 0x5d9   : > { %13520 = vmatpush3.bf16.msra.mxu1 %v14817_v49  ;;  %v14843_v49 = vld [vmem:[#allocation11 + $0x168] sm:$0xff]  }
 0x5da   : > { %13529 = vmatprep.subr.bf16.mxu1 %v14818_v25 }
 0x5dc   : > { %13514 = vmatmul.mubr.msk.bf16.gmra.mrb[36].mxu1 %vm8113_vm4, %v16905_v18 }
 0x5dd   : > { %13521 = vmatprep.mubr.msk.bf16.mxu1 %vm8113_vm4, %v9285_v4  ;;  %v16928_v4 = vld [vmem:[#allocation4 + $0x90] sm:$0xff] }
 0x5de   : > { %v16932_v51 = vpack.c.bf16 %v16928_v4, %v16861_v30  ;;  %v9973_v7 = vpack.c.bf16 %v16995_v28, %v16928_v4  ;;  %v17017_v30 = vld [vmem:[#allocation4 + $0xa2] sm:$0xff] }
 0x5e4   : > { %13522 = vmatmul.mubr.msk.bf16.vlgmr.msra.gmra.mrb[32].mxu1 %vm8113_vm4, %v16675_v40 }
 0x5e5   : > { %13525 = vmatprep.mubr.msk.bf16.mxu1 %vm8113_vm4, %v16731_v24  ;;  %13530 = vmatpush3.bf16.msra.mxu1 %v14818_v25  ;;  %v10654_v25 = vld [vmem:[#allocation4 + $0xb1] sm:$0xff] }
 0x5e6   : > { %13531 = vmatprep.subr.bf16.mxu1 %v14819_v26 }
 0x5e9   : > { %13532 = vmatpush3.bf16.msra.mxu1 %v14819_v26  ;;  %v14845_v26 = vld [vmem:[#allocation11 + $0x178] sm:$0xff]  }
 0x5ea   : > { %13541 = vmatprep.subr.bf16.mxu1 %v14820_v47 }
 0x5ec   : > { %13526 = vmatmul.mubr.msk.bf16.gmra.mrb[36].mxu1 %vm8113_vm4, %v16918_v53 }
 0x5ed   : > { %13533 = vmatprep.mubr.msk.bf16.mxu1 %vm8113_vm4, %v16757_v45  ;;  %v14823_v45 = vld [vmem:[#allocation11 + $0xc8] sm:$0xff]  }
 0x5f4   : > { %13534 = vmatmul.mubr.msk.bf16.vlgmr.msra.gmra.mrb[32].mxu1 %vm8113_vm4, %v16763_v34 }
 0x5f5   : > { %13537 = vmatprep.mubr.msk.bf16.mxu1 %vm8113_vm4, %v16776_v15  ;;  %13542 = vmatpush3.bf16.msra.mxu1 %v14820_v47  ;;  %v10768_v47 = vld [vmem:[#allocation4 + $0xb2] sm:$0xff] }
 0x5f6   : > { %13543 = vmatprep.subr.bf16.mxu1 %v14821_v62 }
 0x5f9   : > { %13544 = vmatpush3.bf16.msra.mxu1 %v14821_v62 }
 0x5fa   : > { %13553 = vmatprep.subr.bf16.mxu1 %v14822_v55 }
 0x5fc   : > { %13538 = vmatmul.mubr.msk.bf16.gmra.mrb[36].mxu1 %vm8113_vm4, %v16932_v51 }
 0x5fd   : > { %13545 = vmatprep.mubr.msk.bf16.mxu1 %vm8113_vm4, %v16629_v50  ;;  %v14825_v50 = vld [vmem:[#allocation11 + $0xd8] sm:$0xff]  }
 0x604   : > { %13546 = vmatmul.mubr.msk.bf16.vlgmr.msra.gmra.mrb[32].mxu1 %vm8113_vm4, %v16689_v38  ;;  %v14826_v38 = vld [vmem:[#allocation11 + $0xe0] sm:$0xff]  }
 0x605   : > { %13549 = vmatprep.mubr.msk.bf16.mxu1 %vm8113_vm4, %v16743_v59  ;;  %13554 = vmatpush3.bf16.msra.mxu1 %v14822_v55  ;;  %v16956_v59 = vld [vmem:[#allocation4 + $0x92] sm:$0xff]  ;;  %v11901_v55 = vld [vmem:[%s17152_s4] ss:$0 sm:$0xff] }
 0x606   : > { %13555 = vmatprep.subr.bf16.mxu1 %v14823_v45  ;;  %v16959_v6 = vpack.c.bf16 %v16956_v59, %v9056_v36  ;;  %v10655_v36 = vpack.c.bf16 %v10648_v5, %v10647_v56 }
 0x609   : > { %13556 = vmatpush3.bf16.msra.mxu1 %v14823_v45 }
 0x60a   : > { %13565 = vmatprep.subr.bf16.mxu1 %v14824_v43 }
 0x60c   : > { %13550 = vmatmul.mubr.msk.bf16.gmra.mrb[36].mxu1 %vm8113_vm4, %v16946_v19 }
 0x60d   : > { %13557 = vmatprep.mubr.msk.bf16.mxu1 %vm8113_vm4, %v16785_v31  ;;  %v14827_v31 = vld [vmem:[#allocation11 + $0xe8] sm:$0xff]  }
 0x614   : > { %13558 = vmatmul.mubr.msk.bf16.vlgmr.msra.gmra.mrb[32].mxu1 %vm8113_vm4, %v16789_v2 }
 0x615   : > { %13561 = vmatprep.mubr.msk.bf16.mxu1 %vm8113_vm4, %v16800_v10  ;;  %13566 = vmatpush3.bf16.msra.mxu1 %v14824_v43 }
 0x616   : > { %13567 = vmatprep.subr.bf16.mxu1 %v14825_v50 }
 0x619   : > { %13568 = vmatpush3.bf16.msra.mxu1 %v14825_v50 }
 0x61a   : > { %13577 = vmatprep.subr.bf16.mxu1 %v14826_v38 }
 0x61c   : > { %13562 = vmatmul.mubr.msk.bf16.gmra.mrb[36].mxu1 %vm8113_vm4, %v16959_v6 }
 0x61d   : > { %13569 = vmatprep.mubr.msk.bf16.mxu1 %vm8113_vm4, %v16807_v13  ;;  %v14829_v13 = vld [vmem:[#allocation11 + $0xf8] sm:$0xff]  }
 0x624   : > { %13570 = vmatmul.mubr.msk.bf16.vlgmr.msra.gmra.mrb[32].mxu1 %vm8113_vm4, %v16811_v32 }
 0x625   : > { %13573 = vmatprep.mubr.msk.bf16.mxu1 %vm8113_vm4, %v16822_v54  ;;  %13578 = vmatpush3.bf16.msra.mxu1 %v14826_v38 }
 0x626   : > { %13579 = vmatprep.subr.bf16.mxu1 %v14827_v31 }
 0x629   : > { %13580 = vmatpush3.bf16.msra.mxu1 %v14827_v31 }
 0x62a   : > { %13589 = vmatprep.subr.bf16.mxu1 %v14828_v3 }
 0x62c   : > { %13574 = vmatmul.mubr.msk.bf16.gmra.mrb[36].mxu1 %vm8113_vm4, %v16972_v44 }
 0x62d   : > { %13581 = vmatprep.mubr.msk.bf16.mxu1 %vm8113_vm4, %v16829_v1  ;;  %v14831_v1 = vld [vmem:[#allocation11 + $0x108] sm:$0xff]  }
 0x634   : > { %13582 = vmatmul.mubr.msk.bf16.vlgmr.msra.gmra.mrb[32].mxu1 %vm8113_vm4, %v16833_v46 }
 0x635   : > { %13585 = vmatprep.mubr.msk.bf16.mxu1 %vm8113_vm4, %v16843_v0  ;;  %13590 = vmatpush3.bf16.msra.mxu1 %v14828_v3 }
 0x636   : > { %13591 = vmatprep.subr.bf16.mxu1 %v14829_v13 }
 0x639   : > { %13592 = vmatpush3.bf16.msra.mxu1 %v14829_v13 }
 0x63a   : > { %13601 = vmatprep.subr.bf16.mxu1 %v14830_v48 }
 0x63c   : > { %13586 = vmatmul.mubr.msk.bf16.gmra.mrb[36].mxu1 %vm8113_vm4, %v16985_v52 }
 0x63d   : > { %13593 = vmatprep.mubr.msk.bf16.mxu1 %vm8113_vm4, %v16852_v33  ;;  %v14833_v33 = vld [vmem:[#allocation11 + $0x118] sm:$0xff]  }
 0x644   : > { %13594 = vmatmul.mubr.msk.bf16.vlgmr.msra.gmra.mrb[32].mxu1 %vm8113_vm4, %v16855_v37  ;;  %v17006_v37 = vld [vmem:[#allocation4 + $0xa1] sm:$0xff] }
 0x645   : > { %13597 = vmatprep.mubr.msk.bf16.mxu1 %vm8113_vm4, %v16865_v12  ;;  %13602 = vmatpush3.bf16.msra.mxu1 %v14830_v48  ;;  %v10087_v8 = vpack.c.bf16 %v17006_v37, %v16942_v17  ;;  %v10201_v12 = vpack.c.bf16 %v17017_v30, %v16956_v59 }
 0x646   : > { %13603 = vmatprep.subr.bf16.mxu1 %v14831_v1 }
 0x649   : > { %13604 = vmatpush3.bf16.msra.mxu1 %v14831_v1 }
 0x64a   : > { %13613 = vmatprep.subr.bf16.mxu1 %v14832_v63 }
 0x64c   : > { %13598 = vmatmul.mubr.msk.bf16.gmra.mrb[36].mxu1 %vm8113_vm4, %v9973_v7 }
 0x64d   : > { %13605 = vmatprep.mubr.msk.bf16.mxu1 %vm8113_vm4, %v16662_v60  ;;  %v14835_v60 = vld [vmem:[#allocation11 + $0x128] sm:$0xff]  }
 0x654   : > { %13606 = vmatmul.mubr.msk.bf16.vlgmr.msra.gmra.mrb[32].mxu1 %vm8113_vm4, %v16718_v14  ;;  %v14836_v14 = vld [vmem:[#allocation11 + $0x130] sm:$0xff]  }
 0x655   : > { %13609 = vmatprep.mubr.msk.bf16.mxu1 %vm8113_vm4, %v16880_v61  ;;  %13614 = vmatpush3.bf16.msra.mxu1 %v14832_v63  ;;  %v14842_v61 = vld [vmem:[#allocation11 + $0x160] sm:$0xff]  }
 0x656   : > { %13615 = vmatprep.subr.bf16.mxu1 %v14833_v33 }
 0x659   : > { %13616 = vmatpush3.bf16.msra.mxu1 %v14833_v33 }
 0x65a   : > { %13625 = vmatprep.subr.bf16.mxu1 %v14834_v39 }
 0x65c   : > { %13610 = vmatmul.mubr.msk.bf16.gmra.mrb[36].mxu1 %vm8113_vm4, %v10087_v8 }
 0x65d   : > { %13617 = vmatprep.mubr.msk.bf16.mxu1 %vm8113_vm4, %v16667_v9  ;;  %v14837_v9 = vld [vmem:[#allocation11 + $0x138] sm:$0xff]  }
 0x664   : > { %13618 = vmatmul.mubr.msk.bf16.vlgmr.msra.gmra.mrb[32].mxu1 %vm8113_vm4, %v16723_v35  ;;  %v14838_v35 = vld [vmem:[#allocation11 + $0x140] sm:$0xff]  }
 0x665   : > { %13621 = vmatprep.mubr.msk.bf16.mxu1 %vm8113_vm4, %v16892_v41  ;;  %13626 = vmatpush3.bf16.msra.mxu1 %v14834_v39 }
 0x666   : > { %13627 = vmatprep.subr.bf16.mxu1 %v14835_v60 }
 0x669   : > { %13628 = vmatpush3.bf16.msra.mxu1 %v14835_v60 }
 0x66a   : > { %13637 = vmatprep.subr.bf16.mxu1 %v14836_v14 }
 0x66c   : > { %13622 = vmatmul.mubr.msk.bf16.gmra.mrb[36].mxu1 %vm8113_vm4, %v10201_v12 }
 0x66d   : > { %13629 = vmatprep.mubr.msk.bf16.mxu1 %vm8113_vm4, %v16671_v29  ;;  %v14839_v29 = vld [vmem:[#allocation11 + $0x148] sm:$0xff]  }
 0x674   : > { %13630 = vmatmul.mubr.msk.bf16.vlgmr.msra.gmra.mrb[32].mxu1 %vm8113_vm4, %v16727_v16  ;;  %v14840_v16 = vld [vmem:[#allocation11 + $0x150] sm:$0xff]  }
 0x675   : > { %13633 = vmatprep.mubr.msk.bf16.mxu1 %vm8113_vm4, %v16905_v18  ;;  %13638 = vmatpush3.bf16.msra.mxu1 %v14836_v14  ;;  %v10658_v18 = vpack.c.bf16 %v10654_v25, %v17006_v37 }
 0x676   : > { %13639 = vmatprep.subr.bf16.mxu1 %v14837_v9 }
 0x679   : > { %13640 = vmatpush3.bf16.msra.mxu1 %v14837_v9 }
 0x67a   : > { %13649 = vmatprep.subr.bf16.mxu1 %v14838_v35 }
 0x67c   : > { %13634 = vmatmul.mubr.msk.bf16.gmra.mrb[36].mxu1 %vm8113_vm4, %v10315_v20 }
 0x67d   : > { %13641 = vmatprep.mubr.msk.bf16.mxu1 %vm8113_vm4, %v16675_v40  ;;  %v14841_v40 = vld [vmem:[#allocation11 + $0x158] sm:$0xff]  }
 0x684   : > { %13642 = vmatmul.mubr.msk.bf16.vlgmr.msra.gmra.mrb[32].mxu1 %vm8113_vm4, %v16731_v24  ;;  %v10540_v24 = vld [vmem:[#allocation4 + $0xb0] sm:$0xff] }
 0x685   : > { %13645 = vmatprep.mubr.msk.bf16.mxu1 %vm8113_vm4, %v16918_v53  ;;  %13650 = vmatpush3.bf16.msra.mxu1 %v14838_v35  ;;  %v10544_v27 = vpack.c.bf16 %v10540_v24, %v16995_v28  ;;  %v10772_v53 = vpack.c.bf16 %v10768_v47, %v17017_v30 }
 0x686   : > { %13651 = vmatprep.subr.bf16.mxu1 %v14839_v29 }
 0x689   : > { %13652 = vmatpush3.bf16.msra.mxu1 %v14839_v29 }
 0x68a   : > { %13661 = vmatprep.subr.bf16.mxu1 %v14840_v16 }
 0x68c   : > { %13646 = vmatmul.mubr.msk.bf16.gmra.mrb[36].mxu1 %vm8113_vm4, %v10429_v57 }
 0x68d   : > { %13653 = vmatprep.mubr.msk.bf16.mxu1 %vm8113_vm4, %v16763_v34  ;;  %v10650_v34 = vld [vmem:[#allocation4 + $0x71] sm:$0xff] }
 0x694   : > { %13654 = vmatmul.mubr.msk.bf16.vlgmr.msra.gmra.mrb[32].mxu1 %vm8113_vm4, %v16776_v15  ;;  %v10649_v15 = vld [vmem:[#allocation4 + $0x61] sm:$0xff] }
 0x695   : > { %13657 = vmatprep.mubr.msk.bf16.mxu1 %vm8113_vm4, %v16932_v51  ;;  %13662 = vmatpush3.bf16.msra.mxu1 %v14840_v16  ;;  %v10656_v41 = vpack.c.bf16 %v10650_v34, %v10649_v15 }
 0x696   : > { %13663 = vmatprep.subr.bf16.mxu1 %v14841_v40 }
 0x699   : > { %13664 = vmatpush3.bf16.msra.mxu1 %v14841_v40 }
 0x69a   : > { %13673 = vmatprep.subr.bf16.mxu1 %v14842_v61 }
 0x69c   : > { %13658 = vmatmul.mubr.msk.bf16.gmra.mrb[36].mxu1 %vm8113_vm4, %v10544_v27 }
 0x69d   : > { %13665 = vmatprep.mubr.msk.bf16.mxu1 %vm8113_vm4, %v10655_v36 }
 0x6a4   : > { %13666 = vmatmul.mubr.msk.bf16.vlgmr.msra.gmra.mrb[32].mxu1 %vm8113_vm4, %v10656_v41 }
 0x6a5   : > { %13669 = vmatprep.mubr.msk.bf16.mxu1 %vm8113_vm4, %v16946_v19  ;;  %13674 = vmatpush3.bf16.msra.mxu1 %v14842_v61 }
 0x6a6   : > { %13675 = vmatprep.subr.bf16.mxu1 %v14843_v49 }
 0x6a9   : > { %13676 = vmatpush3.bf16.msra.mxu1 %v14843_v49 }
 0x6aa   : > { %13685 = vmatprep.subr.bf16.mxu1 %v14844_v58 }
 0x6ac   : > { %13670 = vmatmul.mubr.msk.bf16.gmra.mrb[36].mxu1 %vm8113_vm4, %v10658_v18 }
 0x6ad   : > { %13677 = vmatprep.mubr.msk.bf16.mxu1 %vm8113_vm4, %v16789_v2  ;;  %v14847_v2 = vld [vmem:[#allocation11 + $0x188] sm:$0xff]  }
 0x6b4   : > { %13678 = vmatmul.mubr.msk.bf16.vlgmr.msra.gmra.mrb[32].mxu1 %vm8113_vm4, %v16800_v10  ;;  %v10882_v10 = vld [vmem:[#allocation4 + $0xb3] sm:$0xff] }
 0x6b5   : > { %13681 = vmatprep.mubr.msk.bf16.mxu1 %vm8113_vm4, %v16959_v6  ;;  %13686 = vmatpush3.bf16.msra.mxu1 %v14844_v58  ;;  %v10886_v62 = vpack.c.bf16 %v10882_v10, %v17028_v11 }
 0x6b6   : > { %13687 = vmatprep.subr.bf16.mxu1 %v14845_v26 }
 0x6b9   : > { %13688 = vmatpush3.bf16.msra.mxu1 %v14845_v26 }
 0x6ba   : > { %13697 = vmatprep.subr.bf16.mxu1 %v14846_v42 }
 0x6bc   : > { %13682 = vmatmul.mubr.msk.bf16.gmra.mrb[36].mxu1 %vm8113_vm4, %v10772_v53 }
 0x6bd   : > { %13689 = vmatprep.mubr.msk.bf16.mxu1 %vm8113_vm4, %v16811_v32  ;;  %v10996_v32 = vld [vmem:[#allocation4 + $0xb4] sm:$0xff] }
 0x6c4   : > { %13690 = vmatmul.mubr.msk.bf16.vlgmr.msra.gmra.mrb[32].mxu1 %vm8113_vm4, %v16822_v54  ;;  %v11000_v54 = vpack.c.bf16 %v10996_v32, %v17039_v23 }
 0x6c5   : > { %13693 = vmatprep.mubr.msk.bf16.mxu1 %vm8113_vm4, %v16972_v44  ;;  %13698 = vmatpush3.bf16.msra.mxu1 %v14846_v42 }
 0x6c6   : > { %13699 = vmatprep.subr.bf16.mxu1 %v14847_v2 }
 0x6c9   : > { %13700 = vmatpush3.bf16.msra.mxu1 %v14847_v2 }
 0x6cc   : > { %13694 = vmatmul.mubr.msk.bf16.gmra.mrb[36].mxu1 %vm8113_vm4, %v10886_v62 }
 0x6cd   : > { %13701 = vmatprep.mubr.msk.bf16.mxu1 %vm8113_vm4, %v16833_v46 }
 0x6d4   : > { %13702 = vmatmul.mubr.msk.bf16.vlgmr.msra.gmra.mrb[32].mxu1 %vm8113_vm4, %v16843_v0 }
 0x6d5   : > { %13705 = vmatprep.mubr.msk.bf16.mxu1 %vm8113_vm4, %v16985_v52 }
 0x6dc   : > { %13706 = vmatmul.mubr.msk.bf16.gmra.mrb[36].mxu1 %vm8113_vm4, %v11000_v54 }
 0x7a7   : > { %v13703_v4 = vpop.f32.mrb[32].mxu1 }
 0x7a8   : > { %v11112_v51 = vadd.f32 %v13703_v4, %v11901_v55  ;;  %v11064_v45 = vpop.f32.mrb[33].mxu1 }
 0x7a9   : > { %v11110_v43 = vadd.f32 %v11901_v55, %v11064_v45  ;;  %v13704_v46 = vpop.f32.mrb[34].mxu1 }
 0x7aa   : > { %v11120_v17 = vmax.f32 %v11112_v51, 0.0  ;;  %v11113_v19 = vadd.f32 %v13704_v46, %v11901_v55  ;;  %v11067_v0 = vpop.f32.mrb[35].mxu1 }
 0x7ab   : > { %v11118_v50 = vmax.f32 %v11110_v43, 0.0  ;;  %v11111_v38 = vadd.f32 %v11901_v55, %v11067_v0 }
 0x7ac   : > { %11128 = vst.msk [vmem:[#allocation5 + $0x10] sm:$0xff] %vm8113_vm4, %v11120_v17  ;;  %v11121_v59 = vmax.f32 %v11113_v19, 0.0 }
 0x7ad   : > { %11126 = vst.msk [vmem:[#allocation5] sm:$0xff] %vm8113_vm4, %v11118_v50  ;;  %v11119_v6 = vmax.f32 %v11111_v38, 0.0 }
 0x7ae   : > { %11129 = vst.msk [vmem:[#allocation5 + $0x18] sm:$0xff] %vm8113_vm4, %v11121_v59 }
 0x7af   : > { %11127 = vst.msk [vmem:[#allocation5 + $0x8] sm:$0xff] %vm8113_vm4, %v11119_v6  ;;  %v13707_v31 = vpop.f32.mrb[36].mxu1 }
 0x7b0   : > { %v11116_v3 = vadd.f32 %v13707_v31, %v11901_v55  ;;  %v11080_v22 = vpop.f32.mrb[37].mxu1 }
 0x7b1   : > { %v11114_v44 = vadd.f32 %v11901_v55, %v11080_v22  ;;  %v13708_v13 = vpop.f32.mrb[38].mxu1 }
 0x7b2   : > { %v11124_v48 = vmax.f32 %v11116_v3, 0.0  ;;  %v11117_v21 = vadd.f32 %v13708_v13, %v11901_v55  ;;  %v11083_v52 = vpop.f32.mrb[39].mxu1 }
 0x7b3   : > { %v11122_v1 = vmax.f32 %v11114_v44, 0.0  ;;  %v11115_v63 = vadd.f32 %v11901_v55, %v11083_v52  ;;  %v11138_v33 = vld [vmem:[#allocation5 + $0x10] ss:$2 sm:$0xf] }
 0x7b4   : > { %11132 = vst.msk [vmem:[#allocation5 + $0x30] sm:$0xff] %vm8113_vm4, %v11124_v48  ;;  %v11125_v28 = vmax.f32 %v11117_v21, 0.0  ;;  %v11134_v7 = vld [vmem:[#allocation5] ss:$2 sm:$0xf] }
 0x7b5   : > { %11130 = vst.msk [vmem:[#allocation5 + $0x20] sm:$0xff] %vm8113_vm4, %v11122_v1  ;;  %v11123_v39 = vmax.f32 %v11115_v63, 0.0  ;;  %v11140_v37 = vld [vmem:[#allocation5 + $0x18] ss:$2 sm:$0xf] }
 0x7b6   : > { %11133 = vst.msk [vmem:[#allocation5 + $0x38] sm:$0xff] %vm8113_vm4, %v11125_v28  ;;  %v11136_v8 = vld [vmem:[#allocation5 + $0x8] ss:$2 sm:$0xf] }
 0x7b7   : > { %v11150_v60 = vld [vmem:[#allocation5 + $0x1] ss:$2 sm:$0xf]  ;;  %11131 = vst.msk [vmem:[#allocation5 + $0x28] sm:$0xff] %vm8113_vm4, %v11123_v39 }
 0x7b8   : > { %v11152_v14 = vld [vmem:[#allocation5 + $0x9] ss:$2 sm:$0xf]  ;;  %v11154_v30 = vld [vmem:[#allocation5 + $0x11] ss:$2 sm:$0xf]  ;;  %v11165_v9 = vmax.f32 %v11134_v7, %v11150_v60 }
 0x7b9   : > { %v11156_v12 = vld [vmem:[#allocation5 + $0x19] ss:$2 sm:$0xf]  ;;  %v11166_v35 = vmax.f32 %v11136_v8, %v11152_v14  ;;  %v11167_v11 = vmax.f32 %v11138_v33, %v11154_v30 }
 0x7ba   : > { %v11168_v20 = vmax.f32 %v11140_v37, %v11156_v12 }
 0x7bb   : > { %v11173_v29 = vmax.f32 %v11165_v9, %v11166_v35  ;;  %v11146_v16 = vld [vmem:[#allocation5 + $0x30] ss:$2 sm:$0xf]  ;;  %v11162_v23 = vld [vmem:[#allocation5 + $0x31] ss:$2 sm:$0xf] }
 0x7bc   : > { %v11174_v57 = vmax.f32 %v11167_v11, %v11168_v20  ;;  %v11142_v40 = vld [vmem:[#allocation5 + $0x20] ss:$2 sm:$0xf]  ;;  %v11158_v24 = vld [vmem:[#allocation5 + $0x21] ss:$2 sm:$0xf]  ;;  %v11171_v36 = vmax.f32 %v11146_v16, %v11162_v23 }
 0x7bd   : > { %11177 = vst.msk [vmem:[%s271_s30] sm:$0xf] %vm8147_vm5, %v11173_v29  ;;  %v11148_v61 = vld [vmem:[#allocation5 + $0x38] ss:$2 sm:$0xf]  ;;  %v11169_v15 = vmax.f32 %v11142_v40, %v11158_v24 }
 0x7be   : > { %v11164_v27 = vld [vmem:[#allocation5 + $0x39] ss:$2 sm:$0xf]  ;;  %11178 = vst.msk [vmem:[%s271_s30 + $0x4] sm:$0xf] %vm8147_vm5, %v11174_v57 }
 0x7bf   : > { %v11144_v5 = vld [vmem:[#allocation5 + $0x28] ss:$2 sm:$0xf]  ;;  %v11160_v56 = vld [vmem:[#allocation5 + $0x29] ss:$2 sm:$0xf]  ;;  %v11172_v34 = vmax.f32 %v11148_v61, %v11164_v27 }
 0x7c0   : > { %v11170_v41 = vmax.f32 %v11144_v5, %v11160_v56 }
 0x7c1   : > { %v11176_v49 = vmax.f32 %v11171_v36, %v11172_v34 }
 0x7c2   : > { %v11175_v25 = vmax.f32 %v11169_v15, %v11170_v41 }
 0x7c3   : > { %11180 = vst.msk [vmem:[%s271_s30 + $0xc] sm:$0xf] %vm8147_vm5, %v11176_v49 }
 0x7c4   : > { %11179 = vst.msk [vmem:[%s271_s30 + $0x8] sm:$0xf] %vm8147_vm5, %v11175_v25 }
 0x7c5   : > { %14948 = shalt.err (!%p14945_p2)
}
 0x7c6   : > { %s14949_s24 = scalar_lea.hbm %s17100_s9, 256  ;;  %s14953_s10 = scalar_lea.hbm %s17153_s5, 512 }
 0x7c7   : > { %p14950_p13 = scmp.ne.s32.totalorder %s17100_s9, %s14949_s24  ;;  %p14954_p4 = scmp.lt.u32.totalorder %s17100_s9, %s17153_s5 }
 0x7c8   : > { %p14955_p5 = scmp.lt.u32.totalorder %s14953_s10, %s14949_s24  ;;  %p14957_p11 = scmp.lt.u32.totalorder %s14949_s24, %s17100_s9 }
 0x7c9   : > { %p14951_p6 = pnand %p14950_p13, %p17204_p0 }
 0x7ca   : > { %p14956_p8 = por %p14955_p5, %p14954_p4 }
 0x7cb   : > { %p14952_p10 = pneg %p14951_p6 }
 0x7cc   : > { %p14958_p1 = por %p14957_p11, %p14956_p8 }
 0x7ce   : > { %p14959_p3 = pnand %p14958_p1, %p14952_p10 }
 0x7d0   : > { %14962 = shalt.err (!%p14959_p3)
}
 0x7d1   : > { %s15017_s30 = smov 64   ;;  %s15018_s22 = smov 4  }
 0x7d2   : > { %14683 = dma.vmem_to_hbm [thread:$0]  (%p17204_p0), %s17102_s15, 256, %s17100_s9, %s11182_s12, %s15017_s30, %s15017_s30, %s15018_s22  }
 0x7d3 PF: > { %s11210_s16 = sand.u32 1, %s14993_s18   ;;  %p17205_p7 = scmp.ne.s32.totalorder %s17160_s25, 0 }
 0x7d4   : > { %p17206_p9 = scmp.ge.s32.totalorder %s15005_s21, 2  ;;  %s11211_s13 = scalar_lea.sflag [#allocation8], %s11210_s16 }
 0x7d6   : > { %p14697_p12 = pnand %p17206_p9, %p17205_p7 }
 0x7d8   : > { %14988 = dma.done.wait (!%p14697_p12), %s11211_s13, 256  }
 0x7d9   : > { %14990 = vsyncadd (!%p14697_p12), %s11211_s13, 4294967040  ;;  %p19_p2 = scmp.ge.s32.totalorder %s15159_s14, 4   ;;  %s17207_s18 = smov %s14997_s19 }
 0x7da   : > { %s17208_s19 = smov %s15001_s20  ;;  %s17209_s20 = smov %s15175_s27 }
 0x7db   : > { %s17210_s21 = smov %s15159_s14  ;;  %21 = sbr.rel (!%p19_p2) target bundleno = 6 (0x6), region = 195 }
 0x7e2   :  { %11216 = vsyncpa [#allocation7], 1 }
 0x7e3   :  { %11218 = vsyncpa [#allocation7 + $0x1], 1 }
 0x7e4   :  { %11219 = vsyncpa [#allocation10], 1 }
 0x7e5   :  { %11220 = vsyncpa [#allocation8], 1 }
 0x7e6   :  { %11222 = vsyncpa [#allocation8 + $0x1], 1 }

</bundles_post_ra>
